<compile_context>
chip_gen: v7x
topology: tpu7x:2x2x1
jax: 0.10.0
libtpu: 0.0.40
codegen_flags: <defaults>
</compile_context>

<pallas_src>
import jax
import jax.numpy as jnp
from jax import lax
from jax.experimental import pallas as pl
from jax.experimental.pallas import tpu as pltpu

EPS = 1e-5


def _vgg_block_kernel(x_ref, w1_ref, sh1_ref, w2_ref, sh2_ref,
                      out_ref, xpad_ref, p1_ref, mid_ref, p2_ref):
    # x_ref   : (1, H, W, Cin)       bf16 unpadded NHWC image
    # w1_ref  : (9*Cin, Cm)          bf16 conv1 taps (BN1 scale folded in), (ky,kx,cin) rows
    # w2_ref  : (9*Cm, Cp)           bf16 conv2 taps (BN2 scale folded in), out chans padded
    # sh*_ref : (1, Cm) / (1, Cp)    f32 folded BN shift (conv bias + running stats folded)
    # out_ref : (1, H//2, W//2, Cp)  f32 pooled output, lane-dense last dim
    # xpad_ref: (H+2, W+2, Cin) f32  scratch: zero-halo padded input
    # p1_ref  : (H*W, 9*Cin)   bf16  scratch: conv1 im2col patch matrix
    # mid_ref : (H+2, W+2, Cm) f32   scratch: zero-halo padded conv1 activation
    # p2_ref  : (H*W, 9*Cm)    bf16  scratch: conv2 im2col patch matrix
    H, W = x_ref.shape[1], x_ref.shape[2]
    Cin = x_ref.shape[3]
    Cm = mid_ref.shape[2]
    Cp = out_ref.shape[3]

    def stage_padded(dst_ref, val):
        # Zero only the 1-element halo (2 row strips + 2 column strips), then one
        # interior store -- no full-buffer zero fill.
        h, w, c = val.shape
        dst_ref[0, :, :] = jnp.zeros((w + 2, c), dst_ref.dtype)
        dst_ref[h + 1, :, :] = jnp.zeros((w + 2, c), dst_ref.dtype)
        dst_ref[1:h + 1, 0:1, :] = jnp.zeros((h, 1, c), dst_ref.dtype)
        dst_ref[1:h + 1, w + 1:w + 2, :] = jnp.zeros((h, 1, c), dst_ref.dtype)
        dst_ref[1:h + 1, 1:w + 1, :] = val.astype(dst_ref.dtype)

    def im2col(src_ref, dst_ref, c):
        # dst[:, t*c:(t+1)*c] = tap t = (ky, kx) of the padded source, flattened.
        for ky in range(3):
            for kx in range(3):
                t = ky * 3 + kx
                tap = src_ref[ky:ky + H, kx:kx + W, :].reshape(H * W, c)
                dst_ref[:, t * c:(t + 1) * c] = tap.astype(dst_ref.dtype)

    # ---- conv1 * BN1-scale: one im2col matmul on the MXU (bf16 in, f32 acc) ----
    stage_padded(xpad_ref, x_ref[0])
    im2col(xpad_ref, p1_ref, Cin)
    a1 = jnp.dot(p1_ref[...], w1_ref[...], preferred_element_type=jnp.float32)
    y1 = jnp.maximum(a1 + sh1_ref[...], 0.0)                      # BN1 shift + ReLU (f32)

    # ---- conv2 * BN2-scale: one im2col matmul, out chans padded to Cp (lane dense) ----
    stage_padded(mid_ref, y1.reshape(H, W, Cm))
    im2col(mid_ref, p2_ref, Cm)
    a2 = jnp.dot(p2_ref[...], w2_ref[...], preferred_element_type=jnp.float32)
    y2 = jnp.maximum(a2 + sh2_ref[...], 0.0)                      # (H*W, Cp) f32

    # ---- MaxPool2d(2, 2) on values (w is the fastest-varying row index) ----
    rw = y2.reshape(H * W // 2, 2, Cp)
    wmax = jnp.maximum(rw[:, 0, :], rw[:, 1, :])                  # max over w-pairs
    pooled = jnp.max(wmax.reshape(H // 2, 2, W // 2, Cp), axis=1)  # max over h-pairs

    # Dropout(p=0.2): identity in eval mode.
    out_ref[0] = pooled.astype(out_ref.dtype)


def init_params(key, in_channels, out_channels):
    ks = jax.random.split(key, 12)
    n = jax.random.normal
    return {
        # conv weights in HWIO (torch (O,I,kh,kw) -> (kh,kw,I,O))
        "w1": 0.1 * n(ks[0], (3, 3, in_channels, out_channels), jnp.float32),
        "b1": 0.1 * n(ks[1], (out_channels,), jnp.float32),
        "g1": 1.0 + 0.1 * n(ks[2], (out_channels,), jnp.float32),
        "beta1": 0.1 * n(ks[3], (out_channels,), jnp.float32),
        "m1": 0.1 * n(ks[4], (out_channels,), jnp.float32),
        "v1": 0.5 + 0.5 * jnp.abs(n(ks[5], (out_channels,), jnp.float32)),
        "w2": 0.1 * n(ks[6], (3, 3, out_channels, out_channels), jnp.float32),
        "b2": 0.1 * n(ks[7], (out_channels,), jnp.float32),
        "g2": 1.0 + 0.1 * n(ks[8], (out_channels,), jnp.float32),
        "beta2": 0.1 * n(ks[9], (out_channels,), jnp.float32),
        "m2": 0.1 * n(ks[10], (out_channels,), jnp.float32),
        "v2": 0.5 + 0.5 * jnp.abs(n(ks[11], (out_channels,), jnp.float32)),
    }


def vgg_block_forward(x_nchw, p):
    """Pallas forward.  x_nchw: (N, Cin, H, W) -> (N, Cm, H//2, W//2)."""
    N, Cin, H, W = x_nchw.shape
    Cm = p["w1"].shape[-1]
    assert H % 2 == 0 and W % 2 == 0, "even spatial sizes only (MaxPool2d(2,2))"

    Cp = ((Cm + 127) // 128) * 128   # lane-dense padded output channels

    # fold BN (running stats): scale goes INTO the conv weights (exact in eval
    # mode); conv bias + running mean go into the per-channel shift.
    sc1 = p["g1"] / jnp.sqrt(p["v1"] + EPS)
    sh1 = sc1 * (p["b1"] - p["m1"]) + p["beta1"]
    sc2 = p["g2"] / jnp.sqrt(p["v2"] + EPS)
    sh2 = sc2 * (p["b2"] - p["m2"]) + p["beta2"]

    # conv taps (scale-folded) flattened for one im2col matmul per conv; bf16 for the MXU
    w1r = (p["w1"] * sc1).reshape(9 * Cin, Cm).astype(jnp.bfloat16)
    w2r = jnp.pad((p["w2"] * sc2).reshape(9 * Cm, Cm),
                  ((0, 0), (0, Cp - Cm))).astype(jnp.bfloat16)
    sh1 = sh1.reshape(1, Cm).astype(jnp.float32)
    sh2 = jnp.pad(sh2, (0, Cp - Cm)).reshape(1, Cp).astype(jnp.float32)

    # NHWC bf16, unpadded: the zero halo is built inside the kernel.
    x_nhwc = jnp.transpose(x_nchw, (0, 2, 3, 1)).astype(jnp.bfloat16)

    flops = 2 * N * H * W * 9 * (Cin * Cm + Cm * Cp)
    bytes_accessed = (x_nhwc.size * 2 + w1r.size * 2 + w2r.size * 2
                      + (sh1.size + sh2.size) * 4
                      + N * (H // 2) * (W // 2) * Cp * 4)

    out = pl.pallas_call(
        _vgg_block_kernel,
        out_shape=jax.ShapeDtypeStruct((N, H // 2, W // 2, Cp), jnp.float32),
        grid=(N,),
        in_specs=[
            pl.BlockSpec((1, H, W, Cin), lambda n: (n, 0, 0, 0)),
            pl.BlockSpec((9 * Cin, Cm), lambda n: (0, 0)),
            pl.BlockSpec((1, Cm), lambda n: (0, 0)),
            pl.BlockSpec((9 * Cm, Cp), lambda n: (0, 0)),
            pl.BlockSpec((1, Cp), lambda n: (0, 0)),
        ],
        out_specs=pl.BlockSpec((1, H // 2, W // 2, Cp), lambda n: (n, 0, 0, 0)),
        scratch_shapes=[
            pltpu.VMEM((H + 2, W + 2, Cin), jnp.float32),
            pltpu.VMEM((H * W, 9 * Cin), jnp.bfloat16),
            pltpu.VMEM((H + 2, W + 2, Cm), jnp.float32),
            pltpu.VMEM((H * W, 9 * Cm), jnp.bfloat16),
        ],
        compiler_params=pltpu.CompilerParams(dimension_semantics=("parallel",)),
        cost_estimate=pl.CostEstimate(flops=flops, transcendentals=0,
                                      bytes_accessed=bytes_accessed),
    )(x_nhwc, w1r, sh1, w2r, sh2)

    out = out[..., :Cm]                        # drop channel padding
    return jnp.transpose(out, (0, 3, 1, 2))    # NHWC -> NCHW


def reference_forward(x_nchw, p):
    """Pure-JAX f32 reference (eval-mode VGGBlock)."""
    dn = ("NHWC", "HWIO", "NHWC")
    h = jnp.transpose(x_nchw, (0, 2, 3, 1)).astype(jnp.float32)

    def stage(h, w, b, g, beta, m, v):
        h = lax.conv_general_dilated(h, w, (1, 1), "SAME", dimension_numbers=dn)
        h = h + b
        h = g * (h - m) / jnp.sqrt(v + EPS) + beta
        return jnp.maximum(h, 0.0)

    h = stage(h, p["w1"], p["b1"], p["g1"], p["beta1"], p["m1"], p["v1"])
    h = stage(h, p["w2"], p["b2"], p["g2"], p["beta2"], p["m2"], p["v2"])
    h = lax.reduce_window(h, -jnp.inf, lax.max, (1, 2, 2, 1), (1, 2, 2, 1), "VALID")
    return jnp.transpose(h, (0, 3, 1, 2))


if __name__ == "__main__":
    key = jax.random.PRNGKey(0)
    k_x, k_p = jax.random.split(key)

    N, Cin, Cout, H, W = 2, 4, 8, 16, 16
    x = jax.random.normal(k_x, (N, Cin, H, W), jnp.float32)
    params = init_params(k_p, Cin, Cout)

    out = jax.block_until_ready(vgg_block_forward(x, params))
    ref = jax.block_until_ready(reference_forward(x, params))

    assert out.shape == (N, Cout, H // 2, W // 2), out.shape
    # kernel uses bf16 MXU inputs (f32 accumulation); reference is pure f32
    assert jnp.allclose(out, ref, rtol=2e-2, atol=2e-2), float(jnp.max(jnp.abs(out - ref)))

    print("KERNEL_OK")
</pallas_src>

<mosaic_0001>
module attributes {stable_mosaic.version = 11 : i64} {
  func.func @_vgg_block_kernel(%arg0: i32, %arg1: memref<1x16x16x4xbf16, #tpu.memory_space<vmem>>, %arg2: memref<36x8xbf16, #tpu.memory_space<vmem>>, %arg3: memref<1x8xf32, #tpu.memory_space<vmem>>, %arg4: memref<72x128xbf16, #tpu.memory_space<vmem>>, %arg5: memref<1x128xf32, #tpu.memory_space<vmem>>, %arg6: memref<1x8x8x128xf32, #tpu.memory_space<vmem>>, %arg7: memref<18x18x4xf32, #tpu.memory_space<vmem>>, %arg8: memref<256x36xbf16, #tpu.memory_space<vmem>>, %arg9: memref<18x18x8xf32, #tpu.memory_space<vmem>>, %arg10: memref<256x72xbf16, #tpu.memory_space<vmem>>) attributes {dimension_semantics = [#tpu.dimension_semantics<parallel>], iteration_bounds = array<i64: 2>, scalar_prefetch = 0 : i64, scratch_operands = 4 : i64, tpu.core_type = #tpu.core_type<tc>, window_params = [{transform_indices = @transform_0, window_bounds = array<i64: 1, 16, 16, 4>}, {pipeline_mode = #tpu.pipeline_mode<synchronous>, transform_indices = @transform_1, window_bounds = array<i64: 36, 8>}, {pipeline_mode = #tpu.pipeline_mode<synchronous>, transform_indices = @transform_2, window_bounds = array<i64: 1, 8>}, {pipeline_mode = #tpu.pipeline_mode<synchronous>, transform_indices = @transform_3, window_bounds = array<i64: 72, 128>}, {pipeline_mode = #tpu.pipeline_mode<synchronous>, transform_indices = @transform_4, window_bounds = array<i64: 1, 128>}, {transform_indices = @transform_5, window_bounds = array<i64: 1, 8, 8, 128>}]} {
    %c0 = arith.constant 0 : index
    %c0_0 = arith.constant 0 : index
    %c0_1 = arith.constant 0 : index
    %c0_2 = arith.constant 0 : index
    %0 = vector.load %arg1[%c0, %c0_0, %c0_1, %c0_2] : memref<1x16x16x4xbf16, #tpu.memory_space<vmem>>, vector<1x16x16x4xbf16>
    %1 = vector.shape_cast %0 : vector<1x16x16x4xbf16> to vector<16x16x4xbf16>
    %cst = arith.constant 0.000000e+00 : f32
    %2 = vector.broadcast %cst : f32 to vector<18x4xf32>
    %c0_3 = arith.constant 0 : index
    %c0_4 = arith.constant 0 : index
    %c0_5 = arith.constant 0 : index
    %3 = vector.load %arg7[%c0_3, %c0_4, %c0_5] : memref<18x18x4xf32, #tpu.memory_space<vmem>>, vector<1x18x4xf32>
    %4 = vector.shape_cast %3 : vector<1x18x4xf32> to vector<18x4xf32>
    %5 = vector.shape_cast %2 : vector<18x4xf32> to vector<1x18x4xf32>
    tpu.vector_store %arg7[%c0_3, %c0_4, %c0_5], %5 {strides = array<i32>} : memref<18x18x4xf32, #tpu.memory_space<vmem>>, vector<1x18x4xf32>,
    %cst_6 = arith.constant 0.000000e+00 : f32
    %6 = vector.broadcast %cst_6 : f32 to vector<18x4xf32>
    %c17 = arith.constant 17 : index
    %c0_7 = arith.constant 0 : index
    %c0_8 = arith.constant 0 : index
    %7 = vector.load %arg7[%c17, %c0_7, %c0_8] : memref<18x18x4xf32, #tpu.memory_space<vmem>>, vector<1x18x4xf32>
    %8 = vector.shape_cast %7 : vector<1x18x4xf32> to vector<18x4xf32>
    %9 = vector.shape_cast %6 : vector<18x4xf32> to vector<1x18x4xf32>
    tpu.vector_store %arg7[%c17, %c0_7, %c0_8], %9 {strides = array<i32>} : memref<18x18x4xf32, #tpu.memory_space<vmem>>, vector<1x18x4xf32>,
    %cst_9 = arith.constant 0.000000e+00 : f32
    %10 = vector.broadcast %cst_9 : f32 to vector<16x1x4xf32>
    %c1 = arith.constant 1 : index
    %c0_10 = arith.constant 0 : index
    %c0_11 = arith.constant 0 : index
    %11 = vector.load %arg7[%c1, %c0_10, %c0_11] : memref<18x18x4xf32, #tpu.memory_space<vmem>>, vector<16x1x4xf32>
    tpu.vector_store %arg7[%c1, %c0_10, %c0_11], %10 {strides = array<i32>} : memref<18x18x4xf32, #tpu.memory_space<vmem>>, vector<16x1x4xf32>,
    %cst_12 = arith.constant 0.000000e+00 : f32
    %12 = vector.broadcast %cst_12 : f32 to vector<16x1x4xf32>
    %c1_13 = arith.constant 1 : index
    %c17_14 = arith.constant 17 : index
    %c0_15 = arith.constant 0 : index
    %13 = vector.load %arg7[%c1_13, %c17_14, %c0_15] : memref<18x18x4xf32, #tpu.memory_space<vmem>>, vector<16x1x4xf32>
    tpu.vector_store %arg7[%c1_13, %c17_14, %c0_15], %12 {strides = array<i32>} : memref<18x18x4xf32, #tpu.memory_space<vmem>>, vector<16x1x4xf32>,
    %14 = arith.extf %1 : vector<16x16x4xbf16> to vector<16x16x4xf32>
    %c1_16 = arith.constant 1 : index
    %c1_17 = arith.constant 1 : index
    %c0_18 = arith.constant 0 : index
    %15 = vector.load %arg7[%c1_16, %c1_17, %c0_18] : memref<18x18x4xf32, #tpu.memory_space<vmem>>, vector<16x16x4xf32>
    tpu.vector_store %arg7[%c1_16, %c1_17, %c0_18], %14 {strides = array<i32>} : memref<18x18x4xf32, #tpu.memory_space<vmem>>, vector<16x16x4xf32>,
    %c0_19 = arith.constant 0 : index
    %c0_20 = arith.constant 0 : index
    %c0_21 = arith.constant 0 : index
    %16 = vector.load %arg7[%c0_19, %c0_20, %c0_21] : memref<18x18x4xf32, #tpu.memory_space<vmem>>, vector<16x16x4xf32>
    %17 = vector.shape_cast %16 : vector<16x16x4xf32> to vector<256x4xf32>
    %18 = arith.truncf %17 : vector<256x4xf32> to vector<256x4xbf16>
    %c0_22 = arith.constant 0 : index
    %c0_23 = arith.constant 0 : index
    %19 = vector.load %arg8[%c0_22, %c0_23] : memref<256x36xbf16, #tpu.memory_space<vmem>>, vector<256x4xbf16>
    tpu.vector_store %arg8[%c0_22, %c0_23], %18 {strides = array<i32>} : memref<256x36xbf16, #tpu.memory_space<vmem>>, vector<256x4xbf16>,
    %c0_24 = arith.constant 0 : index
    %c1_25 = arith.constant 1 : index
    %c0_26 = arith.constant 0 : index
    %20 = vector.load %arg7[%c0_24, %c1_25, %c0_26] : memref<18x18x4xf32, #tpu.memory_space<vmem>>, vector<16x16x4xf32>
    %21 = vector.shape_cast %20 : vector<16x16x4xf32> to vector<256x4xf32>
    %22 = arith.truncf %21 : vector<256x4xf32> to vector<256x4xbf16>
    %c0_27 = arith.constant 0 : index
    %c4 = arith.constant 4 : index
    %23 = vector.load %arg8[%c0_27, %c4] : memref<256x36xbf16, #tpu.memory_space<vmem>>, vector<256x4xbf16>
    tpu.vector_store %arg8[%c0_27, %c4], %22 {strides = array<i32>} : memref<256x36xbf16, #tpu.memory_space<vmem>>, vector<256x4xbf16>,
    %c0_28 = arith.constant 0 : index
    %c2 = arith.constant 2 : index
    %c0_29 = arith.constant 0 : index
    %24 = vector.load %arg7[%c0_28, %c2, %c0_29] : memref<18x18x4xf32, #tpu.memory_space<vmem>>, vector<16x16x4xf32>
    %25 = vector.shape_cast %24 : vector<16x16x4xf32> to vector<256x4xf32>
    %26 = arith.truncf %25 : vector<256x4xf32> to vector<256x4xbf16>
    %c0_30 = arith.constant 0 : index
    %c8 = arith.constant 8 : index
    %27 = vector.load %arg8[%c0_30, %c8] : memref<256x36xbf16, #tpu.memory_space<vmem>>, vector<256x4xbf16>
    tpu.vector_store %arg8[%c0_30, %c8], %26 {strides = array<i32>} : memref<256x36xbf16, #tpu.memory_space<vmem>>, vector<256x4xbf16>,
    %c1_31 = arith.constant 1 : index
    %c0_32 = arith.constant 0 : index
    %c0_33 = arith.constant 0 : index
    %28 = vector.load %arg7[%c1_31, %c0_32, %c0_33] : memref<18x18x4xf32, #tpu.memory_space<vmem>>, vector<16x16x4xf32>
    %29 = vector.shape_cast %28 : vector<16x16x4xf32> to vector<256x4xf32>
    %30 = arith.truncf %29 : vector<256x4xf32> to vector<256x4xbf16>
    %c0_34 = arith.constant 0 : index
    %c12 = arith.constant 12 : index
    %31 = vector.load %arg8[%c0_34, %c12] : memref<256x36xbf16, #tpu.memory_space<vmem>>, vector<256x4xbf16>
    tpu.vector_store %arg8[%c0_34, %c12], %30 {strides = array<i32>} : memref<256x36xbf16, #tpu.memory_space<vmem>>, vector<256x4xbf16>,
    %c1_35 = arith.constant 1 : index
    %c1_36 = arith.constant 1 : index
    %c0_37 = arith.constant 0 : index
    %32 = vector.load %arg7[%c1_35, %c1_36, %c0_37] : memref<18x18x4xf32, #tpu.memory_space<vmem>>, vector<16x16x4xf32>
    %33 = vector.shape_cast %32 : vector<16x16x4xf32> to vector<256x4xf32>
    %34 = arith.truncf %33 : vector<256x4xf32> to vector<256x4xbf16>
    %c0_38 = arith.constant 0 : index
    %c16 = arith.constant 16 : index
    %35 = vector.load %arg8[%c0_38, %c16] : memref<256x36xbf16, #tpu.memory_space<vmem>>, vector<256x4xbf16>
    tpu.vector_store %arg8[%c0_38, %c16], %34 {strides = array<i32>} : memref<256x36xbf16, #tpu.memory_space<vmem>>, vector<256x4xbf16>,
    %c1_39 = arith.constant 1 : index
    %c2_40 = arith.constant 2 : index
    %c0_41 = arith.constant 0 : index
    %36 = vector.load %arg7[%c1_39, %c2_40, %c0_41] : memref<18x18x4xf32, #tpu.memory_space<vmem>>, vector<16x16x4xf32>
    %37 = vector.shape_cast %36 : vector<16x16x4xf32> to vector<256x4xf32>
    %38 = arith.truncf %37 : vector<256x4xf32> to vector<256x4xbf16>
    %c0_42 = arith.constant 0 : index
    %c20 = arith.constant 20 : index
    %39 = vector.load %arg8[%c0_42, %c20] : memref<256x36xbf16, #tpu.memory_space<vmem>>, vector<256x4xbf16>
    tpu.vector_store %arg8[%c0_42, %c20], %38 {strides = array<i32>} : memref<256x36xbf16, #tpu.memory_space<vmem>>, vector<256x4xbf16>,
    %c2_43 = arith.constant 2 : index
    %c0_44 = arith.constant 0 : index
    %c0_45 = arith.constant 0 : index
    %40 = vector.load %arg7[%c2_43, %c0_44, %c0_45] : memref<18x18x4xf32, #tpu.memory_space<vmem>>, vector<16x16x4xf32>
    %41 = vector.shape_cast %40 : vector<16x16x4xf32> to vector<256x4xf32>
    %42 = arith.truncf %41 : vector<256x4xf32> to vector<256x4xbf16>
    %c0_46 = arith.constant 0 : index
    %c24 = arith.constant 24 : index
    %43 = vector.load %arg8[%c0_46, %c24] : memref<256x36xbf16, #tpu.memory_space<vmem>>, vector<256x4xbf16>
    tpu.vector_store %arg8[%c0_46, %c24], %42 {strides = array<i32>} : memref<256x36xbf16, #tpu.memory_space<vmem>>, vector<256x4xbf16>,
    %c2_47 = arith.constant 2 : index
    %c1_48 = arith.constant 1 : index
    %c0_49 = arith.constant 0 : index
    %44 = vector.load %arg7[%c2_47, %c1_48, %c0_49] : memref<18x18x4xf32, #tpu.memory_space<vmem>>, vector<16x16x4xf32>
    %45 = vector.shape_cast %44 : vector<16x16x4xf32> to vector<256x4xf32>
    %46 = arith.truncf %45 : vector<256x4xf32> to vector<256x4xbf16>
    %c0_50 = arith.constant 0 : index
    %c28 = arith.constant 28 : index
    %47 = vector.load %arg8[%c0_50, %c28] : memref<256x36xbf16, #tpu.memory_space<vmem>>, vector<256x4xbf16>
    tpu.vector_store %arg8[%c0_50, %c28], %46 {strides = array<i32>} : memref<256x36xbf16, #tpu.memory_space<vmem>>, vector<256x4xbf16>,
    %c2_51 = arith.constant 2 : index
    %c2_52 = arith.constant 2 : index
    %c0_53 = arith.constant 0 : index
    %48 = vector.load %arg7[%c2_51, %c2_52, %c0_53] : memref<18x18x4xf32, #tpu.memory_space<vmem>>, vector<16x16x4xf32>
    %49 = vector.shape_cast %48 : vector<16x16x4xf32> to vector<256x4xf32>
    %50 = arith.truncf %49 : vector<256x4xf32> to vector<256x4xbf16>
    %c0_54 = arith.constant 0 : index
    %c32 = arith.constant 32 : index
    %51 = vector.load %arg8[%c0_54, %c32] : memref<256x36xbf16, #tpu.memory_space<vmem>>, vector<256x4xbf16>
    tpu.vector_store %arg8[%c0_54, %c32], %50 {strides = array<i32>} : memref<256x36xbf16, #tpu.memory_space<vmem>>, vector<256x4xbf16>,
    %c0_55 = arith.constant 0 : index
    %c0_56 = arith.constant 0 : index
    %52 = vector.load %arg8[%c0_55, %c0_56] : memref<256x36xbf16, #tpu.memory_space<vmem>>, vector<256x36xbf16>
    %c0_57 = arith.constant 0 : index
    %c0_58 = arith.constant 0 : index
    %53 = vector.load %arg2[%c0_57, %c0_58] : memref<36x8xbf16, #tpu.memory_space<vmem>>, vector<36x8xbf16>
    %cst_59 = arith.constant dense<0.000000e+00> : vector<256x8xf32>
    %54 = tpu.matmul %52, %53, %cst_59 {dimension_numbers = #tpu.dot_dimension_numbers<[1], [0], [0], [1], [0, 0, 1, 1], [], []>} : vector<256x36xbf16>, vector<36x8xbf16>, vector<256x8xf32> -> vector<256x8xf32>
    %c0_60 = arith.constant 0 : index
    %c0_61 = arith.constant 0 : index
    %55 = vector.load %arg3[%c0_60, %c0_61] : memref<1x8xf32, #tpu.memory_space<vmem>>, vector<1x8xf32>
    %56 = vector.broadcast %55 : vector<1x8xf32> to vector<256x8xf32>
    %57 = arith.addf %54, %56 : vector<256x8xf32>
    %cst_62 = arith.constant 0.000000e+00 : f32
    %58 = vector.broadcast %cst_62 : f32 to vector<256x8xf32>
    %59 = arith.maximumf %57, %58 : vector<256x8xf32>
    %60 = vector.shape_cast %59 : vector<256x8xf32> to vector<16x16x8xf32>
    %cst_63 = arith.constant 0.000000e+00 : f32
    %61 = vector.broadcast %cst_63 : f32 to vector<18x8xf32>
    %c0_64 = arith.constant 0 : index
    %c0_65 = arith.constant 0 : index
    %c0_66 = arith.constant 0 : index
    %62 = vector.load %arg9[%c0_64, %c0_65, %c0_66] : memref<18x18x8xf32, #tpu.memory_space<vmem>>, vector<1x18x8xf32>
    %63 = vector.shape_cast %62 : vector<1x18x8xf32> to vector<18x8xf32>
    %64 = vector.shape_cast %61 : vector<18x8xf32> to vector<1x18x8xf32>
    tpu.vector_store %arg9[%c0_64, %c0_65, %c0_66], %64 {strides = array<i32>} : memref<18x18x8xf32, #tpu.memory_space<vmem>>, vector<1x18x8xf32>,
    %cst_67 = arith.constant 0.000000e+00 : f32
    %65 = vector.broadcast %cst_67 : f32 to vector<18x8xf32>
    %c17_68 = arith.constant 17 : index
    %c0_69 = arith.constant 0 : index
    %c0_70 = arith.constant 0 : index
    %66 = vector.load %arg9[%c17_68, %c0_69, %c0_70] : memref<18x18x8xf32, #tpu.memory_space<vmem>>, vector<1x18x8xf32>
    %67 = vector.shape_cast %66 : vector<1x18x8xf32> to vector<18x8xf32>
    %68 = vector.shape_cast %65 : vector<18x8xf32> to vector<1x18x8xf32>
    tpu.vector_store %arg9[%c17_68, %c0_69, %c0_70], %68 {strides = array<i32>} : memref<18x18x8xf32, #tpu.memory_space<vmem>>, vector<1x18x8xf32>,
    %cst_71 = arith.constant 0.000000e+00 : f32
    %69 = vector.broadcast %cst_71 : f32 to vector<16x1x8xf32>
    %c1_72 = arith.constant 1 : index
    %c0_73 = arith.constant 0 : index
    %c0_74 = arith.constant 0 : index
    %70 = vector.load %arg9[%c1_72, %c0_73, %c0_74] : memref<18x18x8xf32, #tpu.memory_space<vmem>>, vector<16x1x8xf32>
    tpu.vector_store %arg9[%c1_72, %c0_73, %c0_74], %69 {strides = array<i32>} : memref<18x18x8xf32, #tpu.memory_space<vmem>>, vector<16x1x8xf32>,
    %cst_75 = arith.constant 0.000000e+00 : f32
    %71 = vector.broadcast %cst_75 : f32 to vector<16x1x8xf32>
    %c1_76 = arith.constant 1 : index
    %c17_77 = arith.constant 17 : index
    %c0_78 = arith.constant 0 : index
    %72 = vector.load %arg9[%c1_76, %c17_77, %c0_78] : memref<18x18x8xf32, #tpu.memory_space<vmem>>, vector<16x1x8xf32>
    tpu.vector_store %arg9[%c1_76, %c17_77, %c0_78], %71 {strides = array<i32>} : memref<18x18x8xf32, #tpu.memory_space<vmem>>, vector<16x1x8xf32>,
    %c1_79 = arith.constant 1 : index
    %c1_80 = arith.constant 1 : index
    %c0_81 = arith.constant 0 : index
    %73 = vector.load %arg9[%c1_79, %c1_80, %c0_81] : memref<18x18x8xf32, #tpu.memory_space<vmem>>, vector<16x16x8xf32>
    tpu.vector_store %arg9[%c1_79, %c1_80, %c0_81], %60 {strides = array<i32>} : memref<18x18x8xf32, #tpu.memory_space<vmem>>, vector<16x16x8xf32>,
    %c0_82 = arith.constant 0 : index
    %c0_83 = arith.constant 0 : index
    %c0_84 = arith.constant 0 : index
    %74 = vector.load %arg9[%c0_82, %c0_83, %c0_84] : memref<18x18x8xf32, #tpu.memory_space<vmem>>, vector<16x16x8xf32>
    %75 = vector.shape_cast %74 : vector<16x16x8xf32> to vector<256x8xf32>
    %76 = arith.truncf %75 : vector<256x8xf32> to vector<256x8xbf16>
    %c0_85 = arith.constant 0 : index
    %c0_86 = arith.constant 0 : index
    %77 = vector.load %arg10[%c0_85, %c0_86] : memref<256x72xbf16, #tpu.memory_space<vmem>>, vector<256x8xbf16>
    tpu.vector_store %arg10[%c0_85, %c0_86], %76 {strides = array<i32>} : memref<256x72xbf16, #tpu.memory_space<vmem>>, vector<256x8xbf16>,
    %c0_87 = arith.constant 0 : index
    %c1_88 = arith.constant 1 : index
    %c0_89 = arith.constant 0 : index
    %78 = vector.load %arg9[%c0_87, %c1_88, %c0_89] : memref<18x18x8xf32, #tpu.memory_space<vmem>>, vector<16x16x8xf32>
    %79 = vector.shape_cast %78 : vector<16x16x8xf32> to vector<256x8xf32>
    %80 = arith.truncf %79 : vector<256x8xf32> to vector<256x8xbf16>
    %c0_90 = arith.constant 0 : index
    %c8_91 = arith.constant 8 : index
    %81 = vector.load %arg10[%c0_90, %c8_91] : memref<256x72xbf16, #tpu.memory_space<vmem>>, vector<256x8xbf16>
    tpu.vector_store %arg10[%c0_90, %c8_91], %80 {strides = array<i32>} : memref<256x72xbf16, #tpu.memory_space<vmem>>, vector<256x8xbf16>,
    %c0_92 = arith.constant 0 : index
    %c2_93 = arith.constant 2 : index
    %c0_94 = arith.constant 0 : index
    %82 = vector.load %arg9[%c0_92, %c2_93, %c0_94] : memref<18x18x8xf32, #tpu.memory_space<vmem>>, vector<16x16x8xf32>
    %83 = vector.shape_cast %82 : vector<16x16x8xf32> to vector<256x8xf32>
    %84 = arith.truncf %83 : vector<256x8xf32> to vector<256x8xbf16>
    %c0_95 = arith.constant 0 : index
    %c16_96 = arith.constant 16 : index
    %85 = vector.load %arg10[%c0_95, %c16_96] : memref<256x72xbf16, #tpu.memory_space<vmem>>, vector<256x8xbf16>
    tpu.vector_store %arg10[%c0_95, %c16_96], %84 {strides = array<i32>} : memref<256x72xbf16, #tpu.memory_space<vmem>>, vector<256x8xbf16>,
    %c1_97 = arith.constant 1 : index
    %c0_98 = arith.constant 0 : index
    %c0_99 = arith.constant 0 : index
    %86 = vector.load %arg9[%c1_97, %c0_98, %c0_99] : memref<18x18x8xf32, #tpu.memory_space<vmem>>, vector<16x16x8xf32>
    %87 = vector.shape_cast %86 : vector<16x16x8xf32> to vector<256x8xf32>
    %88 = arith.truncf %87 : vector<256x8xf32> to vector<256x8xbf16>
    %c0_100 = arith.constant 0 : index
    %c24_101 = arith.constant 24 : index
    %89 = vector.load %arg10[%c0_100, %c24_101] : memref<256x72xbf16, #tpu.memory_space<vmem>>, vector<256x8xbf16>
    tpu.vector_store %arg10[%c0_100, %c24_101], %88 {strides = array<i32>} : memref<256x72xbf16, #tpu.memory_space<vmem>>, vector<256x8xbf16>,
    %c1_102 = arith.constant 1 : index
    %c1_103 = arith.constant 1 : index
    %c0_104 = arith.constant 0 : index
    %90 = vector.load %arg9[%c1_102, %c1_103, %c0_104] : memref<18x18x8xf32, #tpu.memory_space<vmem>>, vector<16x16x8xf32>
    %91 = vector.shape_cast %90 : vector<16x16x8xf32> to vector<256x8xf32>
    %92 = arith.truncf %91 : vector<256x8xf32> to vector<256x8xbf16>
    %c0_105 = arith.constant 0 : index
    %c32_106 = arith.constant 32 : index
    %93 = vector.load %arg10[%c0_105, %c32_106] : memref<256x72xbf16, #tpu.memory_space<vmem>>, vector<256x8xbf16>
    tpu.vector_store %arg10[%c0_105, %c32_106], %92 {strides = array<i32>} : memref<256x72xbf16, #tpu.memory_space<vmem>>, vector<256x8xbf16>,
    %c1_107 = arith.constant 1 : index
    %c2_108 = arith.constant 2 : index
    %c0_109 = arith.constant 0 : index
    %94 = vector.load %arg9[%c1_107, %c2_108, %c0_109] : memref<18x18x8xf32, #tpu.memory_space<vmem>>, vector<16x16x8xf32>
    %95 = vector.shape_cast %94 : vector<16x16x8xf32> to vector<256x8xf32>
    %96 = arith.truncf %95 : vector<256x8xf32> to vector<256x8xbf16>
    %c0_110 = arith.constant 0 : index
    %c40 = arith.constant 40 : index
    %97 = vector.load %arg10[%c0_110, %c40] : memref<256x72xbf16, #tpu.memory_space<vmem>>, vector<256x8xbf16>
    tpu.vector_store %arg10[%c0_110, %c40], %96 {strides = array<i32>} : memref<256x72xbf16, #tpu.memory_space<vmem>>, vector<256x8xbf16>,
    %c2_111 = arith.constant 2 : index
    %c0_112 = arith.constant 0 : index
    %c0_113 = arith.constant 0 : index
    %98 = vector.load %arg9[%c2_111, %c0_112, %c0_113] : memref<18x18x8xf32, #tpu.memory_space<vmem>>, vector<16x16x8xf32>
    %99 = vector.shape_cast %98 : vector<16x16x8xf32> to vector<256x8xf32>
    %100 = arith.truncf %99 : vector<256x8xf32> to vector<256x8xbf16>
    %c0_114 = arith.constant 0 : index
    %c48 = arith.constant 48 : index
    %101 = vector.load %arg10[%c0_114, %c48] : memref<256x72xbf16, #tpu.memory_space<vmem>>, vector<256x8xbf16>
    tpu.vector_store %arg10[%c0_114, %c48], %100 {strides = array<i32>} : memref<256x72xbf16, #tpu.memory_space<vmem>>, vector<256x8xbf16>,
    %c2_115 = arith.constant 2 : index
    %c1_116 = arith.constant 1 : index
    %c0_117 = arith.constant 0 : index
    %102 = vector.load %arg9[%c2_115, %c1_116, %c0_117] : memref<18x18x8xf32, #tpu.memory_space<vmem>>, vector<16x16x8xf32>
    %103 = vector.shape_cast %102 : vector<16x16x8xf32> to vector<256x8xf32>
    %104 = arith.truncf %103 : vector<256x8xf32> to vector<256x8xbf16>
    %c0_118 = arith.constant 0 : index
    %c56 = arith.constant 56 : index
    %105 = vector.load %arg10[%c0_118, %c56] : memref<256x72xbf16, #tpu.memory_space<vmem>>, vector<256x8xbf16>
    tpu.vector_store %arg10[%c0_118, %c56], %104 {strides = array<i32>} : memref<256x72xbf16, #tpu.memory_space<vmem>>, vector<256x8xbf16>,
    %c2_119 = arith.constant 2 : index
    %c2_120 = arith.constant 2 : index
    %c0_121 = arith.constant 0 : index
    %106 = vector.load %arg9[%c2_119, %c2_120, %c0_121] : memref<18x18x8xf32, #tpu.memory_space<vmem>>, vector<16x16x8xf32>
    %107 = vector.shape_cast %106 : vector<16x16x8xf32> to vector<256x8xf32>
    %108 = arith.truncf %107 : vector<256x8xf32> to vector<256x8xbf16>
    %c0_122 = arith.constant 0 : index
    %c64 = arith.constant 64 : index
    %109 = vector.load %arg10[%c0_122, %c64] : memref<256x72xbf16, #tpu.memory_space<vmem>>, vector<256x8xbf16>
    tpu.vector_store %arg10[%c0_122, %c64], %108 {strides = array<i32>} : memref<256x72xbf16, #tpu.memory_space<vmem>>, vector<256x8xbf16>,
    %c0_123 = arith.constant 0 : index
    %c0_124 = arith.constant 0 : index
    %110 = vector.load %arg10[%c0_123, %c0_124] : memref<256x72xbf16, #tpu.memory_space<vmem>>, vector<256x72xbf16>
    %c0_125 = arith.constant 0 : index
    %c0_126 = arith.constant 0 : index
    %111 = vector.load %arg4[%c0_125, %c0_126] : memref<72x128xbf16, #tpu.memory_space<vmem>>, vector<72x128xbf16>
    %cst_127 = arith.constant dense<0.000000e+00> : vector<256x128xf32>
    %112 = tpu.matmul %110, %111, %cst_127 {dimension_numbers = #tpu.dot_dimension_numbers<[1], [0], [0], [1], [0, 0, 1, 1], [], []>} : vector<256x72xbf16>, vector<72x128xbf16>, vector<256x128xf32> -> vector<256x128xf32>
    %c0_128 = arith.constant 0 : index
    %c0_129 = arith.constant 0 : index
    %113 = vector.load %arg5[%c0_128, %c0_129] : memref<1x128xf32, #tpu.memory_space<vmem>>, vector<1x128xf32>
    %114 = vector.broadcast %113 : vector<1x128xf32> to vector<256x128xf32>
    %115 = arith.addf %112, %114 : vector<256x128xf32>
    %cst_130 = arith.constant 0.000000e+00 : f32
    %116 = vector.broadcast %cst_130 : f32 to vector<256x128xf32>
    %117 = arith.maximumf %115, %116 : vector<256x128xf32>
    %118 = vector.shape_cast %117 : vector<256x128xf32> to vector<128x2x128xf32>
    %119 = vector.extract_strided_slice %118 {offsets = [0, 0, 0], sizes = [128, 1, 128], strides = [1, 1, 1]} : vector<128x2x128xf32> to vector<128x1x128xf32>
    %120 = vector.shape_cast %119 : vector<128x1x128xf32> to vector<128x128xf32>
    %121 = vector.extract_strided_slice %118 {offsets = [0, 1, 0], sizes = [128, 1, 128], strides = [1, 1, 1]} : vector<128x2x128xf32> to vector<128x1x128xf32>
    %122 = vector.shape_cast %121 : vector<128x1x128xf32> to vector<128x128xf32>
    %123 = arith.maximumf %120, %122 : vector<128x128xf32>
    %124 = vector.shape_cast %123 : vector<128x128xf32> to vector<8x2x8x128xf32>
    %cst_131 = arith.constant dense<0xFF800000> : vector<8x8x128xf32>
    %125 = vector.multi_reduction <maximumf>, %124, %cst_131 [1] : vector<8x2x8x128xf32> to vector<8x8x128xf32>
    %c0_132 = arith.constant 0 : index
    %c0_133 = arith.constant 0 : index
    %c0_134 = arith.constant 0 : index
    %c0_135 = arith.constant 0 : index
    %126 = vector.load %arg6[%c0_132, %c0_133, %c0_134, %c0_135] : memref<1x8x8x128xf32, #tpu.memory_space<vmem>>, vector<1x8x8x128xf32>
    %127 = vector.shape_cast %126 : vector<1x8x8x128xf32> to vector<8x8x128xf32>
    %128 = vector.shape_cast %125 : vector<8x8x128xf32> to vector<1x8x8x128xf32>
    tpu.vector_store %arg6[%c0_132, %c0_133, %c0_134, %c0_135], %128 {strides = array<i32>} : memref<1x8x8x128xf32, #tpu.memory_space<vmem>>, vector<1x8x8x128xf32>,
    return
  }
  func.func @transform_0(%arg0: i32) -> (i32, i32, i32, i32) {
    %c0_i32 = arith.constant 0 : i32
    %c0_i32_0 = arith.constant 0 : i32
    %c0_i32_1 = arith.constant 0 : i32
    %c0_i32_2 = arith.constant 0 : i32
    return %arg0, %c0_i32, %c0_i32_0, %c0_i32_1 : i32, i32, i32, i32
  }
  func.func @transform_1(%arg0: i32) -> (i32, i32) {
    %c0_i32 = arith.constant 0 : i32
    %c0_i32_0 = arith.constant 0 : i32
    %c0_i32_1 = arith.constant 0 : i32
    return %c0_i32, %c0_i32_0 : i32, i32
  }
  func.func @transform_2(%arg0: i32) -> (i32, i32) {
    %c0_i32 = arith.constant 0 : i32
    %c0_i32_0 = arith.constant 0 : i32
    %c0_i32_1 = arith.constant 0 : i32
    return %c0_i32, %c0_i32_0 : i32, i32
  }
  func.func @transform_3(%arg0: i32) -> (i32, i32) {
    %c0_i32 = arith.constant 0 : i32
    %c0_i32_0 = arith.constant 0 : i32
    %c0_i32_1 = arith.constant 0 : i32
    return %c0_i32, %c0_i32_0 : i32, i32
  }
  func.func @transform_4(%arg0: i32) -> (i32, i32) {
    %c0_i32 = arith.constant 0 : i32
    %c0_i32_0 = arith.constant 0 : i32
    %c0_i32_1 = arith.constant 0 : i32
    return %c0_i32, %c0_i32_0 : i32, i32
  }
  func.func @transform_5(%arg0: i32) -> (i32, i32, i32, i32) {
    %c0_i32 = arith.constant 0 : i32
    %c0_i32_0 = arith.constant 0 : i32
    %c0_i32_1 = arith.constant 0 : i32
    %c0_i32_2 = arith.constant 0 : i32
    return %arg0, %c0_i32, %c0_i32_0, %c0_i32_1 : i32, i32, i32, i32
  }
}

</mosaic_0001>

<bundles_post_ra>
// kernel: tpu_custom_call.1
= control target key start
LH: loop header
LB: loop body
LE: loop exit
PB: predicated region body
PF: predicated region fallthrough
CT: control target
= control target key end

     0   :  { %10 = vsyncpa [#allocation7], 0  ;;  %s7159_s0 = inlined_call_operand.vmem [shape: bf16[2,16,16,4], index: 0, kind: input, shape index: {}]   ;;  %s7160_s1 = inlined_call_operand.vmem [shape: bf16[36,8], index: 1, kind: input, shape index: {}]   ;;  %s7161_s2 = inlined_call_operand.vmem [shape: f32[1,8], index: 2, kind: input, shape index: {}]   ;;  %s7162_s3 = inlined_call_operand.vmem [shape: bf16[72,128], index: 3, kind: input, shape index: {}]   ;;  %s7163_s4 = inlined_call_operand.vmem [shape: f32[1,128], index: 4, kind: input, shape index: {}]   ;;  %s7164_s5 = inlined_call_operand.hbm [shape: f32[2,8,8,128], index: 5, kind: output, shape index: {}]  }
   0x1   :  { %12 = vsyncpa [#allocation7 + $0x1], 0  ;;  %s5668_s18 = smov 0   ;;  %s5670_s19 = smov 0  }
   0x2   :  { %s5672_s20 = smov 0   ;;  %s5674_s21 = smov 0  }
   0x3 LB: > { %s5689_s22 = sadd.s32 4294967295, %s5620_s21   ;;  %s5110_s23 = sadd.s32 4294967294, %s5620_s21   ;;  %s5620_s21 = sphi %s5674_s21, %s7170_s21   ;;  %s5616_s20 = sphi %s5672_s20, %s7169_s20   ;;  %s5612_s19 = sphi %s5670_s19, %s7168_s19   ;;  %s5608_s18 = sphi %s5668_s18, %s7167_s18  }
   0x4   : > { %s5693_s24 = sadd.s32 1, %s5620_s21   ;;  %s135_s25 = sadd.s32 1, %s5616_s20 }
   0x5   : > { %s132_s26 = ssub.s32 %s5620_s21, %s5693_s24  ;;  %p145_p0 = scmp.ne.s32.totalorder %s5616_s20, %s5612_s19 }
   0x6   : > { %p133_p1 = scmp.eq.s32.totalorder %s132_s26, 0  ;;  %p146_p2 = scmp.eq.s32.totalorder %s5689_s22, 1 }
   0x7   : > { %p151_p3 = scmp.ne.s32.totalorder %s5612_s19, %s5608_s18  ;;  %p152_p4 = scmp.eq.s32.totalorder %s5110_s23, 1 }
   0x8   : > { %s5704_s27 = scalar_select %p133_p1, %s5616_s20, %s135_s25  }
   0x9   : > { %p5706_p5 = por %p146_p2, %p145_p0  ;;  %p5710_p6 = por %p152_p4, %p151_p3 }
   0xa   : > { %p5113_p7 = scmp.ge.s32.totalorder %s5620_s21, 1  ;;  %p190_p8 = scmp.lt.s32.totalorder %s5620_s21, 3 }
   0xc   : > { %p191_p9 = pnand %p5113_p7, %p190_p8 }
   0xd   : > { %vm256_vm0 = vcmask (!%p191_p9), 31744   ;;  %vm259_vm1 = vcmask (!%p191_p9), 25600   ;;  %vm266_vm2 = vcmask (!%p191_p9), 24576   ;;  %v5622_v0 = vmov (!%p191_p9), 0.0   ;;  %p218_p10 = scmp.lt.s32.totalorder (!%p191_p9), %s5689_s22, 1  ;;  %s5623_s10 = smov (!%p191_p9), 4  }
   0xe   : > { %194 = sbr.rel (%p191_p9) target bundleno = 1074 (0x432), region = 40  ;;  %257 = vst.msk [vmem:[#allocation2] sm:$0xff] (!%p191_p9), %vm256_vm0, %v5622_v0  ;;  %258 = vst.msk [vmem:[#allocation2 + $0x8] sm:$0xff] (!%p191_p9), %vm256_vm0, %v5622_v0  ;;  %s5624_s11 = smov (!%p191_p9), 8   ;;  %vm1552_vm3 = vcmask (!%p191_p9), 1041408   ;;  %vm539_vm4 = vcmask (!%p191_p9), 64544  }
   0xf   : > { %260 = vst.msk [vmem:[#allocation2 + $0x10] sm:$0x3] (!%p191_p9), %vm259_vm1, %v5622_v0  ;;  %264 = vst.msk [vmem:[#allocation2 + $0x1a8] sm:$0x3] (!%p191_p9), %vm259_vm1, %v5622_v0  ;;  %s5625_s12 = smov (!%p191_p9), 12   ;;  %s5626_s13 = smov (!%p191_p9), 16  }
  0x10   : > { %262 = vst.msk [vmem:[#allocation2 + $0x198] sm:$0xff] (!%p191_p9), %vm256_vm0, %v5622_v0  ;;  %263 = vst.msk [vmem:[#allocation2 + $0x1a0] sm:$0xff] (!%p191_p9), %vm256_vm0, %v5622_v0  ;;  %s5627_s14 = smov (!%p191_p9), 20   ;;  %s5628_s15 = smov (!%p191_p9), 24   ;;  %vm668_vm5 = vcmask (!%p191_p9), 97344   ;;  %vm797_vm6 = vcmask (!%p191_p9), 130144  }
  0x11   : > { %283 = vst.msk [vmem:[#allocation2 + $0x29] sm:$0x1] (!%p191_p9), %vm266_vm2, %v5622_v0  ;;  %267 = vst.msk [vmem:[#allocation2 + $0x18] sm:$0x1] (!%p191_p9), %vm266_vm2, %v5622_v0  ;;  %s5629_s26 = smov (!%p191_p9), 28   ;;  %s5630_s7 = smov (!%p191_p9), 32  }
  0x12   : > { %268 = vst.msk [vmem:[#allocation2 + $0x30] sm:$0x1] (!%p191_p9), %vm266_vm2, %v5622_v0  ;;  %269 = vst.msk [vmem:[#allocation2 + $0x48] sm:$0x1] (!%p191_p9), %vm266_vm2, %v5622_v0  ;;  %vm926_vm7 = vcmask (!%p191_p9), 162944   ;;  %vm1055_vm8 = vcmask (!%p191_p9), 195744  }
  0x13   : > { %270 = vst.msk [vmem:[#allocation2 + $0x60] sm:$0x1] (!%p191_p9), %vm266_vm2, %v5622_v0  ;;  %271 = vst.msk [vmem:[#allocation2 + $0x78] sm:$0x1] (!%p191_p9), %vm266_vm2, %v5622_v0  ;;  %vm1185_vm9 = vcmask (!%p191_p9), 228544   ;;  %vm1314_vm10 = vcmask (!%p191_p9), 261344  }
  0x14   : > { %272 = vst.msk [vmem:[#allocation2 + $0x90] sm:$0x1] (!%p191_p9), %vm266_vm2, %v5622_v0  ;;  %273 = vst.msk [vmem:[#allocation2 + $0xa8] sm:$0x1] (!%p191_p9), %vm266_vm2, %v5622_v0  ;;  %vm1443_vm11 = vcmask (!%p191_p9), 294144   ;;  %vm1503_vm12 = vcmask (!%p191_p9), 293888  }
  0x15   : > { %274 = vst.msk [vmem:[#allocation2 + $0xc0] sm:$0x1] %vm266_vm2, %v5622_v0  ;;  %275 = vst.msk [vmem:[#allocation2 + $0xd8] sm:$0x1] %vm266_vm2, %v5622_v0  ;;  %s219_s30 = scalar_select %p218_p10, %s5689_s22, 1  ;;  %v427_v4 = vld [vmem:[#allocation2 + $0x1] sm:$0xff] }
  0x16   : > { %276 = vst.msk [vmem:[#allocation2 + $0xf0] sm:$0x1] %vm266_vm2, %v5622_v0  ;;  %277 = vst.msk [vmem:[#allocation2 + $0x108] sm:$0x1] %vm266_vm2, %v5622_v0  ;;  %v428_v5 = vld [vmem:[#allocation2 + $0x9] sm:$0xff]  ;;  %v363_v29 = vld [vmem:[#allocation2] sm:$0xff] }
  0x17   : > { %278 = vst.msk [vmem:[#allocation2 + $0x120] sm:$0x1] %vm266_vm2, %v5622_v0  ;;  %279 = vst.msk [vmem:[#allocation2 + $0x138] sm:$0x1] %vm266_vm2, %v5622_v0  ;;  %s5292_s6 = sshll.u32 %s219_s30, 7  ;;  %v556_v6 = vld [vmem:[#allocation2 + $0x2] sm:$0xff]  ;;  %v459_v11 = vpack.c.bf16 %v428_v5, %v427_v4 }
  0x18   : > { %280 = vst.msk [vmem:[#allocation2 + $0x150] sm:$0x1] %vm266_vm2, %v5622_v0  ;;  %281 = vst.msk [vmem:[#allocation2 + $0x168] sm:$0x1] %vm266_vm2, %v5622_v0  ;;  %s5797_s9 = scalar_lea.vmem %s7159_s0, %s5292_s6  ;;  %v557_v12 = vld [vmem:[#allocation2 + $0xa] sm:$0xff]  ;;  %vm1749_vm13 = vcmask 64512  }
  0x19   : > { %282 = vst.msk [vmem:[#allocation2 + $0x180] sm:$0x1] %vm266_vm2, %v5622_v0  ;;  %284 = vst.msk [vmem:[#allocation2 + $0x41] sm:$0x1] %vm266_vm2, %v5622_v0  ;;  %v5295_v1 = vld [vmem:[%s5797_s9] sm:$0xff]   ;;  %v5358_v2 = vld [vmem:[%s5797_s9 + $0x8] sm:$0xff]   ;;  %v588_v17 = vpack.c.bf16 %v557_v12, %v556_v6  ;;  %491 = vrot.lane.b32.xlu0 %v459_v11, %s5623_s10 }
  0x1a   : > { %285 = vst.msk [vmem:[#allocation2 + $0x59] sm:$0x1] %vm266_vm2, %v5622_v0  ;;  %286 = vst.msk [vmem:[#allocation2 + $0x71] sm:$0x1] %vm266_vm2, %v5622_v0  ;;  %v5359_v3 = vld [vmem:[%s5797_s9 + $0x10] sm:$0xff]   ;;  %v5296_v7 = vunpack.c.l.bf16 %v5295_v1  ;;  %v5297_v8 = vunpack.c.h.bf16 %v5295_v1  ;;  %v5300_v9 = vunpack.c.l.bf16 %v5358_v2  ;;  %v5301_v10 = vunpack.c.h.bf16 %v5358_v2  ;;  %v5360_v15 = vld [vmem:[%s5797_s9 + $0x18] sm:$0xff]  }
  0x1b   : > { %287 = vst.msk [vmem:[#allocation2 + $0x89] sm:$0x1] %vm266_vm2, %v5622_v0  ;;  %288 = vst.msk [vmem:[#allocation2 + $0xa1] sm:$0x1] %vm266_vm2, %v5622_v0  ;;  %v5304_v13 = vunpack.c.l.bf16 %v5359_v3  ;;  %v5305_v14 = vunpack.c.h.bf16 %v5359_v3  ;;  %v5361_v16 = vld [vmem:[%s5797_s9 + $0x20] sm:$0xff]   ;;  %v5308_v18 = vunpack.c.l.bf16 %v5360_v15  ;;  %v5309_v19 = vunpack.c.h.bf16 %v5360_v15  ;;  %v5362_v21 = vld [vmem:[%s5797_s9 + $0x28] sm:$0xff]   ;;  %620 = vrot.lane.b32.xlu1 %v588_v17, %s5624_s11 }
  0x1c   : > { %289 = vst.msk [vmem:[#allocation2 + $0xb9] sm:$0x1] %vm266_vm2, %v5622_v0  ;;  %290 = vst.msk [vmem:[#allocation2 + $0xd1] sm:$0x1] %vm266_vm2, %v5622_v0  ;;  %v5312_v20 = vunpack.c.l.bf16 %v5361_v16  ;;  %v5363_v22 = vld [vmem:[%s5797_s9 + $0x30] sm:$0xff]   ;;  %v5364_v23 = vld [vmem:[%s5797_s9 + $0x38] sm:$0xff]   ;;  %v5313_v24 = vunpack.c.h.bf16 %v5361_v16  ;;  %v5316_v25 = vunpack.c.l.bf16 %v5362_v21  ;;  %v5317_v26 = vunpack.c.h.bf16 %v5362_v21 }
  0x1d   : > { %291 = vst.msk [vmem:[#allocation2 + $0xe9] sm:$0x1] %vm266_vm2, %v5622_v0  ;;  %292 = vst.msk [vmem:[#allocation2 + $0x101] sm:$0x1] %vm266_vm2, %v5622_v0  ;;  %v5320_v27 = vunpack.c.l.bf16 %v5363_v22  ;;  %v364_v28 = vld [vmem:[#allocation2 + $0x8] sm:$0xff]  ;;  %v5365_v30 = vld [vmem:[%s5797_s9 + $0x40] sm:$0xff]   ;;  %v5321_v31 = vunpack.c.h.bf16 %v5363_v22  ;;  %v5324_v32 = vunpack.c.l.bf16 %v5364_v23  ;;  %v5325_v33 = vunpack.c.h.bf16 %v5364_v23 }
  0x1e   : > { %293 = vst.msk [vmem:[#allocation2 + $0x119] sm:$0x1] %vm266_vm2, %v5622_v0  ;;  %294 = vst.msk [vmem:[#allocation2 + $0x131] sm:$0x1] %vm266_vm2, %v5622_v0  ;;  %v395_v34 = vpack.c.bf16 %v364_v28, %v363_v29  ;;  %v5366_v35 = vld [vmem:[%s5797_s9 + $0x48] sm:$0xff]   ;;  %v5328_v36 = vunpack.c.l.bf16 %v5365_v30  ;;  %v5329_v37 = vunpack.c.h.bf16 %v5365_v30  ;;  %v5549_v21 = vld [vmem:[%s7160_s1] sm:$0xff]  }
  0x1f   : > { %295 = vst.msk [vmem:[#allocation2 + $0x149] sm:$0x1] %vm266_vm2, %v5622_v0  ;;  %296 = vst.msk [vmem:[#allocation2 + $0x161] sm:$0x1] %vm266_vm2, %v5622_v0  ;;  %v5332_v38 = vunpack.c.l.bf16 %v5366_v35  ;;  %v5333_v39 = vunpack.c.h.bf16 %v5366_v35  ;;  %v5550_v23 = vld [vmem:[%s7160_s1 + $0x8] sm:$0xff]   ;;  %5413 = vmatprep.subr.bf16.mxu0 %v5549_v21  ;;  %vm1752_vm14 = vcmask 58368  }
  0x20   : > { %297 = vst.msk [vmem:[#allocation2 + $0x179] sm:$0x1] %vm266_vm2, %v5622_v0  ;;  %298 = vst.msk [vmem:[#allocation2 + $0x191] sm:$0x1] %vm266_vm2, %v5622_v0  ;;  %5414 = vmatpush3.bf16.msra.mxu0 %v5549_v21  ;;  %vm1759_vm15 = vcmask 57344   ;;  %vm2129_vm1 = vcmask 195712  }
  0x21   : > { %331 = vst.msk [vmem:[#allocation2 + $0x19] sm:$0xff] %vm256_vm0, %v5296_v7  ;;  %332 = vst.msk [vmem:[#allocation2 + $0x21] sm:$0xff] %vm256_vm0, %v5297_v8  ;;  %5415 = vmatprep.subr.bf16.mxu0 %v5550_v23  ;;  %s5634_s16 = smov 40   ;;  %vm3029_vm2 = vcmask 1043456   ;;  %s5293_s25 = sshll.u32 %s5689_s22, 10 }
  0x22   : > { %333 = vst.msk [vmem:[#allocation2 + $0x31] sm:$0xff] %vm256_vm0, %v5300_v9  ;;  %334 = vst.msk [vmem:[#allocation2 + $0x39] sm:$0xff] %vm256_vm0, %v5301_v10  ;;  %s7108_s8 = scalar_lea.hbm %s7164_s5, %s5293_s25  ;;  %s5636_s17 = smov [#allocation6]  }
  0x23   : > { %335 = vst.msk [vmem:[#allocation2 + $0x49] sm:$0xff] %vm256_vm0, %v5304_v13  ;;  %336 = vst.msk [vmem:[#allocation2 + $0x51] sm:$0xff] %vm256_vm0, %v5305_v14  ;;  %s5562_s23 = sshll.u32 %s5636_s17, 4  ;;  %s5563_s23 = int_to_ptr.vmem [resolvable:$false] %s5562_s23 }
  0x24   : > { %337 = vst.msk [vmem:[#allocation2 + $0x61] sm:$0xff] %vm256_vm0, %v5308_v18  ;;  %338 = vst.msk [vmem:[#allocation2 + $0x69] sm:$0xff] %vm256_vm0, %v5309_v19  ;;  %5416 = vmatpush3.bf16.msra.mxu0 %v5550_v23 }
  0x25   : > { %339 = vst.msk [vmem:[#allocation2 + $0x79] sm:$0xff] %vm256_vm0, %v5312_v20  ;;  %340 = vst.msk [vmem:[#allocation2 + $0x81] sm:$0xff] %vm256_vm0, %v5313_v24  ;;  %v5367_v24 = vld [vmem:[%s5797_s9 + $0x50] sm:$0xff]  }
  0x26   : > { %341 = vst.msk [vmem:[#allocation2 + $0x91] sm:$0xff] %vm256_vm0, %v5316_v25  ;;  %342 = vst.msk [vmem:[#allocation2 + $0x99] sm:$0xff] %vm256_vm0, %v5317_v26  ;;  %v5336_v25 = vunpack.c.l.bf16 %v5367_v24  ;;  %v5337_v26 = vunpack.c.h.bf16 %v5367_v24 }
  0x27   : > { %343 = vst.msk [vmem:[#allocation2 + $0xa9] sm:$0xff] %vm256_vm0, %v5320_v27  ;;  %344 = vst.msk [vmem:[#allocation2 + $0xb1] sm:$0xff] %vm256_vm0, %v5321_v31  ;;  %v5551_v27 = vld [vmem:[%s7160_s1 + $0x10] ss:$0 sps:$4 sm:$0x33]  }
  0x28   : > { %345 = vst.msk [vmem:[#allocation2 + $0xc1] sm:$0xff] %vm256_vm0, %v5324_v32  ;;  %346 = vst.msk [vmem:[#allocation2 + $0xc9] sm:$0xff] %vm256_vm0, %v5325_v33  ;;  %v429_v40 = vld [vmem:[#allocation2 + $0x19] sm:$0xff]  ;;  %v430_v41 = vld [vmem:[#allocation2 + $0x21] sm:$0xff]  ;;  %5493 = vmatprep.subr.msk.bf16.mxu0 %vm1552_vm3, %v5551_v27  ;;  %v1554_v31 = vsel %vm1552_vm3, %v5551_v27, 0  ;;  %vm2258_vm3 = vcmask 261312  }
  0x29   : > { %411 = vst.msk [vmem:[#allocation3] sm:$0xff] %vm256_vm0, %v395_v34  ;;  %347 = vst.msk [vmem:[#allocation2 + $0xd9] sm:$0xff] %vm256_vm0, %v5328_v36  ;;  %v558_v42 = vld [vmem:[#allocation2 + $0x1a] sm:$0xff]  ;;  %v460_v43 = vpack.c.bf16 %v430_v41, %v429_v40  ;;  %v559_v44 = vld [vmem:[#allocation2 + $0x22] sm:$0xff]  ;;  %5418 = vmatpush3.bf16.msra.mxu0 %v1554_v31 }
  0x2a   : > { %348 = vst.msk [vmem:[#allocation2 + $0xe1] sm:$0xff] %vm256_vm0, %v5329_v37  ;;  %349 = vst.msk [vmem:[#allocation2 + $0xf1] sm:$0xff] %vm256_vm0, %v5332_v38  ;;  %v685_v45 = vld [vmem:[#allocation2 + $0x18] sm:$0xff]  ;;  %v686_v46 = vld [vmem:[#allocation2 + $0x20] sm:$0xff]  ;;  %v589_v47 = vpack.c.bf16 %v559_v44, %v558_v42 }
  0x2b   : > { %350 = vst.msk [vmem:[#allocation2 + $0xf9] sm:$0xff] %vm256_vm0, %v5333_v39  ;;  %v717_v48 = vpack.c.bf16 %v686_v46, %v685_v45  ;;  %v687_v49 = vld [vmem:[#allocation2 + $0x30] sm:$0xff]  ;;  %v688_v50 = vld [vmem:[#allocation2 + $0x38] sm:$0xff]  ;;  %493 = vrot.lane.b32.xlu0 %v460_v43, %s5623_s10  ;;  %v1075_v52 = vld [vmem:[#allocation2 + $0x48] sm:$0xff] }
  0x2c   : > { %v718_v51 = vpack.c.bf16 %v688_v50, %v687_v49  ;;  %622 = vrot.lane.b32.xlu1 %v589_v47, %s5624_s11  ;;  %v1076_v53 = vld [vmem:[#allocation2 + $0x50] sm:$0xff]  ;;  %v817_v55 = vld [vmem:[#allocation2 + $0x39] sm:$0xff]  ;;  %v692_v58 = vld [vmem:[#allocation2 + $0x68] sm:$0xff]  ;;  %351 = vst.msk [vmem:[#allocation2 + $0x109] sm:$0xff] %vm256_vm0, %v5336_v25 }
  0x2d   : > { %412 = vst.msk [vmem:[#allocation3 + $0x8] sm:$0xff] %vm256_vm0, %v717_v48  ;;  %v816_v54 = vld [vmem:[#allocation2 + $0x31] sm:$0xff]  ;;  %v5835_v56 = vpack.c.bf16 %v1076_v53, %v1075_v52  ;;  %v691_v57 = vld [vmem:[#allocation2 + $0x60] sm:$0xff]  ;;  %v1204_v15 = vld [vmem:[#allocation2 + $0x49] sm:$0xff] }
  0x2e   : > { %413 = vst.msk [vmem:[#allocation3 + $0x10] sm:$0xff] %vm256_vm0, %v718_v51  ;;  %v5839_v59 = vpack.c.bf16 %v692_v58, %v691_v57  ;;  %v5844_v60 = vpack.c.bf16 %v817_v55, %v816_v54  ;;  %v1079_v61 = vld [vmem:[#allocation2 + $0x78] sm:$0xff]  ;;  %v1080_v62 = vld [vmem:[#allocation2 + $0x80] sm:$0xff]  ;;  %v695_v3 = vld [vmem:[#allocation2 + $0x90] sm:$0xff] }
  0x2f   : > { %749 = vrot.lane.b32.xlu0 %v717_v48, %s5625_s12  ;;  %414 = vst.msk [vmem:[#allocation3 + $0x18] sm:$0xff] %vm256_vm0, %v5835_v56  ;;  %v945_v63 = vld [vmem:[#allocation2 + $0x32] sm:$0xff]  ;;  %v946_v1 = vld [vmem:[#allocation2 + $0x3a] sm:$0xff]  ;;  %v5846_v2 = vpack.c.bf16 %v1080_v62, %v1079_v61  ;;  %v1083_v7 = vld [vmem:[#allocation2 + $0xa8] sm:$0xff] }
  0x30   : > { %751 = vrot.lane.b32.xlu1 %v718_v51, %s5625_s12  ;;  %415 = vst.msk [vmem:[#allocation3 + $0x20] sm:$0xff] %vm256_vm0, %v5839_v59  ;;  %v696_v4 = vld [vmem:[#allocation2 + $0x98] sm:$0xff]  ;;  %v5857_v6 = vpack.c.bf16 %v946_v1, %v945_v63  ;;  %v1084_v8 = vld [vmem:[#allocation2 + $0xb0] sm:$0xff]  ;;  %v699_v10 = vld [vmem:[#allocation2 + $0xc0] sm:$0xff] }
  0x31   : > { %v5851_v5 = vpack.c.bf16 %v696_v4, %v695_v3  ;;  %416 = vst.msk [vmem:[#allocation3 + $0x28] sm:$0xff] %vm256_vm0, %v5846_v2  ;;  %v5859_v9 = vpack.c.bf16 %v1084_v8, %v1083_v7  ;;  %v700_v11 = vld [vmem:[#allocation2 + $0xc8] sm:$0xff]  ;;  %v1087_v13 = vld [vmem:[#allocation2 + $0xd8] sm:$0xff]  ;;  %v1088_v14 = vld [vmem:[#allocation2 + $0xe0] sm:$0xff] }
  0x32   : > { %v5864_v12 = vpack.c.bf16 %v700_v11, %v699_v10  ;;  %v1205_v16 = vld [vmem:[#allocation2 + $0x51] sm:$0xff]  ;;  %v5870_v17 = vpack.c.bf16 %v1088_v14, %v1087_v13  ;;  %352 = vst.msk [vmem:[#allocation2 + $0x111] sm:$0xff] %vm256_vm0, %v5337_v26  ;;  %v820_v38 = vld [vmem:[#allocation2 + $0x61] sm:$0xff]  ;;  %v821_v39 = vld [vmem:[#allocation2 + $0x69] sm:$0xff] }
  0x33   : > { %878 = vrot.lane.b32.xlu0 %v460_v43, %s5626_s13  ;;  %417 = vst.msk [vmem:[#allocation3 + $0x30] sm:$0xff] %vm256_vm0, %v5851_v5  ;;  %418 = vst.msk [vmem:[#allocation3 + $0x38] sm:$0xff] %vm256_vm0, %v5859_v9  ;;  %v703_v18 = vld [vmem:[#allocation2 + $0xf0] sm:$0xff]  ;;  %v704_v19 = vld [vmem:[#allocation2 + $0xf8] sm:$0xff]  ;;  %v1235_v22 = vpack.c.bf16 %v1205_v16, %v1204_v15  ;;  %v849_v44 = vpack.c.bf16 %v821_v39, %v820_v38 }
  0x34   : > { %880 = vrot.lane.b32.xlu1 %v5844_v60, %s5626_s13  ;;  %419 = vst.msk [vmem:[#allocation3 + $0x40] sm:$0xff] %vm256_vm0, %v5864_v12  ;;  %v5875_v20 = vpack.c.bf16 %v704_v19, %v703_v18  ;;  %420 = vst.msk [vmem:[#allocation3 + $0x48] sm:$0xff] %vm256_vm0, %v5870_v17  ;;  %v1333_v28 = vld [vmem:[#allocation2 + $0x4a] sm:$0xff]  ;;  %v1334_v29 = vld [vmem:[#allocation2 + $0x52] sm:$0xff] }
  0x35   : > { %v1364_v30 = vpack.c.bf16 %v1334_v29, %v1333_v28  ;;  %v5368_v32 = vld [vmem:[%s5797_s9 + $0x58] sm:$0xff]   ;;  %v1091_v35 = vld [vmem:[#allocation2 + $0x108] sm:$0xff]  ;;  %v5369_v43 = vld [vmem:[%s5797_s9 + $0x60] sm:$0xff]   ;;  %1750 = vst.msk [vmem:[#allocation4] sm:$0xff] %vm1749_vm13, %v5622_v0 }
  0x36   : > { %421 = vst.msk [vmem:[#allocation3 + $0x50] sm:$0xff] %vm256_vm0, %v5875_v20  ;;  %v5340_v33 = vunpack.c.l.bf16 %v5368_v32  ;;  %v5341_v34 = vunpack.c.h.bf16 %v5368_v32  ;;  %v5344_v45 = vunpack.c.l.bf16 %v5369_v43  ;;  %v5345_v46 = vunpack.c.h.bf16 %v5369_v43  ;;  %v950_v48 = vld [vmem:[#allocation2 + $0x6a] sm:$0xff]  ;;  %v1208_v50 = vld [vmem:[#allocation2 + $0x79] sm:$0xff]  ;;  %v1338_v57 = vld [vmem:[#allocation2 + $0x82] sm:$0xff] }
  0x37   : > { %1007 = vrot.lane.b32.xlu0 %v589_v47, %s5627_s14  ;;  %v949_v47 = vld [vmem:[#allocation2 + $0x62] sm:$0xff]  ;;  %v824_v62 = vld [vmem:[#allocation2 + $0x91] sm:$0xff]  ;;  %v825_v63 = vld [vmem:[#allocation2 + $0x99] sm:$0xff]  ;;  %1751 = vst.msk [vmem:[#allocation4 + $0x8] sm:$0xff] %vm1749_vm13, %v5622_v0 }
  0x38   : > { %1009 = vrot.lane.b32.xlu1 %v5857_v6, %s5627_s14  ;;  %353 = vst.msk [vmem:[#allocation2 + $0x121] sm:$0xff] %vm256_vm0, %v5340_v33  ;;  %354 = vst.msk [vmem:[#allocation2 + $0x129] sm:$0xff] %vm256_vm0, %v5341_v34  ;;  %v978_v49 = vpack.c.bf16 %v950_v48, %v949_v47  ;;  %v851_v7 = vpack.c.bf16 %v825_v63, %v824_v62  ;;  %v953_v11 = vld [vmem:[#allocation2 + $0x92] sm:$0xff]  ;;  %v954_v13 = vld [vmem:[#allocation2 + $0x9a] sm:$0xff] }
  0x39   : > { %v1092_v36 = vld [vmem:[#allocation2 + $0x110] sm:$0xff]  ;;  %355 = vst.msk [vmem:[#allocation2 + $0x139] sm:$0xff] %vm256_vm0, %v5344_v45  ;;  %356 = vst.msk [vmem:[#allocation2 + $0x141] sm:$0xff] %vm256_vm0, %v5345_v46  ;;  %v5372_v25 = vld [vmem:[%s5797_s9 + $0x78] sm:$0xff]  }
  0x3a   : > { %v5906_v37 = vpack.c.bf16 %v1092_v36, %v1091_v35  ;;  %v1212_v14 = vld [vmem:[#allocation2 + $0xa9] sm:$0xff]  ;;  %v1213_v15 = vld [vmem:[#allocation2 + $0xb1] sm:$0xff]  ;;  %v5357_v26 = vunpack.c.h.bf16 %v5372_v25  ;;  %v828_v27 = vld [vmem:[#allocation2 + $0xc1] sm:$0xff]  ;;  %1755 = vst.msk [vmem:[#allocation4 + $0x198] sm:$0xff] %vm1749_vm13, %v5622_v0 }
  0x3b   : > { %1137 = vrot.lane.b32.xlu0 %v718_v51, %s5628_s15  ;;  %v1209_v51 = vld [vmem:[#allocation2 + $0x81] sm:$0xff]  ;;  %v1239_v21 = vpack.c.bf16 %v1213_v15, %v1212_v14  ;;  %v1342_v23 = vld [vmem:[#allocation2 + $0xb2] sm:$0xff]  ;;  %v829_v28 = vld [vmem:[#allocation2 + $0xc9] sm:$0xff]  ;;  %1756 = vst.msk [vmem:[#allocation4 + $0x1a0] sm:$0xff] %vm1749_vm13, %v5622_v0 }
  0x3c   : > { %1139 = vrot.lane.b32.xlu1 %v5835_v56, %s5628_s15  ;;  %422 = vst.msk [vmem:[#allocation3 + $0x58] sm:$0xff] %vm256_vm0, %v5906_v37  ;;  %v1237_v55 = vpack.c.bf16 %v1209_v51, %v1208_v50  ;;  %362 = vst.msk [vmem:[#allocation2 + $0x189] sm:$0xff] %vm256_vm0, %v5357_v26  ;;  %v853_v29 = vpack.c.bf16 %v829_v28, %v828_v27  ;;  %v958_v31 = vld [vmem:[#allocation2 + $0xca] sm:$0xff]  ;;  %v1217_v35 = vld [vmem:[#allocation2 + $0xe1] sm:$0xff] }
  0x3d   : > { %v832_v50 = vld [vmem:[#allocation2 + $0xf1] sm:$0xff]  ;;  %v833_v51 = vld [vmem:[#allocation2 + $0xf9] sm:$0xff]  ;;  %v1220_v62 = vld [vmem:[#allocation2 + $0x109] sm:$0xff]  ;;  %1753 = vst.msk [vmem:[#allocation4 + $0x10] sm:$0x3] %vm1752_vm14, %v5622_v0 }
  0x3e   : > { %v1221_v63 = vld [vmem:[#allocation2 + $0x111] sm:$0xff]  ;;  %1757 = vst.msk [vmem:[#allocation4 + $0x1a8] sm:$0x3] %vm1752_vm14, %v5622_v0  ;;  %vm4961_vm14 = vcmask 1044484  }
  0x3f   : > { %1266 = vrot.lane.b32.xlu0 %v5844_v60, %s5629_s26  ;;  %v707_v40 = vld [vmem:[#allocation2 + $0x120] sm:$0xff]  ;;  %v708_v41 = vld [vmem:[#allocation2 + $0x128] sm:$0xff]  ;;  %1761 = vst.msk [vmem:[#allocation4 + $0x30] sm:$0x1] %vm1759_vm15, %v5622_v0  ;;  %1760 = vst.msk [vmem:[#allocation4 + $0x18] sm:$0x1] %vm1759_vm15, %v5622_v0 }
  0x40   : > { %1268 = vrot.lane.b32.xlu1 %v1235_v22, %s5629_s26  ;;  %v5914_v42 = vpack.c.bf16 %v708_v41, %v707_v40  ;;  %v1095_v52 = vld [vmem:[#allocation2 + $0x138] sm:$0xff]  ;;  %v1096_v53 = vld [vmem:[#allocation2 + $0x140] sm:$0xff]  ;;  %v966_v28 = vld [vmem:[#allocation2 + $0x12a] sm:$0xff]  ;;  %1762 = vst.msk [vmem:[#allocation4 + $0x48] sm:$0x1] %vm1759_vm15, %v5622_v0 }
  0x41   : > { %v5929_v54 = vpack.c.bf16 %v1096_v53, %v1095_v52  ;;  %v1345_v40 = vld [vmem:[#allocation2 + $0xda] sm:$0xff]  ;;  %v1346_v41 = vld [vmem:[#allocation2 + $0xe2] sm:$0xff]  ;;  %v855_v53 = vpack.c.bf16 %v833_v51, %v832_v50  ;;  %1763 = vst.msk [vmem:[#allocation4 + $0x60] sm:$0x1] %vm1759_vm15, %v5622_v0  ;;  %1764 = vst.msk [vmem:[#allocation4 + $0x78] sm:$0x1] %vm1759_vm15, %v5622_v0 }
  0x42   : > { %423 = vst.msk [vmem:[#allocation3 + $0x60] sm:$0xff] %vm256_vm0, %v5914_v42  ;;  %v965_v27 = vld [vmem:[#allocation2 + $0x122] sm:$0xff] }
  0x43   : > { %1395 = vrot.lane.b32.xlu0 %v5857_v6, %s5630_s7  ;;  %424 = vst.msk [vmem:[#allocation3 + $0x68] sm:$0xff] %vm256_vm0, %v5929_v54 }
  0x44   : > { %495 = vrot.lane.b32.xlu1 %v5844_v60, %s5623_s10  ;;  %v5370_v60 = vld [vmem:[%s5797_s9 + $0x68] sm:$0xff]   ;;  %1765 = vst.msk [vmem:[#allocation4 + $0x90] sm:$0x1] %vm1759_vm15, %v5622_v0  ;;  %1766 = vst.msk [vmem:[#allocation4 + $0xa8] sm:$0x1] %vm1759_vm15, %v5622_v0 }
  0x45   : > { %v5349_v61 = vunpack.c.h.bf16 %v5370_v60  ;;  %1767 = vst.msk [vmem:[#allocation4 + $0xc0] sm:$0x1] %vm1759_vm15, %v5622_v0  ;;  %1768 = vst.msk [vmem:[#allocation4 + $0xd8] sm:$0x1] %vm1759_vm15, %v5622_v0 }
  0x46   : > { %1769 = vst.msk [vmem:[#allocation4 + $0xf0] sm:$0x1] %vm1759_vm15, %v5622_v0  ;;  %1770 = vst.msk [vmem:[#allocation4 + $0x108] sm:$0x1] %vm1759_vm15, %v5622_v0 }
  0x47   : > { %1397 = vrot.lane.b32.xlu0 %v1364_v30, %s5630_s7  ;;  %358 = vst.msk [vmem:[#allocation2 + $0x159] sm:$0xff] %vm256_vm0, %v5349_v61 }
  0x48   : > { %497 = vrot.lane.b32.xlu1 %v1235_v22, %s5623_s10  ;;  %1771 = vst.msk [vmem:[#allocation4 + $0x120] sm:$0x1] %vm1759_vm15, %v5622_v0  ;;  %1772 = vst.msk [vmem:[#allocation4 + $0x138] sm:$0x1] %vm1759_vm15, %v5622_v0 }
  0x49   : > { %1773 = vst.msk [vmem:[#allocation4 + $0x150] sm:$0x1] %vm1759_vm15, %v5622_v0  ;;  %1774 = vst.msk [vmem:[#allocation4 + $0x168] sm:$0x1] %vm1759_vm15, %v5622_v0 }
  0x4a   : > { %1775 = vst.msk [vmem:[#allocation4 + $0x180] sm:$0x1] %vm1759_vm15, %v5622_v0  ;;  %1776 = vst.msk [vmem:[#allocation4 + $0x29] sm:$0x1] %vm1759_vm15, %v5622_v0 }
  0x4b   : > { %624 = vrot.lane.b32.xlu0 %v5857_v6, %s5624_s11  ;;  %v5371_v6 = vld [vmem:[%s5797_s9 + $0x70] sm:$0xff]   ;;  %1777 = vst.msk [vmem:[#allocation4 + $0x41] sm:$0x1] %vm1759_vm15, %v5622_v0  ;;  %1778 = vst.msk [vmem:[#allocation4 + $0x59] sm:$0x1] %vm1759_vm15, %v5622_v0 }
  0x4c   : > { %626 = vrot.lane.b32.xlu1 %v1364_v30, %s5624_s11  ;;  %v5352_v8 = vunpack.c.l.bf16 %v5371_v6  ;;  %v5353_v10 = vunpack.c.h.bf16 %v5371_v6  ;;  %1779 = vst.msk [vmem:[#allocation4 + $0x71] sm:$0x1] %vm1759_vm15, %v5622_v0  ;;  %1780 = vst.msk [vmem:[#allocation4 + $0x89] sm:$0x1] %vm1759_vm15, %v5622_v0 }
  0x4d   : > { %1781 = vst.msk [vmem:[#allocation4 + $0xa1] sm:$0x1] %vm1759_vm15, %v5622_v0  ;;  %1782 = vst.msk [vmem:[#allocation4 + $0xb9] sm:$0x1] %vm1759_vm15, %v5622_v0 }
  0x4e   : > { %359 = vst.msk [vmem:[#allocation2 + $0x169] sm:$0xff] %vm256_vm0, %v5352_v8  ;;  %360 = vst.msk [vmem:[#allocation2 + $0x171] sm:$0xff] %vm256_vm0, %v5353_v10  ;;  %v1349_v10 = vld [vmem:[#allocation2 + $0x10a] sm:$0xff]  ;;  %v841_v51 = vld [vmem:[#allocation2 + $0x159] sm:$0xff] }
  0x4f   : > { %753 = vrot.lane.b32.xlu0 %v5835_v56, %s5625_s12  ;;  %v1337_v56 = vld [vmem:[#allocation2 + $0x7a] sm:$0xff]  ;;  %1783 = vst.msk [vmem:[#allocation4 + $0xd1] sm:$0x1] %vm1759_vm15, %v5622_v0  ;;  %1784 = vst.msk [vmem:[#allocation4 + $0xe9] sm:$0x1] %vm1759_vm15, %v5622_v0 }
  0x50   : > { %755 = vrot.lane.b32.xlu1 %v5839_v59, %s5625_s12  ;;  %v1366_v58 = vpack.c.bf16 %v1338_v57, %v1337_v56  ;;  %v961_v56 = vld [vmem:[#allocation2 + $0xf2] sm:$0xff]  ;;  %v962_v57 = vld [vmem:[#allocation2 + $0xfa] sm:$0xff]  ;;  %1785 = vst.msk [vmem:[#allocation4 + $0x101] sm:$0x1] %vm1759_vm15, %v5622_v0  ;;  %1786 = vst.msk [vmem:[#allocation4 + $0x119] sm:$0x1] %vm1759_vm15, %v5622_v0 }
  0x51   : > { %1787 = vst.msk [vmem:[#allocation4 + $0x131] sm:$0x1] %vm1759_vm15, %v5622_v0  ;;  %1788 = vst.msk [vmem:[#allocation4 + $0x149] sm:$0x1] %vm1759_vm15, %v5622_v0 }
  0x52   : > { %1789 = vst.msk [vmem:[#allocation4 + $0x161] sm:$0x1] %vm1759_vm15, %v5622_v0  ;;  %1790 = vst.msk [vmem:[#allocation4 + $0x179] sm:$0x1] %vm1759_vm15, %v5622_v0 }
  0x53   : > { %882 = vrot.lane.b32.xlu0 %v1235_v22, %s5626_s13  ;;  %v1341_v22 = vld [vmem:[#allocation2 + $0xaa] sm:$0xff]  ;;  %1791 = vst.msk [vmem:[#allocation4 + $0x191] sm:$0x1] %vm1759_vm15, %v5622_v0  ;;  %vm4963_vm15 = vcmask 1045509  }
  0x54   : > { %884 = vrot.lane.b32.xlu1 %v849_v44, %s5626_s13  ;;  %v1368_v24 = vpack.c.bf16 %v1342_v23, %v1341_v22  ;;  %v836_v23 = vld [vmem:[#allocation2 + $0x121] sm:$0xff] }
  0x55   : > { %v1099_v16 = vld [vmem:[#allocation2 + $0x168] sm:$0xff]  ;;  %v1100_v18 = vld [vmem:[#allocation2 + $0x170] sm:$0xff] }
  0x56   : > { %v5963_v19 = vpack.c.bf16 %v1100_v18, %v1099_v16 }
  0x57   : > { %1011 = vrot.lane.b32.xlu0 %v1364_v30, %s5627_s14  ;;  %v957_v30 = vld [vmem:[#allocation2 + $0xc2] sm:$0xff] }
  0x58   : > { %1013 = vrot.lane.b32.xlu1 %v978_v49, %s5627_s14  ;;  %426 = vst.msk [vmem:[#allocation3 + $0x78] sm:$0xff] %vm256_vm0, %v5963_v19  ;;  %v982_v32 = vpack.c.bf16 %v958_v31, %v957_v30  ;;  %v986_v30 = vpack.c.bf16 %v966_v28, %v965_v27 }
  0x5b   : > { %1141 = vrot.lane.b32.xlu0 %v5839_v59, %s5628_s15  ;;  %v5348_v59 = vunpack.c.l.bf16 %v5370_v60  ;;  %v984_v60 = vpack.c.bf16 %v962_v57, %v961_v56  ;;  %v970_v57 = vld [vmem:[#allocation2 + $0x15a] sm:$0xff] }
  0x5c   : > { %1143 = vrot.lane.b32.xlu1 %v5846_v2, %s5628_s15 }
  0x5d   : > { %357 = vst.msk [vmem:[#allocation2 + $0x151] sm:$0xff] %vm256_vm0, %v5348_v59 }
  0x5f   : > { %1270 = vrot.lane.b32.xlu0 %v849_v44, %s5629_s26 }
  0x60   : > { %1272 = vrot.lane.b32.xlu1 %v1237_v55, %s5629_s26 }
  0x63   : > { %1399 = vrot.lane.b32.xlu0 %v978_v49, %s5630_s7 }
  0x64   : > { %499 = vrot.lane.b32.xlu1 %v849_v44, %s5623_s10  ;;  %v711_v1 = vld [vmem:[#allocation2 + $0x150] sm:$0xff]  ;;  %v712_v3 = vld [vmem:[#allocation2 + $0x158] sm:$0xff]  ;;  %v1370_v44 = vpack.c.bf16 %v1346_v41, %v1345_v40  ;;  %v1354_v41 = vld [vmem:[#allocation2 + $0x142] sm:$0xff] }
  0x65   : > { %v5948_v4 = vpack.c.bf16 %v712_v3, %v711_v1  ;;  %v1243_v3 = vpack.c.bf16 %v1221_v63, %v1220_v62  ;;  %v1353_v40 = vld [vmem:[#allocation2 + $0x13a] sm:$0xff]  ;;  %v840_v50 = vld [vmem:[#allocation2 + $0x151] sm:$0xff] }
  0x66   : > { %v969_v56 = vld [vmem:[#allocation2 + $0x152] sm:$0xff] }
  0x67   : > { %1401 = vrot.lane.b32.xlu0 %v1366_v58, %s5630_s7  ;;  %425 = vst.msk [vmem:[#allocation3 + $0x70] sm:$0xff] %vm256_vm0, %v5948_v4  ;;  %v1229_v62 = vld [vmem:[#allocation2 + $0x171] sm:$0xff] }
  0x68   : > { %501 = vrot.lane.b32.xlu1 %v1237_v55, %s5623_s10 }
  0x6b   : > { %628 = vrot.lane.b32.xlu0 %v978_v49, %s5624_s11 }
  0x6c   : > { %630 = vrot.lane.b32.xlu1 %v1366_v58, %s5624_s11 }
  0x6f   : > { %757 = vrot.lane.b32.xlu0 %v5846_v2, %s5625_s12  ;;  %v980_v2 = vpack.c.bf16 %v954_v13, %v953_v11 }
  0x70   : > { %759 = vrot.lane.b32.xlu1 %v5851_v5, %s5625_s12 }
  0x73   : > { %886 = vrot.lane.b32.xlu0 %v1237_v55, %s5626_s13 }
  0x74   : > { %888 = vrot.lane.b32.xlu1 %v851_v7, %s5626_s13 }
  0x77   : > { %1015 = vrot.lane.b32.xlu0 %v1366_v58, %s5627_s14 }
  0x78   : > { %1017 = vrot.lane.b32.xlu1 %v980_v2, %s5627_s14 }
  0x7b   : > { %1145 = vrot.lane.b32.xlu0 %v5851_v5, %s5628_s15  ;;  %v5356_v5 = vunpack.c.l.bf16 %v5372_v25 }
  0x7c   : > { %1147 = vrot.lane.b32.xlu1 %v5859_v9, %s5628_s15 }
  0x7d   : > { %361 = vst.msk [vmem:[#allocation2 + $0x181] sm:$0xff] %vm256_vm0, %v5356_v5  ;;  %vm2000_vm0 = vcmask 130112  }
  0x7f   : > { %1274 = vrot.lane.b32.xlu0 %v851_v7, %s5629_s26 }
  0x80   : > { %1276 = vrot.lane.b32.xlu1 %v1239_v21, %s5629_s26 }
  0x83   : > { %1403 = vrot.lane.b32.xlu0 %v980_v2, %s5630_s7 }
  0x84   : > { %503 = vrot.lane.b32.xlu1 %v851_v7, %s5623_s10  ;;  %v973_v28 = vld [vmem:[#allocation2 + $0x182] sm:$0xff] }
  0x87   : > { %1405 = vrot.lane.b32.xlu0 %v1368_v24, %s5630_s7 }
  0x88   : > { %505 = vrot.lane.b32.xlu1 %v1239_v21, %s5623_s10 }
  0x8b   : > { %632 = vrot.lane.b32.xlu0 %v980_v2, %s5624_s11  ;;  %v492_v33 = vpop.permute.xlu0 %491 }
  0x8c   : > { %634 = vrot.lane.b32.xlu1 %v1368_v24, %s5624_s11  ;;  %540 = vst.msk [vmem:[#allocation3] sm:$0xff] %vm539_vm4, %v492_v33  ;;  %v1224_v33 = vld [vmem:[#allocation2 + $0x139] sm:$0xff] }
  0x8d   : > { %v621_v34 = vpop.permute.xlu1 %620 }
  0x8e   : > { %669 = vst.msk [vmem:[#allocation3] sm:$0xff] %vm668_vm5, %v621_v34  ;;  %v1225_v34 = vld [vmem:[#allocation2 + $0x141] sm:$0xff] }
  0x8f   : > { %761 = vrot.lane.b32.xlu0 %v5859_v9, %s5625_s12  ;;  %v1216_v9 = vld [vmem:[#allocation2 + $0xd9] sm:$0xff] }
  0x90   : > { %763 = vrot.lane.b32.xlu1 %v5864_v12, %s5625_s12  ;;  %v1241_v36 = vpack.c.bf16 %v1217_v35, %v1216_v9  ;;  %v1245_v35 = vpack.c.bf16 %v1225_v34, %v1224_v33 }
  0x93   : > { %890 = vrot.lane.b32.xlu0 %v1239_v21, %s5626_s13 }
  0x94   : > { %892 = vrot.lane.b32.xlu1 %v853_v29, %s5626_s13 }
  0x97   : > { %1019 = vrot.lane.b32.xlu0 %v1368_v24, %s5627_s14  ;;  %v837_v24 = vld [vmem:[#allocation2 + $0x129] sm:$0xff] }
  0x98   : > { %1021 = vrot.lane.b32.xlu1 %v982_v32, %s5627_s14  ;;  %v857_v5 = vpack.c.bf16 %v837_v24, %v836_v23  ;;  %v844_v24 = vld [vmem:[#allocation2 + $0x181] sm:$0xff] }
  0x9b   : > { %1149 = vrot.lane.b32.xlu0 %v5864_v12, %s5628_s15 }
  0x9c   : > { %1151 = vrot.lane.b32.xlu1 %v5870_v17, %s5628_s15 }
  0x9d   : > { %v494_v38 = vpop.permute.xlu0 %493 }
  0x9e   : > { %541 = vst.msk [vmem:[#allocation3 + $0x8] sm:$0xff] %vm539_vm4, %v494_v38  ;;  %v623_v39 = vpop.permute.xlu1 %622 }
  0x9f   : > { %670 = vst.msk [vmem:[#allocation3 + $0x8] sm:$0xff] %vm668_vm5, %v623_v39  ;;  %1278 = vrot.lane.b32.xlu0 %v853_v29, %s5629_s26 }
  0xa0   : > { %1280 = vrot.lane.b32.xlu1 %v1241_v36, %s5629_s26 }
  0xa1   : > { %v750_v43 = vpop.permute.xlu0 %749 }
  0xa2   : > { %798 = vst.msk [vmem:[#allocation3] sm:$0xff] %vm797_vm6, %v750_v43  ;;  %v752_v12 = vpop.permute.xlu1 %751 }
  0xa3   : > { %799 = vst.msk [vmem:[#allocation3 + $0x8] sm:$0xff] %vm797_vm6, %v752_v12  ;;  %1407 = vrot.lane.b32.xlu0 %v982_v32, %s5630_s7 }
  0xa4   : > { %507 = vrot.lane.b32.xlu1 %v853_v29, %s5623_s10 }
  0xa5   : > { %v879_v45 = vpop.permute.xlu0 %878 }
  0xa6   : > { %927 = vst.msk [vmem:[#allocation3] sm:$0xff] %vm926_vm7, %v879_v45  ;;  %v881_v46 = vpop.permute.xlu1 %880 }
  0xa7   : > { %928 = vst.msk [vmem:[#allocation3 + $0x8] sm:$0xff] %vm926_vm7, %v881_v46  ;;  %1409 = vrot.lane.b32.xlu0 %v1370_v44, %s5630_s7 }
  0xa8   : > { %509 = vrot.lane.b32.xlu1 %v1241_v36, %s5623_s10 }
  0xa9   : > { %v1008_v47 = vpop.permute.xlu0 %1007 }
  0xaa   : > { %1056 = vst.msk [vmem:[#allocation3] sm:$0xff] %vm1055_vm8, %v1008_v47  ;;  %v1010_v48 = vpop.permute.xlu1 %1009 }
  0xab   : > { %1057 = vst.msk [vmem:[#allocation3 + $0x8] sm:$0xff] %vm1055_vm8, %v1010_v48  ;;  %636 = vrot.lane.b32.xlu0 %v982_v32, %s5624_s11 }
  0xac   : > { %638 = vrot.lane.b32.xlu1 %v1370_v44, %s5624_s11 }
  0xad   : > { %v1138_v49 = vpop.permute.xlu0 %1137 }
  0xae   : > { %1186 = vst.msk [vmem:[#allocation3] sm:$0xff] %vm1185_vm9, %v1138_v49  ;;  %v1140_v52 = vpop.permute.xlu1 %1139 }
  0xaf   : > { %1187 = vst.msk [vmem:[#allocation3 + $0x8] sm:$0xff] %vm1185_vm9, %v1140_v52  ;;  %765 = vrot.lane.b32.xlu0 %v5870_v17, %s5625_s12 }
  0xb0   : > { %767 = vrot.lane.b32.xlu1 %v5875_v20, %s5625_s12 }
  0xb1   : > { %v1267_v55 = vpop.permute.xlu0 %1266 }
  0xb2   : > { %1315 = vst.msk [vmem:[#allocation3] sm:$0xff] %vm1314_vm10, %v1267_v55  ;;  %v1269_v58 = vpop.permute.xlu1 %1268 }
  0xb3   : > { %1316 = vst.msk [vmem:[#allocation3 + $0x8] sm:$0xff] %vm1314_vm10, %v1269_v58  ;;  %894 = vrot.lane.b32.xlu0 %v1241_v36, %s5626_s13 }
  0xb4   : > { %896 = vrot.lane.b32.xlu1 %v855_v53, %s5626_s13 }
  0xb5   : > { %v1396_v17 = vpop.permute.xlu0 %1395 }
  0xb6   : > { %1444 = vst.msk [vmem:[#allocation3] sm:$0xff] %vm1443_vm11, %v1396_v17  ;;  %v496_v59 = vpop.permute.xlu1 %495 }
  0xb7   : > { %542 = vst.msk [vmem:[#allocation3 + $0x10] sm:$0xff] %vm539_vm4, %v496_v59  ;;  %1023 = vrot.lane.b32.xlu0 %v1370_v44, %s5627_s14  ;;  %v1374_v44 = vpack.c.bf16 %v1354_v41, %v1353_v40 }
  0xb8   : > { %1025 = vrot.lane.b32.xlu1 %v984_v60, %s5627_s14 }
  0xb9   : > { %v1398_v61 = vpop.permute.xlu0 %1397 }
  0xba   : > { %1445 = vst.msk [vmem:[#allocation3 + $0x8] sm:$0xff] %vm1443_vm11, %v1398_v61  ;;  %v498_v1 = vpop.permute.xlu1 %497  ;;  %v1228_v61 = vld [vmem:[#allocation2 + $0x169] sm:$0xff] }
  0xbb   : > { %543 = vst.msk [vmem:[#allocation3 + $0x18] sm:$0xff] %vm539_vm4, %v498_v1  ;;  %1153 = vrot.lane.b32.xlu0 %v5875_v20, %s5628_s15  ;;  %v1350_v20 = vld [vmem:[#allocation2 + $0x112] sm:$0xff]  ;;  %v1247_v1 = vpack.c.bf16 %v1229_v62, %v1228_v61 }
  0xbc   : > { %1155 = vrot.lane.b32.xlu1 %v5906_v37, %s5628_s15  ;;  %v1372_v14 = vpack.c.bf16 %v1350_v20, %v1349_v10  ;;  %v1358_v10 = vld [vmem:[#allocation2 + $0x172] sm:$0xff] }
  0xbd   : > { %v625_v6 = vpop.permute.xlu0 %624  ;;  %v1460_v7 = vld [vmem:[#allocation3] sm:$0xff] }
  0xbe   : > { %671 = vst.msk [vmem:[#allocation3 + $0x10] sm:$0xff] %vm668_vm5, %v625_v6  ;;  %v627_v8 = vpop.permute.xlu1 %626  ;;  %5419 = vmatprep.mubr.msk.bf16.mxu0 %vm1503_vm12, %v1460_v7 }
  0xbf   : > { %672 = vst.msk [vmem:[#allocation3 + $0x18] sm:$0xff] %vm668_vm5, %v627_v8  ;;  %1282 = vrot.lane.b32.xlu0 %v855_v53, %s5629_s26  ;;  %v1357_v8 = vld [vmem:[#allocation2 + $0x16a] sm:$0xff] }
  0xc0   : > { %1284 = vrot.lane.b32.xlu1 %v1243_v3, %s5629_s26 }
  0xc1   : > { %v754_v11 = vpop.permute.xlu0 %753  ;;  %v1461_v13 = vld [vmem:[#allocation3 + $0x8] sm:$0xff] }
  0xc2   : > { %800 = vst.msk [vmem:[#allocation3 + $0x10] sm:$0xff] %vm797_vm6, %v754_v11  ;;  %v756_v2 = vpop.permute.xlu1 %755  ;;  %5420 = vmatmul.mubr.msk.bf16.vlgmr.msra.gmra.mrb[0].mxu0 %vm1503_vm12, %v1461_v13  ;;  %v1376_v13 = vpack.c.bf16 %v1358_v10, %v1357_v8 }
  0xc3   : > { %801 = vst.msk [vmem:[#allocation3 + $0x18] sm:$0xff] %vm797_vm6, %v756_v2  ;;  %1411 = vrot.lane.b32.xlu0 %v984_v60, %s5630_s7 }
  0xc4   : > { %511 = vrot.lane.b32.xlu1 %v855_v53, %s5623_s10  ;;  %v859_v53 = vpack.c.bf16 %v841_v51, %v840_v50  ;;  %v2017_v50 = vld [vmem:[#allocation4 + $0x2] sm:$0xff]  ;;  %v2018_v51 = vld [vmem:[#allocation4 + $0xa] sm:$0xff] }
  0xc5   : > { %v883_v15 = vpop.permute.xlu0 %882 }
  0xc6   : > { %929 = vst.msk [vmem:[#allocation3 + $0x10] sm:$0xff] %vm926_vm7, %v883_v15  ;;  %v885_v16 = vpop.permute.xlu1 %884 }
  0xc7   : > { %930 = vst.msk [vmem:[#allocation3 + $0x18] sm:$0xff] %vm926_vm7, %v885_v16  ;;  %1413 = vrot.lane.b32.xlu0 %v1372_v14, %s5630_s7  ;;  %v715_v16 = vld [vmem:[#allocation2 + $0x180] sm:$0xff] }
  0xc8   : > { %513 = vrot.lane.b32.xlu1 %v1243_v3, %s5623_s10 }
  0xc9   : > { %v1012_v18 = vpop.permute.xlu0 %1011 }
  0xca   : > { %1058 = vst.msk [vmem:[#allocation3 + $0x10] sm:$0xff] %vm1055_vm8, %v1012_v18  ;;  %v1014_v21 = vpop.permute.xlu1 %1013  ;;  %v716_v18 = vld [vmem:[#allocation2 + $0x188] sm:$0xff] }
  0xcb   : > { %1059 = vst.msk [vmem:[#allocation3 + $0x18] sm:$0xff] %vm1055_vm8, %v1014_v21  ;;  %640 = vrot.lane.b32.xlu0 %v984_v60, %s5624_s11  ;;  %v988_v60 = vpack.c.bf16 %v970_v57, %v969_v56 }
  0xcc   : > { %642 = vrot.lane.b32.xlu1 %v1372_v14, %s5624_s11 }
  0xcd   : > { %v1142_v22 = vpop.permute.xlu0 %1141 }
  0xce   : > { %1188 = vst.msk [vmem:[#allocation3 + $0x10] sm:$0xff] %vm1185_vm9, %v1142_v22  ;;  %v1144_v25 = vpop.permute.xlu1 %1143  ;;  %v6126_v22 = vpack.c.bf16 %v716_v18, %v715_v16 }
  0xcf   : > { %1189 = vst.msk [vmem:[#allocation3 + $0x18] sm:$0xff] %vm1185_vm9, %v1144_v25  ;;  %769 = vrot.lane.b32.xlu0 %v5906_v37, %s5625_s12  ;;  %v845_v25 = vld [vmem:[#allocation2 + $0x189] sm:$0xff] }
  0xd0   : > { %771 = vrot.lane.b32.xlu1 %v5914_v42, %s5625_s12 }
  0xd1   : > { %v1271_v26 = vpop.permute.xlu0 %1270 }
  0xd2   : > { %1317 = vst.msk [vmem:[#allocation3 + $0x10] sm:$0xff] %vm1314_vm10, %v1271_v26  ;;  %v1273_v29 = vpop.permute.xlu1 %1272  ;;  %v6134_v26 = vpack.c.bf16 %v845_v25, %v844_v24 }
  0xd3   : > { %1318 = vst.msk [vmem:[#allocation3 + $0x18] sm:$0xff] %vm1314_vm10, %v1273_v29  ;;  %898 = vrot.lane.b32.xlu0 %v1243_v3, %s5626_s13  ;;  %v974_v29 = vld [vmem:[#allocation2 + $0x18a] sm:$0xff] }
  0xd4   : > { %900 = vrot.lane.b32.xlu1 %v857_v5, %s5626_s13 }
  0xd5   : > { %v1400_v31 = vpop.permute.xlu0 %1399 }
  0xd6   : > { %1446 = vst.msk [vmem:[#allocation3 + $0x10] sm:$0xff] %vm1443_vm11, %v1400_v31  ;;  %v500_v37 = vpop.permute.xlu1 %499 }
  0xd7   : > { %544 = vst.msk [vmem:[#allocation3 + $0x20] sm:$0xff] %vm539_vm4, %v500_v37  ;;  %1027 = vrot.lane.b32.xlu0 %v1372_v14, %s5627_s14  ;;  %v1103_v37 = vld [vmem:[#allocation2 + $0x198] sm:$0xff] }
  0xd8   : > { %1029 = vrot.lane.b32.xlu1 %v986_v30, %s5627_s14 }
  0xd9   : > { %v1402_v32 = vpop.permute.xlu0 %1401 }
  0xda   : > { %1447 = vst.msk [vmem:[#allocation3 + $0x18] sm:$0xff] %vm1443_vm11, %v1402_v32  ;;  %v502_v9 = vpop.permute.xlu1 %501  ;;  %v1104_v32 = vld [vmem:[#allocation2 + $0x1a0] sm:$0xff] }
  0xdb   : > { %545 = vst.msk [vmem:[#allocation3 + $0x28] sm:$0xff] %vm539_vm4, %v502_v9  ;;  %1157 = vrot.lane.b32.xlu0 %v5914_v42, %s5628_s15  ;;  %v1120_v34 = vpack.c.bf16 %v1104_v32, %v1103_v37 }
  0xdc   : > { %1159 = vrot.lane.b32.xlu1 %v5929_v54, %s5628_s15 }
  0xdd   : > { %v629_v36 = vpop.permute.xlu0 %628  ;;  %v1462_v38 = vld [vmem:[#allocation3 + $0x10] sm:$0xff] }
  0xde   : > { %673 = vst.msk [vmem:[#allocation3 + $0x20] sm:$0xff] %vm668_vm5, %v629_v36  ;;  %v631_v39 = vpop.permute.xlu1 %630  ;;  %5423 = vmatprep.mubr.msk.bf16.mxu0 %vm1503_vm12, %v1462_v38  ;;  %v1233_v36 = vld [vmem:[#allocation2 + $0x1a1] sm:$0xff] }
  0xdf   : > { %674 = vst.msk [vmem:[#allocation3 + $0x28] sm:$0xff] %vm668_vm5, %v631_v39  ;;  %1286 = vrot.lane.b32.xlu0 %v857_v5, %s5629_s26 }
  0xe0   : > { %1288 = vrot.lane.b32.xlu1 %v1245_v35, %s5629_s26 }
  0xe1   : > { %v758_v42 = vpop.permute.xlu0 %757  ;;  %v1463_v43 = vld [vmem:[#allocation3 + $0x18] sm:$0xff] }
  0xe2   : > { %802 = vst.msk [vmem:[#allocation3 + $0x20] sm:$0xff] %vm797_vm6, %v758_v42  ;;  %v760_v12 = vpop.permute.xlu1 %759  ;;  %5424 = vmatmul.mubr.msk.bf16.gmra.mrb[4].mxu0 %vm1503_vm12, %v1463_v43  ;;  %v1361_v42 = vld [vmem:[#allocation2 + $0x19a] sm:$0xff]  ;;  %v1362_v43 = vld [vmem:[#allocation2 + $0x1a2] sm:$0xff] }
  0xe3   : > { %803 = vst.msk [vmem:[#allocation3 + $0x28] sm:$0xff] %vm797_vm6, %v760_v12  ;;  %1415 = vrot.lane.b32.xlu0 %v986_v30, %s5630_s7  ;;  %v1378_v0 = vpack.c.bf16 %v1362_v43, %v1361_v42 }
  0xe4   : > { %515 = vrot.lane.b32.xlu1 %v857_v5, %s5623_s10 }
  0xe5   : > { %v887_v45 = vpop.permute.xlu0 %886 }
  0xe6   : > { %931 = vst.msk [vmem:[#allocation3 + $0x20] sm:$0xff] %vm926_vm7, %v887_v45  ;;  %v889_v46 = vpop.permute.xlu1 %888  ;;  %v1889_v45 = vld [vmem:[#allocation4 + $0x9] sm:$0xff] }
  0xe7   : > { %932 = vst.msk [vmem:[#allocation3 + $0x28] sm:$0xff] %vm926_vm7, %v889_v46  ;;  %1417 = vrot.lane.b32.xlu0 %v1374_v44, %s5630_s7 }
  0xe8   : > { %517 = vrot.lane.b32.xlu1 %v1245_v35, %s5623_s10 }
  0xe9   : > { %v1016_v47 = vpop.permute.xlu0 %1015 }
  0xea   : > { %1060 = vst.msk [vmem:[#allocation3 + $0x20] sm:$0xff] %vm1055_vm8, %v1016_v47  ;;  %v1018_v48 = vpop.permute.xlu1 %1017 }
  0xeb   : > { %1061 = vst.msk [vmem:[#allocation3 + $0x28] sm:$0xff] %vm1055_vm8, %v1018_v48  ;;  %644 = vrot.lane.b32.xlu0 %v986_v30, %s5624_s11 }
  0xec   : > { %646 = vrot.lane.b32.xlu1 %v1374_v44, %s5624_s11 }
  0xed   : > { %v1146_v49 = vpop.permute.xlu0 %1145 }
  0xee   : > { %1190 = vst.msk [vmem:[#allocation3 + $0x20] sm:$0xff] %vm1185_vm9, %v1146_v49  ;;  %v1148_v52 = vpop.permute.xlu1 %1147 }
  0xef   : > { %1191 = vst.msk [vmem:[#allocation3 + $0x28] sm:$0xff] %vm1185_vm9, %v1148_v52  ;;  %773 = vrot.lane.b32.xlu0 %v5929_v54, %s5625_s12 }
  0xf0   : > { %775 = vrot.lane.b32.xlu1 %v5948_v4, %s5625_s12 }
  0xf1   : > { %v1275_v55 = vpop.permute.xlu0 %1274 }
  0xf2   : > { %1319 = vst.msk [vmem:[#allocation3 + $0x20] sm:$0xff] %vm1314_vm10, %v1275_v55  ;;  %v1277_v58 = vpop.permute.xlu1 %1276  ;;  %v2049_v55 = vpack.c.bf16 %v2018_v51, %v2017_v50  ;;  %v1825_v50 = vld [vmem:[#allocation4 + $0x8] sm:$0xff] }
  0xf3   : > { %1320 = vst.msk [vmem:[#allocation3 + $0x28] sm:$0xff] %vm1314_vm10, %v1277_v58  ;;  %902 = vrot.lane.b32.xlu0 %v1245_v35, %s5626_s13  ;;  %v1232_v35 = vld [vmem:[#allocation2 + $0x199] sm:$0xff] }
  0xf4   : > { %904 = vrot.lane.b32.xlu1 %v859_v53, %s5626_s13  ;;  %v1249_v39 = vpack.c.bf16 %v1233_v36, %v1232_v35 }
  0xf5   : > { %v1404_v17 = vpop.permute.xlu0 %1403 }
  0xf6   : > { %1448 = vst.msk [vmem:[#allocation3 + $0x20] sm:$0xff] %vm1443_vm11, %v1404_v17  ;;  %v504_v54 = vpop.permute.xlu1 %503 }
  0xf7   : > { %546 = vst.msk [vmem:[#allocation3 + $0x30] sm:$0xff] %vm539_vm4, %v504_v54  ;;  %1031 = vrot.lane.b32.xlu0 %v1374_v44, %s5627_s14  ;;  %v1888_v44 = vld [vmem:[#allocation4 + $0x1] sm:$0xff] }
  0xf8   : > { %1033 = vrot.lane.b32.xlu1 %v988_v60, %s5627_s14  ;;  %v1920_v49 = vpack.c.bf16 %v1889_v45, %v1888_v44 }
  0xf9   : > { %v1406_v59 = vpop.permute.xlu0 %1405 }
  0xfa   : > { %1449 = vst.msk [vmem:[#allocation3 + $0x28] sm:$0xff] %vm1443_vm11, %v1406_v59  ;;  %v506_v63 = vpop.permute.xlu1 %505 }
  0xfb   : > { %547 = vst.msk [vmem:[#allocation3 + $0x38] sm:$0xff] %vm539_vm4, %v506_v63  ;;  %1161 = vrot.lane.b32.xlu0 %v5948_v4, %s5628_s15 }
  0xfc   : > { %1163 = vrot.lane.b32.xlu1 %v5963_v19, %s5628_s15 }
  0xfd   : > { %v633_v3 = vpop.permute.xlu0 %632  ;;  %v1464_v6 = vld [vmem:[#allocation3 + $0x20] sm:$0xff] }
  0xfe   : > { %675 = vst.msk [vmem:[#allocation3 + $0x30] sm:$0xff] %vm668_vm5, %v633_v3  ;;  %v635_v7 = vpop.permute.xlu1 %634  ;;  %5427 = vmatprep.mubr.msk.bf16.mxu0 %vm1503_vm12, %v1464_v6 }
  0xff   : > { %676 = vst.msk [vmem:[#allocation3 + $0x38] sm:$0xff] %vm668_vm5, %v635_v7  ;;  %1290 = vrot.lane.b32.xlu0 %v859_v53, %s5629_s26 }
 0x100   : > { %1292 = vrot.lane.b32.xlu1 %v1247_v1, %s5629_s26 }
 0x101   : > { %v762_v4 = vpop.permute.xlu0 %761  ;;  %v1465_v20 = vld [vmem:[#allocation3 + $0x28] sm:$0xff] }
 0x102   : > { %804 = vst.msk [vmem:[#allocation3 + $0x30] sm:$0xff] %vm797_vm6, %v762_v4  ;;  %v764_v11 = vpop.permute.xlu1 %763  ;;  %5428 = vmatmul.mubr.msk.bf16.gmra.mrb[8].mxu0 %vm1503_vm12, %v1465_v20 }
 0x103   : > { %805 = vst.msk [vmem:[#allocation3 + $0x38] sm:$0xff] %vm797_vm6, %v764_v11  ;;  %1419 = vrot.lane.b32.xlu0 %v988_v60, %s5630_s7 }
 0x104   : > { %519 = vrot.lane.b32.xlu1 %v859_v53, %s5623_s10 }
 0x105   : > { %v891_v2 = vpop.permute.xlu0 %890 }
 0x106   : > { %933 = vst.msk [vmem:[#allocation3 + $0x30] sm:$0xff] %vm926_vm7, %v891_v2  ;;  %v893_v14 = vpop.permute.xlu1 %892 }
 0x107   : > { %934 = vst.msk [vmem:[#allocation3 + $0x38] sm:$0xff] %vm926_vm7, %v893_v14  ;;  %1421 = vrot.lane.b32.xlu0 %v1376_v13, %s5630_s7 }
 0x108   : > { %521 = vrot.lane.b32.xlu1 %v1247_v1, %s5623_s10  ;;  %s5631_s10 = smov 48  }
 0x109   : > { %v1020_v15 = vpop.permute.xlu0 %1019 }
 0x10a   : > { %1062 = vst.msk [vmem:[#allocation3 + $0x30] sm:$0xff] %vm1055_vm8, %v1020_v15  ;;  %v1022_v21 = vpop.permute.xlu1 %1021 }
 0x10b   : > { %1063 = vst.msk [vmem:[#allocation3 + $0x38] sm:$0xff] %vm1055_vm8, %v1022_v21  ;;  %648 = vrot.lane.b32.xlu0 %v988_v60, %s5624_s11 }
 0x10c   : > { %650 = vrot.lane.b32.xlu1 %v1376_v13, %s5624_s11 }
 0x10d   : > { %v1150_v23 = vpop.permute.xlu0 %1149 }
 0x10e   : > { %1192 = vst.msk [vmem:[#allocation3 + $0x30] sm:$0xff] %vm1185_vm9, %v1150_v23  ;;  %v1152_v5 = vpop.permute.xlu1 %1151 }
 0x10f   : > { %1193 = vst.msk [vmem:[#allocation3 + $0x38] sm:$0xff] %vm1185_vm9, %v1152_v5  ;;  %777 = vrot.lane.b32.xlu0 %v5963_v19, %s5625_s12  ;;  %v6141_v19 = vpack.c.bf16 %v974_v29, %v973_v28 }
 0x110   : > { %779 = vrot.lane.b32.xlu1 %v6126_v22, %s5625_s12  ;;  %s5632_s12 = smov 56  }
 0x111   : > { %v1279_v27 = vpop.permute.xlu0 %1278 }
 0x112   : > { %1321 = vst.msk [vmem:[#allocation3 + $0x30] sm:$0xff] %vm1314_vm10, %v1279_v27  ;;  %v1281_v30 = vpop.permute.xlu1 %1280 }
 0x113   : > { %1322 = vst.msk [vmem:[#allocation3 + $0x38] sm:$0xff] %vm1314_vm10, %v1281_v30  ;;  %906 = vrot.lane.b32.xlu0 %v1247_v1, %s5626_s13 }
 0x114   : > { %908 = vrot.lane.b32.xlu1 %v6134_v26, %s5626_s13 }
 0x115   : > { %v1408_v31 = vpop.permute.xlu0 %1407 }
 0x116   : > { %1450 = vst.msk [vmem:[#allocation3 + $0x30] sm:$0xff] %vm1443_vm11, %v1408_v31  ;;  %v508_v33 = vpop.permute.xlu1 %507 }
 0x117   : > { %548 = vst.msk [vmem:[#allocation3 + $0x40] sm:$0xff] %vm539_vm4, %v508_v33  ;;  %1035 = vrot.lane.b32.xlu0 %v1376_v13, %s5627_s14 }
 0x118   : > { %1037 = vrot.lane.b32.xlu1 %v6141_v19, %s5627_s14  ;;  %s5633_s14 = smov 64  }
 0x119   : > { %v1410_v9 = vpop.permute.xlu0 %1409 }
 0x11a   : > { %1451 = vst.msk [vmem:[#allocation3 + $0x38] sm:$0xff] %vm1443_vm11, %v1410_v9  ;;  %v510_v38 = vpop.permute.xlu1 %509 }
 0x11b   : > { %549 = vst.msk [vmem:[#allocation3 + $0x48] sm:$0xff] %vm539_vm4, %v510_v38  ;;  %1165 = vrot.lane.b32.xlu0 %v6126_v22, %s5628_s15 }
 0x11c   : > { %1167 = vrot.lane.b32.xlu1 %v1120_v34, %s5628_s15 }
 0x11d   : > { %v637_v40 = vpop.permute.xlu0 %636  ;;  %v1466_v41 = vld [vmem:[#allocation3 + $0x30] sm:$0xff] }
 0x11e   : > { %677 = vst.msk [vmem:[#allocation3 + $0x40] sm:$0xff] %vm668_vm5, %v637_v40  ;;  %v639_v12 = vpop.permute.xlu1 %638  ;;  %5431 = vmatprep.mubr.msk.bf16.mxu0 %vm1503_vm12, %v1466_v41 }
 0x11f   : > { %678 = vst.msk [vmem:[#allocation3 + $0x48] sm:$0xff] %vm668_vm5, %v639_v12  ;;  %1294 = vrot.lane.b32.xlu0 %v6134_v26, %s5629_s26 }
 0x120   : > { %1296 = vrot.lane.b32.xlu1 %v1249_v39, %s5629_s26 }
 0x121   : > { %v766_v46 = vpop.permute.xlu0 %765  ;;  %v1467_v47 = vld [vmem:[#allocation3 + $0x38] sm:$0xff] }
 0x122   : > { %806 = vst.msk [vmem:[#allocation3 + $0x40] sm:$0xff] %vm797_vm6, %v766_v46  ;;  %v768_v48 = vpop.permute.xlu1 %767  ;;  %5432 = vmatmul.mubr.msk.bf16.gmra.mrb[12].mxu0 %vm1503_vm12, %v1467_v47 }
 0x123   : > { %807 = vst.msk [vmem:[#allocation3 + $0x48] sm:$0xff] %vm797_vm6, %v768_v48  ;;  %1423 = vrot.lane.b32.xlu0 %v6141_v19, %s5630_s7 }
 0x124   : > { %1425 = vrot.lane.b32.xlu1 %v1378_v0, %s5630_s7 }
 0x125   : > { %v895_v52 = vpop.permute.xlu0 %894 }
 0x126   : > { %935 = vst.msk [vmem:[#allocation3 + $0x40] sm:$0xff] %vm926_vm7, %v895_v52  ;;  %v897_v53 = vpop.permute.xlu1 %896 }
 0x127   : > { %936 = vst.msk [vmem:[#allocation3 + $0x48] sm:$0xff] %vm926_vm7, %v897_v53  ;;  %1952 = vrot.lane.b32.xlu0 %v1920_v49, %s5624_s11  ;;  %v1824_v49 = vld [vmem:[#allocation4] sm:$0xff] }
 0x128   : > { %v1856_v51 = vpack.c.bf16 %v1825_v50, %v1824_v49 }
 0x129   : > { %v1024_v56 = vpop.permute.xlu0 %1023 }
 0x12a   : > { %1064 = vst.msk [vmem:[#allocation3 + $0x40] sm:$0xff] %vm1055_vm8, %v1024_v56  ;;  %v1026_v57 = vpop.permute.xlu1 %1025 }
 0x12b   : > { %1065 = vst.msk [vmem:[#allocation3 + $0x48] sm:$0xff] %vm1055_vm8, %v1026_v57  ;;  %2081 = vrot.lane.b32.xlu0 %v2049_v55, %s5626_s13  ;;  %v6307_v55 = vld [vmem:[%s7161_s2] ss:$0 sm:$0xff] }
 0x12c   : > { %1872 = vst.msk [vmem:[#allocation5] sm:$0xff] %vm1749_vm13, %v1856_v51 }
 0x12d   : > { %v1154_v58 = vpop.permute.xlu0 %1153 }
 0x12e   : > { %1194 = vst.msk [vmem:[#allocation3 + $0x40] sm:$0xff] %vm1185_vm9, %v1154_v58  ;;  %v1156_v60 = vpop.permute.xlu1 %1155 }
 0x12f   : > { %1195 = vst.msk [vmem:[#allocation3 + $0x48] sm:$0xff] %vm1185_vm9, %v1156_v60 }
 0x131   : > { %v1283_v17 = vpop.permute.xlu0 %1282 }
 0x132   : > { %1323 = vst.msk [vmem:[#allocation3 + $0x40] sm:$0xff] %vm1314_vm10, %v1283_v17  ;;  %v1285_v54 = vpop.permute.xlu1 %1284 }
 0x133   : > { %1324 = vst.msk [vmem:[#allocation3 + $0x48] sm:$0xff] %vm1314_vm10, %v1285_v54 }
 0x135   : > { %v1412_v59 = vpop.permute.xlu0 %1411 }
 0x136   : > { %1452 = vst.msk [vmem:[#allocation3 + $0x40] sm:$0xff] %vm1443_vm11, %v1412_v59  ;;  %v512_v61 = vpop.permute.xlu1 %511 }
 0x137   : > { %550 = vst.msk [vmem:[#allocation3 + $0x50] sm:$0xff] %vm539_vm4, %v512_v61 }
 0x139   : > { %v1414_v62 = vpop.permute.xlu0 %1413 }
 0x13a   : > { %1453 = vst.msk [vmem:[#allocation3 + $0x48] sm:$0xff] %vm1443_vm11, %v1414_v62  ;;  %v514_v63 = vpop.permute.xlu1 %513 }
 0x13b   : > { %551 = vst.msk [vmem:[#allocation3 + $0x58] sm:$0xff] %vm539_vm4, %v514_v63 }
 0x13d   : > { %v641_v1 = vpop.permute.xlu0 %640  ;;  %v1468_v3 = vld [vmem:[#allocation3 + $0x40] sm:$0xff] }
 0x13e   : > { %679 = vst.msk [vmem:[#allocation3 + $0x50] sm:$0xff] %vm668_vm5, %v641_v1  ;;  %v643_v6 = vpop.permute.xlu1 %642  ;;  %5435 = vmatprep.mubr.msk.bf16.mxu0 %vm1503_vm12, %v1468_v3 }
 0x13f   : > { %680 = vst.msk [vmem:[#allocation3 + $0x58] sm:$0xff] %vm668_vm5, %v643_v6 }
 0x141   : > { %v770_v7 = vpop.permute.xlu0 %769  ;;  %v1469_v8 = vld [vmem:[#allocation3 + $0x48] sm:$0xff] }
 0x142   : > { %808 = vst.msk [vmem:[#allocation3 + $0x50] sm:$0xff] %vm797_vm6, %v770_v7  ;;  %v772_v10 = vpop.permute.xlu1 %771  ;;  %5436 = vmatmul.mubr.msk.bf16.gmra.mrb[16].mxu0 %vm1503_vm12, %v1469_v8 }
 0x143   : > { %809 = vst.msk [vmem:[#allocation3 + $0x58] sm:$0xff] %vm797_vm6, %v772_v10 }
 0x145   : > { %v899_v4 = vpop.permute.xlu0 %898 }
 0x146   : > { %937 = vst.msk [vmem:[#allocation3 + $0x50] sm:$0xff] %vm926_vm7, %v899_v4  ;;  %v901_v20 = vpop.permute.xlu1 %900 }
 0x147   : > { %938 = vst.msk [vmem:[#allocation3 + $0x58] sm:$0xff] %vm926_vm7, %v901_v20 }
 0x149   : > { %v1028_v11 = vpop.permute.xlu0 %1027 }
 0x14a   : > { %1066 = vst.msk [vmem:[#allocation3 + $0x50] sm:$0xff] %vm1055_vm8, %v1028_v11  ;;  %v1030_v13 = vpop.permute.xlu1 %1029 }
 0x14b   : > { %1067 = vst.msk [vmem:[#allocation3 + $0x58] sm:$0xff] %vm1055_vm8, %v1030_v13 }
 0x14d   : > { %v1158_v2 = vpop.permute.xlu0 %1157 }
 0x14e   : > { %1196 = vst.msk [vmem:[#allocation3 + $0x50] sm:$0xff] %vm1185_vm9, %v1158_v2  ;;  %v1160_v14 = vpop.permute.xlu1 %1159 }
 0x14f   : > { %1197 = vst.msk [vmem:[#allocation3 + $0x58] sm:$0xff] %vm1185_vm9, %v1160_v14 }
 0x151   : > { %v1287_v15 = vpop.permute.xlu0 %1286 }
 0x152   : > { %1325 = vst.msk [vmem:[#allocation3 + $0x50] sm:$0xff] %vm1314_vm10, %v1287_v15  ;;  %v1289_v16 = vpop.permute.xlu1 %1288 }
 0x153   : > { %1326 = vst.msk [vmem:[#allocation3 + $0x58] sm:$0xff] %vm1314_vm10, %v1289_v16 }
 0x155   : > { %v1416_v18 = vpop.permute.xlu0 %1415 }
 0x156   : > { %1454 = vst.msk [vmem:[#allocation3 + $0x50] sm:$0xff] %vm1443_vm11, %v1416_v18  ;;  %v516_v21 = vpop.permute.xlu1 %515 }
 0x157   : > { %552 = vst.msk [vmem:[#allocation3 + $0x60] sm:$0xff] %vm539_vm4, %v516_v21 }
 0x159   : > { %v1418_v22 = vpop.permute.xlu0 %1417 }
 0x15a   : > { %1455 = vst.msk [vmem:[#allocation3 + $0x58] sm:$0xff] %vm1443_vm11, %v1418_v22  ;;  %v518_v23 = vpop.permute.xlu1 %517 }
 0x15b   : > { %553 = vst.msk [vmem:[#allocation3 + $0x68] sm:$0xff] %vm539_vm4, %v518_v23 }
 0x15d   : > { %v645_v24 = vpop.permute.xlu0 %644  ;;  %v1470_v25 = vld [vmem:[#allocation3 + $0x50] sm:$0xff] }
 0x15e   : > { %681 = vst.msk [vmem:[#allocation3 + $0x60] sm:$0xff] %vm668_vm5, %v645_v24  ;;  %v647_v5 = vpop.permute.xlu1 %646  ;;  %5439 = vmatprep.mubr.msk.bf16.mxu0 %vm1503_vm12, %v1470_v25 }
 0x15f   : > { %682 = vst.msk [vmem:[#allocation3 + $0x68] sm:$0xff] %vm668_vm5, %v647_v5 }
 0x161   : > { %v774_v26 = vpop.permute.xlu0 %773  ;;  %v1471_v27 = vld [vmem:[#allocation3 + $0x58] sm:$0xff] }
 0x162   : > { %810 = vst.msk [vmem:[#allocation3 + $0x60] sm:$0xff] %vm797_vm6, %v774_v26  ;;  %v776_v28 = vpop.permute.xlu1 %775  ;;  %5440 = vmatmul.mubr.msk.bf16.gmra.mrb[20].mxu0 %vm1503_vm12, %v1471_v27 }
 0x163   : > { %811 = vst.msk [vmem:[#allocation3 + $0x68] sm:$0xff] %vm797_vm6, %v776_v28 }
 0x165   : > { %v903_v29 = vpop.permute.xlu0 %902 }
 0x166   : > { %939 = vst.msk [vmem:[#allocation3 + $0x60] sm:$0xff] %vm926_vm7, %v903_v29  ;;  %v905_v30 = vpop.permute.xlu1 %904 }
 0x167   : > { %940 = vst.msk [vmem:[#allocation3 + $0x68] sm:$0xff] %vm926_vm7, %v905_v30 }
 0x169   : > { %v1032_v19 = vpop.permute.xlu0 %1031 }
 0x16a   : > { %1068 = vst.msk [vmem:[#allocation3 + $0x60] sm:$0xff] %vm1055_vm8, %v1032_v19  ;;  %v1034_v31 = vpop.permute.xlu1 %1033 }
 0x16b   : > { %1069 = vst.msk [vmem:[#allocation3 + $0x68] sm:$0xff] %vm1055_vm8, %v1034_v31 }
 0x16d   : > { %v1162_v37 = vpop.permute.xlu0 %1161 }
 0x16e   : > { %1198 = vst.msk [vmem:[#allocation3 + $0x60] sm:$0xff] %vm1185_vm9, %v1162_v37  ;;  %v1164_v32 = vpop.permute.xlu1 %1163 }
 0x16f   : > { %1199 = vst.msk [vmem:[#allocation3 + $0x68] sm:$0xff] %vm1185_vm9, %v1164_v32 }
 0x171   : > { %v1291_v33 = vpop.permute.xlu0 %1290 }
 0x172   : > { %1327 = vst.msk [vmem:[#allocation3 + $0x60] sm:$0xff] %vm1314_vm10, %v1291_v33  ;;  %v1293_v34 = vpop.permute.xlu1 %1292 }
 0x173   : > { %1328 = vst.msk [vmem:[#allocation3 + $0x68] sm:$0xff] %vm1314_vm10, %v1293_v34 }
 0x175   : > { %v1420_v9 = vpop.permute.xlu0 %1419 }
 0x176   : > { %1456 = vst.msk [vmem:[#allocation3 + $0x60] sm:$0xff] %vm1443_vm11, %v1420_v9  ;;  %v520_v35 = vpop.permute.xlu1 %519 }
 0x177   : > { %554 = vst.msk [vmem:[#allocation3 + $0x70] sm:$0xff] %vm539_vm4, %v520_v35 }
 0x179   : > { %v1422_v36 = vpop.permute.xlu0 %1421 }
 0x17a   : > { %1457 = vst.msk [vmem:[#allocation3 + $0x68] sm:$0xff] %vm1443_vm11, %v1422_v36  ;;  %v522_v38 = vpop.permute.xlu1 %521 }
 0x17b   : > { %555 = vst.msk [vmem:[#allocation3 + $0x78] sm:$0xff] %vm539_vm4, %v522_v38  ;;  %vm2387_vm4 = vcmask 326912  }
 0x17d   : > { %v649_v39 = vpop.permute.xlu0 %648  ;;  %v1472_v40 = vld [vmem:[#allocation3 + $0x60] sm:$0xff] }
 0x17e   : > { %683 = vst.msk [vmem:[#allocation3 + $0x70] sm:$0xff] %vm668_vm5, %v649_v39  ;;  %v651_v41 = vpop.permute.xlu1 %650  ;;  %5443 = vmatprep.mubr.msk.bf16.mxu0 %vm1503_vm12, %v1472_v40 }
 0x17f   : > { %684 = vst.msk [vmem:[#allocation3 + $0x78] sm:$0xff] %vm668_vm5, %v651_v41  ;;  %v5552_v41 = vld [vmem:[%s7162_s3] sm:$0xff]   ;;  %vm2516_vm5 = vcmask 392512  }
 0x180   : > { %5451 = vmatprep.subr.bf16.mxu1 %v5552_v41 }
 0x181   : > { %v778_v42 = vpop.permute.xlu0 %777  ;;  %v1473_v43 = vld [vmem:[#allocation3 + $0x68] sm:$0xff]  ;;  %5452 = vmatpush3.bf16.msra.mxu1 %v5552_v41 }
 0x182   : > { %812 = vst.msk [vmem:[#allocation3 + $0x70] sm:$0xff] %vm797_vm6, %v778_v42  ;;  %v780_v12 = vpop.permute.xlu1 %779  ;;  %5444 = vmatmul.mubr.msk.bf16.gmra.mrb[24].mxu0 %vm1503_vm12, %v1473_v43 }
 0x183   : > { %813 = vst.msk [vmem:[#allocation3 + $0x78] sm:$0xff] %vm797_vm6, %v780_v12  ;;  %vm2646_vm6 = vcmask 458112  }
 0x185   : > { %v907_v0 = vpop.permute.xlu0 %906 }
 0x186   : > { %941 = vst.msk [vmem:[#allocation3 + $0x70] sm:$0xff] %vm926_vm7, %v907_v0  ;;  %v909_v44 = vpop.permute.xlu1 %908 }
 0x187   : > { %942 = vst.msk [vmem:[#allocation3 + $0x78] sm:$0xff] %vm926_vm7, %v909_v44  ;;  %vm2775_vm7 = vcmask 523712  }
 0x189   : > { %v1036_v45 = vpop.permute.xlu0 %1035 }
 0x18a   : > { %1070 = vst.msk [vmem:[#allocation3 + $0x70] sm:$0xff] %vm1055_vm8, %v1036_v45  ;;  %v1038_v46 = vpop.permute.xlu1 %1037 }
 0x18b   : > { %1071 = vst.msk [vmem:[#allocation3 + $0x78] sm:$0xff] %vm1055_vm8, %v1038_v46  ;;  %vm2904_vm8 = vcmask 589312  }
 0x18d   : > { %v1166_v47 = vpop.permute.xlu0 %1165 }
 0x18e   : > { %1200 = vst.msk [vmem:[#allocation3 + $0x70] sm:$0xff] %vm1185_vm9, %v1166_v47  ;;  %v1168_v48 = vpop.permute.xlu1 %1167  ;;  %v5553_v47 = vld [vmem:[%s7162_s3 + $0x8] sm:$0xff]  }
 0x18f   : > { %1201 = vst.msk [vmem:[#allocation3 + $0x78] sm:$0xff] %vm1185_vm9, %v1168_v48  ;;  %5453 = vmatprep.subr.bf16.mxu1 %v5553_v47  ;;  %vm2980_vm9 = vcmask 588800  }
 0x190   : > { %5454 = vmatpush3.bf16.msra.mxu1 %v5553_v47 }
 0x191   : > { %v1295_v52 = vpop.permute.xlu0 %1294 }
 0x192   : > { %1329 = vst.msk [vmem:[#allocation3 + $0x70] sm:$0xff] %vm1314_vm10, %v1295_v52  ;;  %v1297_v53 = vpop.permute.xlu1 %1296  ;;  %v5554_v52 = vld [vmem:[%s7162_s3 + $0x10] sm:$0xff]  }
 0x193   : > { %1330 = vst.msk [vmem:[#allocation3 + $0x78] sm:$0xff] %vm1314_vm10, %v1297_v53  ;;  %5455 = vmatprep.subr.bf16.mxu1 %v5554_v52  ;;  %vm4442_vm10 = vcmask 1040384  }
 0x194   : > { %5456 = vmatpush3.bf16.msra.mxu1 %v5554_v52 }
 0x195   : > { %v1424_v56 = vpop.permute.xlu0 %1423  ;;  %v5421_v57 = vpop.f32.mrb[0].mxu0 }
 0x196   : > { %1458 = vst.msk [vmem:[#allocation3 + $0x70] sm:$0xff] %vm1443_vm11, %v1424_v56  ;;  %v1599_v58 = vadd.f32 %v5421_v57, %v6307_v55  ;;  %v1426_v60 = vpop.permute.xlu1 %1425  ;;  %v1590_v17 = vpop.f32.mrb[1].mxu0  ;;  %v5555_v56 = vld [vmem:[%s7162_s3 + $0x18] sm:$0xff]  }
 0x197   : > { %1459 = vst.msk [vmem:[#allocation3 + $0x78] sm:$0xff] %vm1443_vm11, %v1426_v60  ;;  %v1591_v54 = vadd.f32 %v6307_v55, %v1590_v17  ;;  %v5422_v59 = vpop.f32.mrb[2].mxu0  ;;  %5457 = vmatprep.subr.bf16.mxu1 %v5555_v56  ;;  %v5556_v60 = vld [vmem:[%s7162_s3 + $0x20] ss:$0 sps:$4 sm:$0xff]   ;;  %vm4955_vm11 = vcmask 1041409  }
 0x198   : > { %v1719_v61 = vmax.f32 %v1599_v58, 0.0  ;;  %v1602_v62 = vadd.f32 %v5422_v59, %v6307_v55  ;;  %v1593_v63 = vpop.f32.mrb[3].mxu0  ;;  %5458 = vmatpush3.bf16.msra.mxu1 %v5555_v56 }
 0x199   : > { %v1717_v1 = vmax.f32 %v1591_v54, 0.0  ;;  %v1594_v3 = vadd.f32 %v6307_v55, %v1593_v63  ;;  %v1953_v6 = vpop.permute.xlu0 %1952  ;;  %5494 = vmatprep.subr.msk.bf16.mxu1 %vm3029_vm2, %v5556_v60  ;;  %v3031_v54 = vsel %vm3029_vm2, %v5556_v60, 0 }
 0x19a   : > { %1794 = vst.msk [vmem:[#allocation4 + $0x31] sm:$0xff] %vm1749_vm13, %v1719_v61  ;;  %v1720_v7 = vmax.f32 %v1602_v62, 0.0 }
 0x19b   : > { %2001 = vst.msk [vmem:[#allocation5] sm:$0xff] %vm2000_vm0, %v1953_v6  ;;  %v1718_v8 = vmax.f32 %v1594_v3, 0.0 }
 0x19c   : > { %1792 = vst.msk [vmem:[#allocation4 + $0x19] sm:$0xff] %vm1749_vm13, %v1717_v1  ;;  %1795 = vst.msk [vmem:[#allocation4 + $0x39] sm:$0xff] %vm1749_vm13, %v1720_v7  ;;  %5460 = vmatpush3.bf16.msra.mxu1 %v3031_v54 }
 0x19d   : > { %1793 = vst.msk [vmem:[#allocation4 + $0x21] sm:$0xff] %vm1749_vm13, %v1718_v8  ;;  %v1474_v10 = vld [vmem:[#allocation3 + $0x70] sm:$0xff]  ;;  %v2082_v4 = vpop.permute.xlu0 %2081 }
 0x19e   : > { %5447 = vmatprep.mubr.msk.bf16.mxu0 %vm1503_vm12, %v1474_v10  ;;  %v1475_v20 = vld [vmem:[#allocation3 + $0x78] sm:$0xff]  ;;  %2130 = vst.msk [vmem:[#allocation5] sm:$0xff] %vm2129_vm1, %v2082_v4 }
 0x19f   : > { %5448 = vmatmul.mubr.msk.bf16.gmra.mrb[28].mxu0 %vm1503_vm12, %v1475_v20  ;;  %vm4957_vm12 = vcmask 1042434  }
 0x1a1   : > { %v2534_v11 = vld [vmem:[#allocation4 + $0x30] sm:$0xff] }
 0x1a2   : > { %v2663_v21 = vld [vmem:[#allocation4 + $0x31] sm:$0xff] }
 0x1a3   : > { %v2535_v13 = vld [vmem:[#allocation4 + $0x38] sm:$0xff] }
 0x1a4   : > { %v2566_v2 = vpack.c.bf16 %v2535_v13, %v2534_v11  ;;  %v2146_v14 = vld [vmem:[#allocation4 + $0x18] sm:$0xff]  ;;  %v2147_v15 = vld [vmem:[#allocation4 + $0x20] sm:$0xff] }
 0x1a5   : > { %v2664_v16 = vld [vmem:[#allocation4 + $0x39] sm:$0xff]  ;;  %v2178_v18 = vpack.c.bf16 %v2147_v15, %v2146_v14  ;;  %v1891_v5 = vld [vmem:[#allocation4 + $0x21] sm:$0xff] }
 0x1a6   : > { %2598 = vrot.lane.b32.xlu0 %v2566_v2, %s5631_s10  ;;  %2212 = vrot.lane.b32.xlu1 %v2566_v2, %s5628_s15  ;;  %1874 = vst.msk [vmem:[#allocation5 + $0x10] sm:$0xff] %vm1749_vm13, %v2566_v2  ;;  %v2695_v22 = vpack.c.bf16 %v2664_v16, %v2663_v21  ;;  %v2792_v23 = vld [vmem:[#allocation4 + $0x32] sm:$0xff]  ;;  %v2793_v24 = vld [vmem:[#allocation4 + $0x3a] sm:$0xff]  ;;  %v2020_v30 = vld [vmem:[#allocation4 + $0x22] sm:$0xff] }
 0x1a7   : > { %1873 = vst.msk [vmem:[#allocation5 + $0x8] sm:$0xff] %vm1749_vm13, %v2178_v18  ;;  %v2824_v25 = vpack.c.bf16 %v2793_v24, %v2792_v23  ;;  %v1890_v26 = vld [vmem:[#allocation4 + $0x19] sm:$0xff] }
 0x1a8   : > { %v1921_v27 = vpack.c.bf16 %v1891_v5, %v1890_v26  ;;  %v2019_v29 = vld [vmem:[#allocation4 + $0x1a] sm:$0xff] }
 0x1a9   : > { %v2050_v35 = vpack.c.bf16 %v2020_v30, %v2019_v29 }
 0x1aa   : > { %2727 = vrot.lane.b32.xlu0 %v2695_v22, %s5632_s12  ;;  %2341 = vrot.lane.b32.xlu1 %v2695_v22, %s5630_s7 }
 0x1ae   : > { %2856 = vrot.lane.b32.xlu0 %v2824_v25, %s5633_s14  ;;  %2470 = vrot.lane.b32.xlu1 %v2824_v25, %s5634_s16 }
 0x1b2   : > { %2085 = vrot.lane.b32.xlu0 %v2824_v25, %s5626_s13  ;;  %1956 = vrot.lane.b32.xlu1 %v2695_v22, %s5624_s11 }
 0x1b5   : > { %v5425_v28 = vpop.f32.mrb[4].mxu0 }
 0x1b6   : > { %v1615_v19 = vadd.f32 %v5425_v28, %v6307_v55  ;;  %v1606_v31 = vpop.f32.mrb[5].mxu0  ;;  %2210 = vrot.lane.b32.xlu0 %v2178_v18, %s5628_s15  ;;  %1954 = vrot.lane.b32.xlu1 %v1921_v27, %s5624_s11 }
 0x1b7   : > { %v1607_v37 = vadd.f32 %v6307_v55, %v1606_v31  ;;  %v5426_v32 = vpop.f32.mrb[6].mxu0 }
 0x1b8   : > { %v1723_v33 = vmax.f32 %v1615_v19, 0.0  ;;  %v1618_v34 = vadd.f32 %v5426_v32, %v6307_v55  ;;  %v1609_v9 = vpop.f32.mrb[7].mxu0 }
 0x1b9   : > { %v1721_v36 = vmax.f32 %v1607_v37, 0.0  ;;  %v1610_v38 = vadd.f32 %v6307_v55, %v1609_v9 }
 0x1ba   : > { %1798 = vst.msk [vmem:[#allocation4 + $0x61] sm:$0xff] %vm1749_vm13, %v1723_v33  ;;  %v1724_v39 = vmax.f32 %v1618_v34, 0.0  ;;  %2339 = vrot.lane.b32.xlu0 %v1921_v27, %s5630_s7  ;;  %2083 = vrot.lane.b32.xlu1 %v2050_v35, %s5626_s13 }
 0x1bb   : > { %1796 = vst.msk [vmem:[#allocation4 + $0x49] sm:$0xff] %vm1749_vm13, %v1721_v36  ;;  %v1722_v40 = vmax.f32 %v1610_v38, 0.0 }
 0x1bc   : > { %1799 = vst.msk [vmem:[#allocation4 + $0x69] sm:$0xff] %vm1749_vm13, %v1724_v39 }
 0x1bd   : > { %1797 = vst.msk [vmem:[#allocation4 + $0x51] sm:$0xff] %vm1749_vm13, %v1722_v40 }
 0x1be   : > { %2468 = vrot.lane.b32.xlu0 %v2050_v35, %s5634_s16 }
 0x1c1   : > { %v2538_v42 = vld [vmem:[#allocation4 + $0x60] sm:$0xff] }
 0x1c2   : > { %v2536_v44 = vld [vmem:[#allocation4 + $0x48] sm:$0xff] }
 0x1c3   : > { %v2539_v43 = vld [vmem:[#allocation4 + $0x68] sm:$0xff] }
 0x1c4   : > { %v2568_v12 = vpack.c.bf16 %v2539_v43, %v2538_v42  ;;  %v2668_v0 = vld [vmem:[#allocation4 + $0x69] sm:$0xff]  ;;  %v2667_v48 = vld [vmem:[#allocation4 + $0x61] sm:$0xff]  ;;  %v2795_v58 = vld [vmem:[#allocation4 + $0x52] sm:$0xff] }
 0x1c5   : > { %v2537_v45 = vld [vmem:[#allocation4 + $0x50] sm:$0xff]  ;;  %v2697_v49 = vpack.c.bf16 %v2668_v0, %v2667_v48  ;;  %v2796_v50 = vld [vmem:[#allocation4 + $0x62] sm:$0xff] }
 0x1c6   : > { %2602 = vrot.lane.b32.xlu0 %v2568_v12, %s5631_s10  ;;  %2216 = vrot.lane.b32.xlu1 %v2568_v12, %s5628_s15  ;;  %v2567_v46 = vpack.c.bf16 %v2537_v45, %v2536_v44  ;;  %1876 = vst.msk [vmem:[#allocation5 + $0x20] sm:$0xff] %vm1749_vm13, %v2568_v12  ;;  %v2797_v51 = vld [vmem:[#allocation4 + $0x6a] sm:$0xff] }
 0x1c7   : > { %v2826_v53 = vpack.c.bf16 %v2797_v51, %v2796_v50  ;;  %v2794_v57 = vld [vmem:[#allocation4 + $0x4a] sm:$0xff] }
 0x1c8   : > { %1875 = vst.msk [vmem:[#allocation5 + $0x18] sm:$0xff] %vm1749_vm13, %v2567_v46  ;;  %v2825_v17 = vpack.c.bf16 %v2795_v58, %v2794_v57  ;;  %v2666_v61 = vld [vmem:[#allocation4 + $0x51] sm:$0xff]  ;;  %v2665_v6 = vld [vmem:[#allocation4 + $0x49] sm:$0xff] }
 0x1c9   : > { %v2696_v4 = vpack.c.bf16 %v2666_v61, %v2665_v6 }
 0x1ca   : > { %2731 = vrot.lane.b32.xlu0 %v2697_v49, %s5632_s12  ;;  %2345 = vrot.lane.b32.xlu1 %v2697_v49, %s5630_s7 }
 0x1ce   : > { %2860 = vrot.lane.b32.xlu0 %v2826_v53, %s5633_s14  ;;  %2474 = vrot.lane.b32.xlu1 %v2826_v53, %s5634_s16 }
 0x1d2   : > { %2089 = vrot.lane.b32.xlu0 %v2826_v53, %s5626_s13  ;;  %1960 = vrot.lane.b32.xlu1 %v2697_v49, %s5624_s11 }
 0x1d5   : > { %v5429_v59 = vpop.f32.mrb[8].mxu0 }
 0x1d6   : > { %v1631_v62 = vadd.f32 %v5429_v59, %v6307_v55  ;;  %v1622_v63 = vpop.f32.mrb[9].mxu0  ;;  %2858 = vrot.lane.b32.xlu0 %v2825_v17, %s5633_s14  ;;  %2600 = vrot.lane.b32.xlu1 %v2567_v46, %s5631_s10 }
 0x1d7   : > { %v1623_v1 = vadd.f32 %v6307_v55, %v1622_v63  ;;  %v5430_v3 = vpop.f32.mrb[10].mxu0 }
 0x1d8   : > { %v1727_v7 = vmax.f32 %v1631_v62, 0.0  ;;  %v1634_v8 = vadd.f32 %v5430_v3, %v6307_v55  ;;  %v1625_v10 = vpop.f32.mrb[11].mxu0 }
 0x1d9   : > { %v1725_v20 = vmax.f32 %v1623_v1, 0.0  ;;  %v1626_v11 = vadd.f32 %v6307_v55, %v1625_v10 }
 0x1da   : > { %1802 = vst.msk [vmem:[#allocation4 + $0x91] sm:$0xff] %vm1749_vm13, %v1727_v7  ;;  %v1728_v13 = vmax.f32 %v1634_v8, 0.0  ;;  %2214 = vrot.lane.b32.xlu0 %v2567_v46, %s5628_s15  ;;  %2729 = vrot.lane.b32.xlu1 %v2696_v4, %s5632_s12 }
 0x1db   : > { %1800 = vst.msk [vmem:[#allocation4 + $0x79] sm:$0xff] %vm1749_vm13, %v1725_v20  ;;  %v1726_v2 = vmax.f32 %v1626_v11, 0.0 }
 0x1dc   : > { %1803 = vst.msk [vmem:[#allocation4 + $0x99] sm:$0xff] %vm1749_vm13, %v1728_v13 }
 0x1dd   : > { %1801 = vst.msk [vmem:[#allocation4 + $0x81] sm:$0xff] %vm1749_vm13, %v1726_v2 }
 0x1de   : > { %2343 = vrot.lane.b32.xlu0 %v2696_v4, %s5630_s7  ;;  %1958 = vrot.lane.b32.xlu1 %v2696_v4, %s5624_s11 }
 0x1e1   : > { %v2542_v14 = vld [vmem:[#allocation4 + $0x90] sm:$0xff] }
 0x1e2   : > { %2472 = vrot.lane.b32.xlu0 %v2825_v17, %s5634_s16  ;;  %2087 = vrot.lane.b32.xlu1 %v2825_v17, %s5626_s13  ;;  %v2540_v21 = vld [vmem:[#allocation4 + $0x78] sm:$0xff] }
 0x1e3   : > { %v2543_v15 = vld [vmem:[#allocation4 + $0x98] sm:$0xff] }
 0x1e4   : > { %v2570_v16 = vpack.c.bf16 %v2543_v15, %v2542_v14  ;;  %v2672_v18 = vld [vmem:[#allocation4 + $0x99] sm:$0xff]  ;;  %v2671_v24 = vld [vmem:[#allocation4 + $0x91] sm:$0xff]  ;;  %v2799_v29 = vld [vmem:[#allocation4 + $0x82] sm:$0xff] }
 0x1e5   : > { %v2541_v22 = vld [vmem:[#allocation4 + $0x80] sm:$0xff]  ;;  %v2699_v25 = vpack.c.bf16 %v2672_v18, %v2671_v24  ;;  %v2800_v5 = vld [vmem:[#allocation4 + $0x92] sm:$0xff] }
 0x1e6   : > { %2606 = vrot.lane.b32.xlu0 %v2570_v16, %s5631_s10  ;;  %2220 = vrot.lane.b32.xlu1 %v2570_v16, %s5628_s15  ;;  %v2569_v23 = vpack.c.bf16 %v2541_v22, %v2540_v21  ;;  %1878 = vst.msk [vmem:[#allocation5 + $0x30] sm:$0xff] %vm1749_vm13, %v2570_v16  ;;  %v2801_v26 = vld [vmem:[#allocation4 + $0x9a] sm:$0xff] }
 0x1e7   : > { %v2828_v27 = vpack.c.bf16 %v2801_v26, %v2800_v5  ;;  %v2798_v28 = vld [vmem:[#allocation4 + $0x7a] sm:$0xff] }
 0x1e8   : > { %1877 = vst.msk [vmem:[#allocation5 + $0x28] sm:$0xff] %vm1749_vm13, %v2569_v23  ;;  %v2827_v30 = vpack.c.bf16 %v2799_v29, %v2798_v28  ;;  %v2670_v31 = vld [vmem:[#allocation4 + $0x81] sm:$0xff]  ;;  %v2669_v9 = vld [vmem:[#allocation4 + $0x79] sm:$0xff] }
 0x1e9   : > { %v2698_v39 = vpack.c.bf16 %v2670_v31, %v2669_v9 }
 0x1ea   : > { %2735 = vrot.lane.b32.xlu0 %v2699_v25, %s5632_s12  ;;  %2349 = vrot.lane.b32.xlu1 %v2699_v25, %s5630_s7 }
 0x1ee   : > { %2864 = vrot.lane.b32.xlu0 %v2828_v27, %s5633_s14  ;;  %2478 = vrot.lane.b32.xlu1 %v2828_v27, %s5634_s16 }
 0x1f2   : > { %2093 = vrot.lane.b32.xlu0 %v2828_v27, %s5626_s13  ;;  %1964 = vrot.lane.b32.xlu1 %v2699_v25, %s5624_s11 }
 0x1f5   : > { %v5433_v19 = vpop.f32.mrb[12].mxu0 }
 0x1f6   : > { %v1647_v37 = vadd.f32 %v5433_v19, %v6307_v55  ;;  %v1638_v32 = vpop.f32.mrb[13].mxu0  ;;  %2862 = vrot.lane.b32.xlu0 %v2827_v30, %s5633_s14  ;;  %2604 = vrot.lane.b32.xlu1 %v2569_v23, %s5631_s10 }
 0x1f7   : > { %v1639_v33 = vadd.f32 %v6307_v55, %v1638_v32  ;;  %v5434_v34 = vpop.f32.mrb[14].mxu0 }
 0x1f8   : > { %v1731_v35 = vmax.f32 %v1647_v37, 0.0  ;;  %v1650_v36 = vadd.f32 %v5434_v34, %v6307_v55  ;;  %v1641_v38 = vpop.f32.mrb[15].mxu0 }
 0x1f9   : > { %v1729_v40 = vmax.f32 %v1639_v33, 0.0  ;;  %v1642_v41 = vadd.f32 %v6307_v55, %v1641_v38 }
 0x1fa   : > { %1806 = vst.msk [vmem:[#allocation4 + $0xc1] sm:$0xff] %vm1749_vm13, %v1731_v35  ;;  %v1732_v42 = vmax.f32 %v1650_v36, 0.0  ;;  %2218 = vrot.lane.b32.xlu0 %v2569_v23, %s5628_s15  ;;  %2733 = vrot.lane.b32.xlu1 %v2698_v39, %s5632_s12 }
 0x1fb   : > { %1804 = vst.msk [vmem:[#allocation4 + $0xa9] sm:$0xff] %vm1749_vm13, %v1729_v40  ;;  %v1730_v43 = vmax.f32 %v1642_v41, 0.0 }
 0x1fc   : > { %1807 = vst.msk [vmem:[#allocation4 + $0xc9] sm:$0xff] %vm1749_vm13, %v1732_v42 }
 0x1fd   : > { %1805 = vst.msk [vmem:[#allocation4 + $0xb1] sm:$0xff] %vm1749_vm13, %v1730_v43 }
 0x1fe   : > { %2347 = vrot.lane.b32.xlu0 %v2698_v39, %s5630_s7  ;;  %1962 = vrot.lane.b32.xlu1 %v2698_v39, %s5624_s11 }
 0x201   : > { %v2546_v12 = vld [vmem:[#allocation4 + $0xc0] sm:$0xff] }
 0x202   : > { %2476 = vrot.lane.b32.xlu0 %v2827_v30, %s5634_s16  ;;  %2091 = vrot.lane.b32.xlu1 %v2827_v30, %s5626_s13  ;;  %v2544_v46 = vld [vmem:[#allocation4 + $0xa8] sm:$0xff] }
 0x203   : > { %v2547_v0 = vld [vmem:[#allocation4 + $0xc8] sm:$0xff] }
 0x204   : > { %v2572_v44 = vpack.c.bf16 %v2547_v0, %v2546_v12  ;;  %v2676_v45 = vld [vmem:[#allocation4 + $0xc9] sm:$0xff]  ;;  %v2675_v49 = vld [vmem:[#allocation4 + $0xc1] sm:$0xff]  ;;  %v2803_v57 = vld [vmem:[#allocation4 + $0xb2] sm:$0xff] }
 0x205   : > { %v2545_v47 = vld [vmem:[#allocation4 + $0xb0] sm:$0xff]  ;;  %v2701_v50 = vpack.c.bf16 %v2676_v45, %v2675_v49  ;;  %v2804_v51 = vld [vmem:[#allocation4 + $0xc2] sm:$0xff] }
 0x206   : > { %2610 = vrot.lane.b32.xlu0 %v2572_v44, %s5631_s10  ;;  %2224 = vrot.lane.b32.xlu1 %v2572_v44, %s5628_s15  ;;  %v2571_v48 = vpack.c.bf16 %v2545_v47, %v2544_v46  ;;  %1880 = vst.msk [vmem:[#allocation5 + $0x40] sm:$0xff] %vm1749_vm13, %v2572_v44  ;;  %v2805_v52 = vld [vmem:[#allocation4 + $0xca] sm:$0xff] }
 0x207   : > { %v2830_v53 = vpack.c.bf16 %v2805_v52, %v2804_v51  ;;  %v2802_v56 = vld [vmem:[#allocation4 + $0xaa] sm:$0xff] }
 0x208   : > { %1879 = vst.msk [vmem:[#allocation5 + $0x38] sm:$0xff] %vm1749_vm13, %v2571_v48  ;;  %v2829_v58 = vpack.c.bf16 %v2803_v57, %v2802_v56  ;;  %v2674_v17 = vld [vmem:[#allocation4 + $0xb1] sm:$0xff]  ;;  %v2673_v63 = vld [vmem:[#allocation4 + $0xa9] sm:$0xff] }
 0x209   : > { %v2700_v8 = vpack.c.bf16 %v2674_v17, %v2673_v63 }
 0x20a   : > { %2739 = vrot.lane.b32.xlu0 %v2701_v50, %s5632_s12  ;;  %2353 = vrot.lane.b32.xlu1 %v2701_v50, %s5630_s7 }
 0x20e   : > { %2868 = vrot.lane.b32.xlu0 %v2830_v53, %s5633_s14  ;;  %2482 = vrot.lane.b32.xlu1 %v2830_v53, %s5634_s16 }
 0x212   : > { %2097 = vrot.lane.b32.xlu0 %v2830_v53, %s5626_s13  ;;  %1968 = vrot.lane.b32.xlu1 %v2701_v50, %s5624_s11 }
 0x215   : > { %v5437_v60 = vpop.f32.mrb[16].mxu0 }
 0x216   : > { %v1663_v54 = vadd.f32 %v5437_v60, %v6307_v55  ;;  %v1654_v59 = vpop.f32.mrb[17].mxu0  ;;  %2866 = vrot.lane.b32.xlu0 %v2829_v58, %s5633_s14  ;;  %2608 = vrot.lane.b32.xlu1 %v2571_v48, %s5631_s10 }
 0x217   : > { %v1655_v61 = vadd.f32 %v6307_v55, %v1654_v59  ;;  %v5438_v62 = vpop.f32.mrb[18].mxu0 }
 0x218   : > { %v1735_v1 = vmax.f32 %v1663_v54, 0.0  ;;  %v1666_v3 = vadd.f32 %v5438_v62, %v6307_v55  ;;  %v6428_v6 = vpop.permute.xlu0 %2598  ;;  %v2213_v7 = vpop.permute.xlu1 %2212 }
 0x219   : > { %v1733_v10 = vmax.f32 %v1655_v61, 0.0  ;;  %v1657_v4 = vpop.f32.mrb[19].mxu0 }
 0x21a   : > { %1810 = vst.msk [vmem:[#allocation4 + $0xf1] sm:$0xff] %vm1749_vm13, %v1735_v1  ;;  %v1736_v20 = vmax.f32 %v1666_v3, 0.0  ;;  %v1658_v11 = vadd.f32 %v6307_v55, %v1657_v4  ;;  %2222 = vrot.lane.b32.xlu0 %v2571_v48, %s5628_s15  ;;  %2737 = vrot.lane.b32.xlu1 %v2700_v8, %s5632_s12 }
 0x21b   : > { %1808 = vst.msk [vmem:[#allocation4 + $0xd9] sm:$0xff] %vm1749_vm13, %v1733_v10 }
 0x21c   : > { %1811 = vst.msk [vmem:[#allocation4 + $0xf9] sm:$0xff] %vm1749_vm13, %v1736_v20  ;;  %v1734_v13 = vmax.f32 %v1658_v11, 0.0  ;;  %v2728_v2 = vpop.permute.xlu0 %2727  ;;  %v2342_v14 = vpop.permute.xlu1 %2341 }
 0x21e   : > { %1809 = vst.msk [vmem:[#allocation4 + $0xe1] sm:$0xff] %vm1749_vm13, %v1734_v13  ;;  %2351 = vrot.lane.b32.xlu0 %v2700_v8, %s5630_s7  ;;  %1966 = vrot.lane.b32.xlu1 %v2700_v8, %s5624_s11 }
 0x220   : > { %v2857_v15 = vpop.permute.xlu0 %2856  ;;  %v2471_v16 = vpop.permute.xlu1 %2470 }
 0x221   : > { %v2550_v18 = vld [vmem:[#allocation4 + $0xf0] sm:$0xff] }
 0x222   : > { %2480 = vrot.lane.b32.xlu0 %v2829_v58, %s5634_s16  ;;  %2095 = vrot.lane.b32.xlu1 %v2829_v58, %s5626_s13  ;;  %v1844_v25 = vld [vmem:[#allocation4 + $0xf0] sm:$0xff]  ;;  %v2162_v27 = vld [vmem:[#allocation4 + $0xd8] sm:$0xff] }
 0x223   : > { %v2551_v21 = vld [vmem:[#allocation4 + $0xf8] sm:$0xff] }
 0x224   : > { %v2086_v22 = vpop.permute.xlu0 %2085  ;;  %v1957_v23 = vpop.permute.xlu1 %1956  ;;  %v2574_v24 = vpack.c.bf16 %v2551_v21, %v2550_v18  ;;  %v1845_v5 = vld [vmem:[#allocation4 + $0xf8] sm:$0xff] }
 0x225   : > { %2003 = vst.msk [vmem:[#allocation5 + $0x10] sm:$0xff] %vm2000_vm0, %v1957_v23  ;;  %v2680_v26 = vld [vmem:[#allocation4 + $0xf9] sm:$0xff]  ;;  %v1866_v29 = vpack.c.bf16 %v1845_v5, %v1844_v25  ;;  %v2679_v19 = vld [vmem:[#allocation4 + $0xf1] sm:$0xff]  ;;  %v2807_v9 = vld [vmem:[#allocation4 + $0xe2] sm:$0xff] }
 0x226   : > { %v2163_v28 = vld [vmem:[#allocation4 + $0xe0] sm:$0xff]  ;;  %2132 = vst.msk [vmem:[#allocation5 + $0x10] sm:$0xff] %vm2129_vm1, %v2086_v22  ;;  %2614 = vrot.lane.b32.xlu0 %v2574_v24, %s5631_s10  ;;  %2228 = vrot.lane.b32.xlu1 %v2574_v24, %s5628_s15  ;;  %v6446_v32 = vpack.c.bf16 %v2680_v26, %v2679_v19  ;;  %v2422_v33 = vld [vmem:[#allocation4 + $0xf2] sm:$0xff] }
 0x227   : > { %v2186_v30 = vpack.c.bf16 %v2163_v28, %v2162_v27  ;;  %1882 = vst.msk [vmem:[#allocation5 + $0x50] sm:$0xff] %vm1749_vm13, %v1866_v29  ;;  %v2806_v34 = vld [vmem:[#allocation4 + $0xda] sm:$0xff] }
 0x228   : > { %v2211_v31 = vpop.permute.xlu0 %2210  ;;  %v1955_v37 = vpop.permute.xlu1 %1954  ;;  %v2423_v35 = vld [vmem:[#allocation4 + $0xfa] sm:$0xff]  ;;  %v2831_v39 = vpack.c.bf16 %v2807_v9, %v2806_v34 }
 0x229   : > { %1881 = vst.msk [vmem:[#allocation5 + $0x48] sm:$0xff] %vm1749_vm13, %v2186_v30  ;;  %v6455_v40 = vpack.c.bf16 %v2423_v35, %v2422_v33  ;;  %v2292_v42 = vld [vmem:[#allocation4 + $0xe1] sm:$0xff]  ;;  %v2291_v43 = vld [vmem:[#allocation4 + $0xd9] sm:$0xff] }
 0x22a   : > { %2259 = vst.msk [vmem:[#allocation5] sm:$0xff] %vm2258_vm3, %v2211_v31  ;;  %2743 = vrot.lane.b32.xlu0 %v6446_v32, %s5632_s12  ;;  %2357 = vrot.lane.b32.xlu1 %v6446_v32, %s5630_s7  ;;  %v2315_v12 = vpack.c.bf16 %v2292_v42, %v2291_v43 }
 0x22b   : > { %2002 = vst.msk [vmem:[#allocation5 + $0x8] sm:$0xff] %vm2000_vm0, %v1955_v37 }
 0x22c   : > { %v2340_v36 = vpop.permute.xlu0 %2339  ;;  %v2084_v38 = vpop.permute.xlu1 %2083 }
 0x22d   : > { %2388 = vst.msk [vmem:[#allocation5] sm:$0xff] %vm2387_vm4, %v2340_v36 }
 0x22e   : > { %2131 = vst.msk [vmem:[#allocation5 + $0x8] sm:$0xff] %vm2129_vm1, %v2084_v38  ;;  %2870 = vrot.lane.b32.xlu0 %v2831_v39, %s5633_s14  ;;  %2486 = vrot.lane.b32.xlu1 %v6455_v40, %s5634_s16 }
 0x22f   : > { %2260 = vst.msk [vmem:[#allocation5 + $0x8] sm:$0xff] %vm2258_vm3, %v2213_v7 }
 0x230   : > { %2389 = vst.msk [vmem:[#allocation5 + $0x8] sm:$0xff] %vm2387_vm4, %v2342_v14  ;;  %v2469_v41 = vpop.permute.xlu0 %2468 }
 0x231   : > { %2518 = vst.msk [vmem:[#allocation5 + $0x8] sm:$0xff] %vm2516_vm5, %v2471_v16  ;;  %2517 = vst.msk [vmem:[#allocation5] sm:$0xff] %vm2516_vm5, %v2469_v41 }
 0x232   : > { %2647 = vst.msk [vmem:[#allocation5] sm:$0xff] %vm2646_vm6, %v6428_v6  ;;  %2226 = vrot.lane.b32.xlu0 %v2186_v30, %s5628_s15  ;;  %2612 = vrot.lane.b32.xlu1 %v2186_v30, %s5631_s10 }
 0x233   : > { %2776 = vst.msk [vmem:[#allocation5] sm:$0xff] %vm2775_vm7, %v2728_v2 }
 0x234   : > { %2905 = vst.msk [vmem:[#allocation5] sm:$0xff] %vm2904_vm8, %v2857_v15 }
 0x235   : > { %v5441_v0 = vpop.f32.mrb[20].mxu0 }
 0x236   : > { %v1679_v44 = vadd.f32 %v5441_v0, %v6307_v55  ;;  %v1670_v45 = vpop.f32.mrb[21].mxu0  ;;  %2355 = vrot.lane.b32.xlu0 %v2315_v12, %s5630_s7  ;;  %2741 = vrot.lane.b32.xlu1 %v2315_v12, %s5632_s12 }
 0x237   : > { %v1671_v46 = vadd.f32 %v6307_v55, %v1670_v45  ;;  %v5442_v47 = vpop.f32.mrb[22].mxu0 }
 0x238   : > { %v1739_v48 = vmax.f32 %v1679_v44, 0.0  ;;  %v1682_v49 = vadd.f32 %v5442_v47, %v6307_v55  ;;  %v1673_v50 = vpop.f32.mrb[23].mxu0  ;;  %v6477_v51 = vpop.permute.xlu0 %2602 }
 0x239   : > { %v1737_v52 = vmax.f32 %v1671_v46, 0.0  ;;  %v1674_v53 = vadd.f32 %v6307_v55, %v1673_v50  ;;  %v6480_v56 = vpop.permute.xlu1 %2216 }
 0x23a   : > { %1814 = vst.msk [vmem:[#allocation4 + $0x121] sm:$0xff] %vm1749_vm13, %v1739_v48  ;;  %v1740_v57 = vmax.f32 %v1682_v49, 0.0  ;;  %2484 = vrot.lane.b32.xlu0 %v2831_v39, %s5634_s16  ;;  %1970 = vrot.lane.b32.xlu1 %v2315_v12, %s5624_s11 }
 0x23b   : > { %1812 = vst.msk [vmem:[#allocation4 + $0x109] sm:$0xff] %vm1749_vm13, %v1737_v52  ;;  %v1738_v58 = vmax.f32 %v1674_v53, 0.0  ;;  %v2921_v60 = vld [vmem:[#allocation5] sm:$0xff] }
 0x23c   : > { %1815 = vst.msk [vmem:[#allocation4 + $0x129] sm:$0xff] %vm1749_vm13, %v1740_v57  ;;  %5461 = vmatprep.mubr.msk.bf16.mxu1 %vm2980_vm9, %v2921_v60  ;;  %v2732_v17 = vpop.permute.xlu0 %2731 }
 0x23d   : > { %1813 = vst.msk [vmem:[#allocation4 + $0x111] sm:$0xff] %vm1749_vm13, %v1738_v58  ;;  %v2346_v54 = vpop.permute.xlu1 %2345 }
 0x23e   : > { %2872 = vrot.lane.b32.xlu0 %v6455_v40, %s5633_s14  ;;  %2099 = vrot.lane.b32.xlu1 %v2831_v39, %s5626_s13 }
 0x240   : > { %v2861_v59 = vpop.permute.xlu0 %2860 }
 0x241   : > { %v6492_v61 = vpop.permute.xlu1 %2474  ;;  %v2168_v63 = vld [vmem:[#allocation4 + $0x120] sm:$0xff] }
 0x242   : > { %1972 = vrot.lane.b32.xlu1 %v6446_v32, %s5624_s11  ;;  %v2552_v62 = vld [vmem:[#allocation4 + $0x108] sm:$0xff] }
 0x243   : > { %v2169_v1 = vld [vmem:[#allocation4 + $0x128] sm:$0xff] }
 0x244   : > { %v2090_v3 = vpop.permute.xlu0 %2089  ;;  %v2810_v6 = vld [vmem:[#allocation4 + $0x10a] sm:$0xff]  ;;  %v2811_v7 = vld [vmem:[#allocation4 + $0x112] sm:$0xff]  ;;  %v6496_v10 = vpack.c.bf16 %v2169_v1, %v2168_v63  ;;  %v2297_v36 = vld [vmem:[#allocation4 + $0x121] sm:$0xff] }
 0x245   : > { %v2553_v8 = vld [vmem:[#allocation4 + $0x110] sm:$0xff]  ;;  %v1961_v4 = vpop.permute.xlu1 %1960  ;;  %v2833_v20 = vpack.c.bf16 %v2811_v7, %v2810_v6  ;;  %v2426_v41 = vld [vmem:[#allocation4 + $0x122] sm:$0xff] }
 0x246   : > { %v2575_v11 = vpack.c.bf16 %v2553_v8, %v2552_v62  ;;  %2005 = vst.msk [vmem:[#allocation5 + $0x20] sm:$0xff] %vm2000_vm0, %v1961_v4  ;;  %v2682_v13 = vld [vmem:[#allocation4 + $0x111] sm:$0xff]  ;;  %v2681_v14 = vld [vmem:[#allocation4 + $0x109] sm:$0xff] }
 0x247   : > { %1884 = vst.msk [vmem:[#allocation5 + $0x60] sm:$0xff] %vm1749_vm13, %v6496_v10  ;;  %2874 = vrot.lane.b32.xlu0 %v2833_v20, %s5633_s14  ;;  %v2704_v16 = vpack.c.bf16 %v2682_v13, %v2681_v14  ;;  %v2298_v19 = vld [vmem:[#allocation4 + $0x129] sm:$0xff] }
 0x248   : > { %2134 = vst.msk [vmem:[#allocation5 + $0x20] sm:$0xff] %vm2129_vm1, %v2090_v3  ;;  %2616 = vrot.lane.b32.xlu1 %v2575_v11, %s5631_s10  ;;  %v2859_v2 = vpop.permute.xlu0 %2858  ;;  %v2318_v39 = vpack.c.bf16 %v2298_v19, %v2297_v36  ;;  %v2427_v42 = vld [vmem:[#allocation4 + $0x12a] sm:$0xff] }
 0x249   : > { %1883 = vst.msk [vmem:[#allocation5 + $0x58] sm:$0xff] %vm1749_vm13, %v2575_v11  ;;  %v2601_v15 = vpop.permute.xlu1 %2600  ;;  %v2447_v0 = vpack.c.bf16 %v2427_v42, %v2426_v41 }
 0x24a   : > { %2648 = vst.msk [vmem:[#allocation5 + $0x8] sm:$0xff] %vm2646_vm6, %v2601_v15 }
 0x24b   : > { %2101 = vrot.lane.b32.xlu0 %v6455_v40, %s5626_s13 }
 0x24c   : > { %2745 = vrot.lane.b32.xlu1 %v2704_v16, %s5632_s12  ;;  %v2215_v18 = vpop.permute.xlu0 %2214 }
 0x24d   : > { %2261 = vst.msk [vmem:[#allocation5 + $0x10] sm:$0xff] %vm2258_vm3, %v2215_v18  ;;  %v2730_v21 = vpop.permute.xlu1 %2729 }
 0x24e   : > { %2777 = vst.msk [vmem:[#allocation5 + $0x8] sm:$0xff] %vm2775_vm7, %v2730_v21 }
 0x24f   : > { %2906 = vst.msk [vmem:[#allocation5 + $0x8] sm:$0xff] %vm2904_vm8, %v2859_v2  ;;  %2230 = vrot.lane.b32.xlu0 %v2575_v11, %s5628_s15 }
 0x250   : > { %1974 = vrot.lane.b32.xlu1 %v2704_v16, %s5624_s11  ;;  %v2344_v22 = vpop.permute.xlu0 %2343 }
 0x251   : > { %2390 = vst.msk [vmem:[#allocation5 + $0x10] sm:$0xff] %vm2387_vm4, %v2344_v22  ;;  %v1959_v23 = vpop.permute.xlu1 %1958 }
 0x252   : > { %2004 = vst.msk [vmem:[#allocation5 + $0x18] sm:$0xff] %vm2000_vm0, %v1959_v23 }
 0x253   : > { %2359 = vrot.lane.b32.xlu0 %v2704_v16, %s5630_s7 }
 0x254   : > { %2103 = vrot.lane.b32.xlu1 %v2833_v20, %s5626_s13  ;;  %v2473_v24 = vpop.permute.xlu0 %2472 }
 0x255   : > { %2519 = vst.msk [vmem:[#allocation5 + $0x10] sm:$0xff] %vm2516_vm5, %v2473_v24  ;;  %v2088_v25 = vpop.permute.xlu1 %2087  ;;  %v5445_v5 = vpop.f32.mrb[24].mxu0 }
 0x256   : > { %2649 = vst.msk [vmem:[#allocation5 + $0x10] sm:$0xff] %vm2646_vm6, %v6477_v51  ;;  %v1695_v26 = vadd.f32 %v5445_v5, %v6307_v55  ;;  %v1686_v27 = vpop.f32.mrb[25].mxu0  ;;  %v2922_v28 = vld [vmem:[#allocation5 + $0x8] sm:$0xff] }
 0x257   : > { %2133 = vst.msk [vmem:[#allocation5 + $0x18] sm:$0xff] %vm2129_vm1, %v2088_v25  ;;  %v1687_v29 = vadd.f32 %v6307_v55, %v1686_v27  ;;  %5462 = vmatmul.mubr.msk.bf16.vlgmr.msra.gmra.mrb[0].mxu1 %vm2980_vm9, %v2922_v28  ;;  %v5446_v30 = vpop.f32.mrb[26].mxu0  ;;  %2488 = vrot.lane.b32.xlu0 %v2833_v20, %s5634_s16 }
 0x258   : > { %2778 = vst.msk [vmem:[#allocation5 + $0x10] sm:$0xff] %vm2775_vm7, %v2732_v17  ;;  %v1743_v31 = vmax.f32 %v1695_v26, 0.0  ;;  %v1698_v37 = vadd.f32 %v5446_v30, %v6307_v55  ;;  %2232 = vrot.lane.b32.xlu1 %v6496_v10, %s5628_s15  ;;  %v1689_v32 = vpop.f32.mrb[27].mxu0  ;;  %v6534_v33 = vpop.permute.xlu0 %2606 }
 0x259   : > { %2262 = vst.msk [vmem:[#allocation5 + $0x18] sm:$0xff] %vm2258_vm3, %v6480_v56  ;;  %v1741_v34 = vmax.f32 %v1687_v29, 0.0  ;;  %v1690_v9 = vadd.f32 %v6307_v55, %v1689_v32  ;;  %v6539_v35 = vpop.permute.xlu1 %2220 }
 0x25a   : > { %2907 = vst.msk [vmem:[#allocation5 + $0x10] sm:$0xff] %vm2904_vm8, %v2861_v59  ;;  %v1744_v38 = vmax.f32 %v1698_v37, 0.0 }
 0x25b   : > { %2391 = vst.msk [vmem:[#allocation5 + $0x18] sm:$0xff] %vm2387_vm4, %v2346_v54  ;;  %v1742_v40 = vmax.f32 %v1690_v9, 0.0  ;;  %2618 = vrot.lane.b32.xlu0 %v6496_v10, %s5631_s10 }
 0x25c   : > { %2520 = vst.msk [vmem:[#allocation5 + $0x18] sm:$0xff] %vm2516_vm5, %v6492_v61  ;;  %2361 = vrot.lane.b32.xlu1 %v2318_v39, %s5630_s7  ;;  %v6547_v43 = vpop.permute.xlu0 %2735 }
 0x25d   : > { %1818 = vst.msk [vmem:[#allocation4 + $0x151] sm:$0xff] %vm1749_vm13, %v1743_v31  ;;  %1816 = vst.msk [vmem:[#allocation4 + $0x139] sm:$0xff] %vm1749_vm13, %v1741_v34  ;;  %v6550_v12 = vpop.permute.xlu1 %2349 }
 0x25e   : > { %1819 = vst.msk [vmem:[#allocation4 + $0x159] sm:$0xff] %vm1749_vm13, %v1744_v38  ;;  %1817 = vst.msk [vmem:[#allocation4 + $0x141] sm:$0xff] %vm1749_vm13, %v1742_v40 }
 0x25f   : > { %2747 = vrot.lane.b32.xlu0 %v2318_v39, %s5632_s12 }
 0x260   : > { %2490 = vrot.lane.b32.xlu1 %v2447_v0, %s5634_s16  ;;  %v6554_v45 = vpop.permute.xlu0 %2864 }
 0x261   : > { %v2923_v44 = vld [vmem:[#allocation5 + $0x10] sm:$0xff]  ;;  %v6557_v46 = vpop.permute.xlu1 %2478 }
 0x262   : > { %5465 = vmatprep.mubr.msk.bf16.mxu1 %vm2980_vm9, %v2923_v44 }
 0x263   : > { %2876 = vrot.lane.b32.xlu0 %v2447_v0, %s5633_s14 }
 0x264   : > { %v2556_v47 = vld [vmem:[#allocation4 + $0x138] sm:$0xff]  ;;  %v2558_v48 = vld [vmem:[#allocation4 + $0x150] sm:$0xff]  ;;  %v2094_v50 = vpop.permute.xlu0 %2093 }
 0x265   : > { %v2559_v49 = vld [vmem:[#allocation4 + $0x158] sm:$0xff]  ;;  %v2815_v52 = vld [vmem:[#allocation4 + $0x142] sm:$0xff]  ;;  %v1965_v57 = vpop.permute.xlu1 %1964 }
 0x266   : > { %v2814_v51 = vld [vmem:[#allocation4 + $0x13a] sm:$0xff]  ;;  %v6560_v56 = vpack.c.bf16 %v2559_v49, %v2558_v48  ;;  %2007 = vst.msk [vmem:[#allocation5 + $0x30] sm:$0xff] %vm2000_vm0, %v1965_v57  ;;  %v2687_v26 = vld [vmem:[#allocation4 + $0x151] sm:$0xff] }
 0x267   : > { %v2557_v53 = vld [vmem:[#allocation4 + $0x140] sm:$0xff]  ;;  %v2835_v58 = vpack.c.bf16 %v2815_v52, %v2814_v51  ;;  %2136 = vst.msk [vmem:[#allocation5 + $0x30] sm:$0xff] %vm2129_vm1, %v2094_v50  ;;  %v2816_v29 = vld [vmem:[#allocation4 + $0x152] sm:$0xff] }
 0x268   : > { %v2577_v60 = vpack.c.bf16 %v2557_v53, %v2556_v47  ;;  %v2686_v17 = vld [vmem:[#allocation4 + $0x141] sm:$0xff]  ;;  %1886 = vst.msk [vmem:[#allocation5 + $0x70] sm:$0xff] %vm1749_vm13, %v6560_v56  ;;  %v2863_v54 = vpop.permute.xlu0 %2862  ;;  %v2685_v59 = vld [vmem:[#allocation4 + $0x139] sm:$0xff] }
 0x269   : > { %2878 = vrot.lane.b32.xlu0 %v2835_v58, %s5633_s14  ;;  %v2605_v61 = vpop.permute.xlu1 %2604  ;;  %v2706_v62 = vpack.c.bf16 %v2686_v17, %v2685_v59  ;;  %v2688_v25 = vld [vmem:[#allocation4 + $0x159] sm:$0xff] }
 0x26a   : > { %2620 = vrot.lane.b32.xlu1 %v2577_v60, %s5631_s10  ;;  %1885 = vst.msk [vmem:[#allocation5 + $0x68] sm:$0xff] %vm1749_vm13, %v2577_v60  ;;  %v2707_v28 = vpack.c.bf16 %v2688_v25, %v2687_v26  ;;  %v2817_v30 = vld [vmem:[#allocation4 + $0x15a] sm:$0xff] }
 0x26b   : > { %2650 = vst.msk [vmem:[#allocation5 + $0x18] sm:$0xff] %vm2646_vm6, %v2605_v61 }
 0x26c   : > { %v2219_v63 = vpop.permute.xlu0 %2218 }
 0x26d   : > { %2105 = vrot.lane.b32.xlu0 %v2447_v0, %s5626_s13  ;;  %2263 = vst.msk [vmem:[#allocation5 + $0x20] sm:$0xff] %vm2258_vm3, %v2219_v63  ;;  %v2734_v1 = vpop.permute.xlu1 %2733 }
 0x26e   : > { %2749 = vrot.lane.b32.xlu1 %v2706_v62, %s5632_s12  ;;  %2779 = vst.msk [vmem:[#allocation5 + $0x18] sm:$0xff] %vm2775_vm7, %v2734_v1 }
 0x26f   : > { %2908 = vst.msk [vmem:[#allocation5 + $0x18] sm:$0xff] %vm2904_vm8, %v2863_v54 }
 0x270   : > { %v2348_v3 = vpop.permute.xlu0 %2347 }
 0x271   : > { %2234 = vrot.lane.b32.xlu0 %v2577_v60, %s5628_s15  ;;  %2392 = vst.msk [vmem:[#allocation5 + $0x20] sm:$0xff] %vm2387_vm4, %v2348_v3  ;;  %v1963_v6 = vpop.permute.xlu1 %1962 }
 0x272   : > { %1976 = vrot.lane.b32.xlu1 %v2318_v39, %s5624_s11  ;;  %2006 = vst.msk [vmem:[#allocation5 + $0x28] sm:$0xff] %vm2000_vm0, %v1963_v6  ;;  %v5449_v7 = vpop.f32.mrb[28].mxu0 }
 0x273   : > { %v1711_v8 = vadd.f32 %v5449_v7, %v6307_v55  ;;  %v1702_v10 = vpop.f32.mrb[29].mxu0  ;;  %v2564_v7 = vld [vmem:[#allocation4 + $0x198] sm:$0xff] }
 0x274   : > { %v1703_v4 = vadd.f32 %v6307_v55, %v1702_v10  ;;  %v5450_v20 = vpop.f32.mrb[30].mxu0  ;;  %v2477_v11 = vpop.permute.xlu0 %2476 }
 0x275   : > { %2363 = vrot.lane.b32.xlu0 %v2706_v62, %s5630_s7  ;;  %v1747_v13 = vmax.f32 %v1711_v8, 0.0  ;;  %v1714_v2 = vadd.f32 %v5450_v20, %v6307_v55  ;;  %2521 = vst.msk [vmem:[#allocation5 + $0x20] sm:$0xff] %vm2516_vm5, %v2477_v11  ;;  %v2092_v14 = vpop.permute.xlu1 %2091  ;;  %v1705_v15 = vpop.f32.mrb[31].mxu0  ;;  %v2565_v8 = vld [vmem:[#allocation4 + $0x1a0] sm:$0xff] }
 0x276   : > { %1978 = vrot.lane.b32.xlu1 %v2706_v62, %s5624_s11  ;;  %v1745_v16 = vmax.f32 %v1703_v4, 0.0  ;;  %2651 = vst.msk [vmem:[#allocation5 + $0x20] sm:$0xff] %vm2646_vm6, %v6534_v33  ;;  %v1706_v18 = vadd.f32 %v6307_v55, %v1705_v15  ;;  %v2924_v21 = vld [vmem:[#allocation5 + $0x18] sm:$0xff]  ;;  %v2836_v33 = vpack.c.bf16 %v2817_v30, %v2816_v29  ;;  %v2581_v4 = vpack.c.bf16 %v2565_v8, %v2564_v7  ;;  %v2693_v11 = vld [vmem:[#allocation4 + $0x199] sm:$0xff] }
 0x277   : > { %2135 = vst.msk [vmem:[#allocation5 + $0x28] sm:$0xff] %vm2129_vm1, %v2092_v14  ;;  %v1748_v22 = vmax.f32 %v1714_v2, 0.0  ;;  %5466 = vmatmul.mubr.msk.bf16.gmra.mrb[4].mxu1 %vm2980_vm9, %v2924_v21 }
 0x278   : > { %1822 = vst.msk [vmem:[#allocation4 + $0x181] sm:$0xff] %vm1749_vm13, %v1747_v13  ;;  %1820 = vst.msk [vmem:[#allocation4 + $0x169] sm:$0xff] %vm1749_vm13, %v1745_v16  ;;  %v1746_v55 = vmax.f32 %v1706_v18, 0.0  ;;  %v2611_v23 = vpop.permute.xlu0 %2610  ;;  %v2694_v13 = vld [vmem:[#allocation4 + $0x1a1] sm:$0xff] }
 0x279   : > { %2780 = vst.msk [vmem:[#allocation5 + $0x20] sm:$0xff] %vm2775_vm7, %v6547_v43  ;;  %2492 = vrot.lane.b32.xlu0 %v2835_v58, %s5634_s16  ;;  %v6605_v24 = vpop.permute.xlu1 %2224  ;;  %v2710_v14 = vpack.c.bf16 %v2694_v13, %v2693_v11  ;;  %v2822_v16 = vld [vmem:[#allocation4 + $0x19a] sm:$0xff]  ;;  %v2823_v18 = vld [vmem:[#allocation4 + $0x1a2] sm:$0xff] }
 0x27a   : > { %2264 = vst.msk [vmem:[#allocation5 + $0x28] sm:$0xff] %vm2258_vm3, %v6539_v35  ;;  %2107 = vrot.lane.b32.xlu1 %v2835_v58, %s5626_s13 }
 0x27b   : > { %2909 = vst.msk [vmem:[#allocation5 + $0x20] sm:$0xff] %vm2904_vm8, %v6554_v45 }
 0x27c   : > { %2393 = vst.msk [vmem:[#allocation5 + $0x28] sm:$0xff] %vm2387_vm4, %v6550_v12  ;;  %v2740_v5 = vpop.permute.xlu0 %2739 }
 0x27d   : > { %1823 = vst.msk [vmem:[#allocation4 + $0x189] sm:$0xff] %vm1749_vm13, %v1748_v22  ;;  %1821 = vst.msk [vmem:[#allocation4 + $0x171] sm:$0xff] %vm1749_vm13, %v1746_v55  ;;  %2622 = vrot.lane.b32.xlu0 %v6560_v56, %s5631_s10  ;;  %v2354_v27 = vpop.permute.xlu1 %2353  ;;  %v2839_v22 = vpack.c.bf16 %v2823_v18, %v2822_v16 }
 0x27e   : > { %2522 = vst.msk [vmem:[#allocation5 + $0x28] sm:$0xff] %vm2516_vm5, %v6557_v46  ;;  %2236 = vrot.lane.b32.xlu1 %v6560_v56, %s5628_s15 }
 0x27f   : > { %v2560_v31 = vld [vmem:[#allocation4 + $0x168] sm:$0xff]  ;;  %v2562_v51 = vld [vmem:[#allocation4 + $0x180] sm:$0xff] }
 0x280   : > { %v2869_v37 = vpop.permute.xlu0 %2868  ;;  %v2689_v41 = vld [vmem:[#allocation4 + $0x169] sm:$0xff]  ;;  %v2691_v58 = vld [vmem:[#allocation4 + $0x181] sm:$0xff] }
 0x281   : > { %2751 = vrot.lane.b32.xlu0 %v2707_v28, %s5632_s12  ;;  %v2483_v32 = vpop.permute.xlu1 %2482 }
 0x282   : > { %v2925_v19 = vld [vmem:[#allocation5 + $0x20] sm:$0xff]  ;;  %2365 = vrot.lane.b32.xlu1 %v2707_v28, %s5630_s7 }
 0x283   : > { %5469 = vmatprep.mubr.msk.bf16.mxu1 %vm2980_vm9, %v2925_v19 }
 0x284   : > { %v2561_v34 = vld [vmem:[#allocation4 + $0x170] sm:$0xff]  ;;  %v2098_v38 = vpop.permute.xlu0 %2097  ;;  %v2563_v52 = vld [vmem:[#allocation4 + $0x188] sm:$0xff] }
 0x285   : > { %v2818_v9 = vld [vmem:[#allocation4 + $0x16a] sm:$0xff]  ;;  %v2819_v35 = vld [vmem:[#allocation4 + $0x172] sm:$0xff]  ;;  %v2579_v36 = vpack.c.bf16 %v2561_v34, %v2560_v31  ;;  %2880 = vrot.lane.b32.xlu0 %v2836_v33, %s5633_s14  ;;  %v1969_v39 = vpop.permute.xlu1 %1968  ;;  %v2580_v57 = vpack.c.bf16 %v2563_v52, %v2562_v51  ;;  %v2820_v61 = vld [vmem:[#allocation4 + $0x182] sm:$0xff] }
 0x286   : > { %2494 = vrot.lane.b32.xlu1 %v2836_v33, %s5634_s16  ;;  %v2837_v40 = vpack.c.bf16 %v2819_v35, %v2818_v9  ;;  %2009 = vst.msk [vmem:[#allocation5 + $0x40] sm:$0xff] %vm2000_vm0, %v1969_v39  ;;  %v2690_v42 = vld [vmem:[#allocation4 + $0x171] sm:$0xff]  ;;  %v2692_v60 = vld [vmem:[#allocation4 + $0x189] sm:$0xff] }
 0x287   : > { %1887 = vst.msk [vmem:[#allocation5 + $0x78] sm:$0xff] %vm1749_vm13, %v2579_v36  ;;  %v2708_v0 = vpack.c.bf16 %v2690_v42, %v2689_v41  ;;  %v2709_v59 = vpack.c.bf16 %v2692_v60, %v2691_v58  ;;  %v2821_v62 = vld [vmem:[#allocation4 + $0x18a] sm:$0xff]  ;;  %vm4959_vm13 = vcmask 1043459  }
 0x288   : > { %2138 = vst.msk [vmem:[#allocation5 + $0x40] sm:$0xff] %vm2129_vm1, %v2098_v38  ;;  %v2867_v43 = vpop.permute.xlu0 %2866  ;;  %v2838_v6 = vpack.c.bf16 %v2821_v62, %v2820_v61 }
 0x289   : > { %2882 = vrot.lane.b32.xlu0 %v2837_v40, %s5633_s14  ;;  %v2609_v12 = vpop.permute.xlu1 %2608 }
 0x28a   : > { %2624 = vrot.lane.b32.xlu1 %v2579_v36, %s5631_s10  ;;  %2652 = vst.msk [vmem:[#allocation5 + $0x28] sm:$0xff] %vm2646_vm6, %v2609_v12 }
 0x28c   : > { %v2223_v44 = vpop.permute.xlu0 %2222 }
 0x28d   : > { %2109 = vrot.lane.b32.xlu0 %v2836_v33, %s5626_s13  ;;  %2265 = vst.msk [vmem:[#allocation5 + $0x30] sm:$0xff] %vm2258_vm3, %v2223_v44  ;;  %v2738_v45 = vpop.permute.xlu1 %2737 }
 0x28e   : > { %2753 = vrot.lane.b32.xlu1 %v2708_v0, %s5632_s12  ;;  %2781 = vst.msk [vmem:[#allocation5 + $0x28] sm:$0xff] %vm2775_vm7, %v2738_v45 }
 0x28f   : > { %2910 = vst.msk [vmem:[#allocation5 + $0x28] sm:$0xff] %vm2904_vm8, %v2867_v43 }
 0x290   : > { %v2352_v46 = vpop.permute.xlu0 %2351 }
 0x291   : > { %2238 = vrot.lane.b32.xlu0 %v2579_v36, %s5628_s15  ;;  %2394 = vst.msk [vmem:[#allocation5 + $0x30] sm:$0xff] %vm2387_vm4, %v2352_v46  ;;  %v1967_v47 = vpop.permute.xlu1 %1966 }
 0x292   : > { %1980 = vrot.lane.b32.xlu1 %v2707_v28, %s5624_s11  ;;  %2008 = vst.msk [vmem:[#allocation5 + $0x38] sm:$0xff] %vm2000_vm0, %v1967_v47 }
 0x294   : > { %v2481_v48 = vpop.permute.xlu0 %2480 }
 0x295   : > { %2367 = vrot.lane.b32.xlu0 %v2708_v0, %s5630_s7  ;;  %2523 = vst.msk [vmem:[#allocation5 + $0x30] sm:$0xff] %vm2516_vm5, %v2481_v48  ;;  %v2096_v49 = vpop.permute.xlu1 %2095 }
 0x296   : > { %1982 = vrot.lane.b32.xlu1 %v2708_v0, %s5624_s11  ;;  %2653 = vst.msk [vmem:[#allocation5 + $0x30] sm:$0xff] %vm2646_vm6, %v2611_v23  ;;  %v2926_v50 = vld [vmem:[#allocation5 + $0x28] sm:$0xff] }
 0x297   : > { %2137 = vst.msk [vmem:[#allocation5 + $0x38] sm:$0xff] %vm2129_vm1, %v2096_v49  ;;  %5470 = vmatmul.mubr.msk.bf16.gmra.mrb[8].mxu1 %vm2980_vm9, %v2926_v50 }
 0x298   : > { %2782 = vst.msk [vmem:[#allocation5 + $0x30] sm:$0xff] %vm2775_vm7, %v2740_v5  ;;  %v2615_v53 = vpop.permute.xlu0 %2614 }
 0x299   : > { %2266 = vst.msk [vmem:[#allocation5 + $0x38] sm:$0xff] %vm2258_vm3, %v6605_v24  ;;  %2496 = vrot.lane.b32.xlu0 %v2837_v40, %s5634_s16  ;;  %v2229_v56 = vpop.permute.xlu1 %2228 }
 0x29a   : > { %2911 = vst.msk [vmem:[#allocation5 + $0x30] sm:$0xff] %vm2904_vm8, %v2869_v37  ;;  %2111 = vrot.lane.b32.xlu1 %v2837_v40, %s5626_s13  ;;  %s5564_s13 = scalar_lea.vmem %s5563_s23, 2048 }
 0x29b   : > { %2395 = vst.msk [vmem:[#allocation5 + $0x38] sm:$0xff] %vm2387_vm4, %v2354_v27 }
 0x29c   : > { %2524 = vst.msk [vmem:[#allocation5 + $0x38] sm:$0xff] %vm2516_vm5, %v2483_v32  ;;  %v2744_v17 = vpop.permute.xlu0 %2743 }
 0x29d   : > { %2626 = vrot.lane.b32.xlu0 %v2580_v57, %s5631_s10  ;;  %v2358_v54 = vpop.permute.xlu1 %2357 }
 0x29e   : > { %2240 = vrot.lane.b32.xlu1 %v2580_v57, %s5628_s15 }
 0x2a0   : > { %v2871_v1 = vpop.permute.xlu0 %2870 }
 0x2a1   : > { %2755 = vrot.lane.b32.xlu0 %v2709_v59, %s5632_s12  ;;  %v2927_v63 = vld [vmem:[#allocation5 + $0x30] sm:$0xff]  ;;  %v2487_v3 = vpop.permute.xlu1 %2486 }
 0x2a2   : > { %2369 = vrot.lane.b32.xlu1 %v2709_v59, %s5630_s7  ;;  %5473 = vmatprep.mubr.msk.bf16.mxu1 %vm2980_vm9, %v2927_v63  ;;  %s215_s7 = sand.u32 1, %s5612_s19  }
 0x2a3   : > { %s7117_s22 = scalar_lea.sflag [#allocation7], %s215_s7 }
 0x2a4   : > { %v2227_v10 = vpop.permute.xlu0 %2226 }
 0x2a5   : > { %2884 = vrot.lane.b32.xlu0 %v2838_v6, %s5633_s14  ;;  %2267 = vst.msk [vmem:[#allocation5 + $0x40] sm:$0xff] %vm2258_vm3, %v2227_v10  ;;  %v2613_v20 = vpop.permute.xlu1 %2612 }
 0x2a6   : > { %2498 = vrot.lane.b32.xlu1 %v2838_v6, %s5634_s16  ;;  %2654 = vst.msk [vmem:[#allocation5 + $0x38] sm:$0xff] %vm2646_vm6, %v2613_v20 }
 0x2a8   : > { %v2356_v2 = vpop.permute.xlu0 %2355 }
 0x2a9   : > { %2396 = vst.msk [vmem:[#allocation5 + $0x40] sm:$0xff] %vm2387_vm4, %v2356_v2  ;;  %v2742_v15 = vpop.permute.xlu1 %2741 }
 0x2aa   : > { %2628 = vrot.lane.b32.xlu1 %v2581_v4, %s5631_s10  ;;  %2783 = vst.msk [vmem:[#allocation5 + $0x38] sm:$0xff] %vm2775_vm7, %v2742_v15  ;;  %s5114_s10 = sshll.u32 %s215_s7, 6 }
 0x2ab   : > { %2912 = vst.msk [vmem:[#allocation5 + $0x38] sm:$0xff] %vm2904_vm8, %v2871_v1 }
 0x2ac   : > { %v2485_v21 = vpop.permute.xlu0 %2484 }
 0x2ad   : > { %2525 = vst.msk [vmem:[#allocation5 + $0x40] sm:$0xff] %vm2516_vm5, %v2485_v21  ;;  %v1971_v55 = vpop.permute.xlu1 %1970  ;;  %v5635_v21 = vmov 1983009808  }
 0x2ae   : > { %2757 = vrot.lane.b32.xlu1 %v2710_v14, %s5632_s12  ;;  %2655 = vst.msk [vmem:[#allocation5 + $0x40] sm:$0xff] %vm2646_vm6, %v2615_v53  ;;  %s6787_s12 = scalar_lea.vmem [#allocation6], %s5114_s10 }
 0x2af   : > { %2010 = vst.msk [vmem:[#allocation5 + $0x48] sm:$0xff] %vm2000_vm0, %v1971_v55  ;;  %v3262_v55 = vlaneseq  ;;  %s5048_s26 = sshll.u32 %s6787_s12, 4  ;;  %s7111_s26 = int_to_ptr.vmem [resolvable:$true] %s5048_s26 }
 0x2b0   : > { %2784 = vst.msk [vmem:[#allocation5 + $0x40] sm:$0xff] %vm2775_vm7, %v2744_v17  ;;  %v2873_v23 = vpop.permute.xlu0 %2872  ;;  %s5558_s9 = scalar_lea.vmem %s7111_s26, 1024  ;;  %p5565_p0 = scmp.lt.s32.totalorder %s7111_s26, %s5563_s23 }
 0x2b1   : > { %2913 = vst.msk [vmem:[#allocation5 + $0x40] sm:$0xff] %vm2904_vm8, %v2873_v23  ;;  %v2100_v24 = vpop.permute.xlu1 %2099  ;;  %p5559_p11 = scmp.ne.s32.totalorder %s7111_s26, %s5558_s9  ;;  %p5566_p1 = scmp.lt.s32.totalorder %s5564_s13, %s5558_s9 }
 0x2b2   : > { %2886 = vrot.lane.b32.xlu1 %v2839_v22, %s5633_s14  ;;  %2139 = vst.msk [vmem:[#allocation5 + $0x48] sm:$0xff] %vm2129_vm1, %v2100_v24  ;;  %v2928_v25 = vld [vmem:[#allocation5 + $0x38] sm:$0xff]  ;;  %v3260_v22 = vunpack.c.l.s4 %v5635_v21  ;;  %v3263_v24 = vshrl.u32 %v3262_v55, 7 }
 0x2b3   : > { %2268 = vst.msk [vmem:[#allocation5 + $0x48] sm:$0xff] %vm2258_vm3, %v2229_v56  ;;  %5474 = vmatmul.mubr.msk.bf16.gmra.mrb[12].mxu1 %vm2980_vm9, %v2928_v25  ;;  %v6732_v25 = vld [vmem:[%s7163_s4] ss:$0 sm:$0xff]  ;;  %p5560_p12 = pnand %p5559_p11, %p5706_p5  ;;  %p5567_p2 = por %p5566_p1, %p5565_p0 }
 0x2b4   : > { %2397 = vst.msk [vmem:[#allocation5 + $0x48] sm:$0xff] %vm2387_vm4, %v2358_v54  ;;  %v3261_v23 = vunpack.c.0.s8 %v3260_v22 }
 0x2b5   : > { %2526 = vst.msk [vmem:[#allocation5 + $0x48] sm:$0xff] %vm2516_vm5, %v2487_v3  ;;  %v1973_v5 = vpop.permute.xlu1 %1972  ;;  %p5561_p13 = pneg %p5560_p12 }
 0x2b6   : > { %2011 = vst.msk [vmem:[#allocation5 + $0x50] sm:$0xff] %vm2000_vm0, %v1973_v5 }
 0x2b7   : > { %p5568_p3 = pnand %p5567_p2, %p5561_p13 }
 0x2b8   : > { %v2929_v26 = vld [vmem:[#allocation5 + $0x40] sm:$0xff] }
 0x2b9   : > { %v2875_v27 = vpop.permute.xlu0 %2874  ;;  %5477 = vmatprep.mubr.msk.bf16.mxu1 %vm2980_vm9, %v2929_v26 }
 0x2ba   : > { %v2617_v28 = vpop.permute.xlu1 %2616 }
 0x2bb   : > { %2656 = vst.msk [vmem:[#allocation5 + $0x48] sm:$0xff] %vm2646_vm6, %v2617_v28  ;;  %v6735_v28 = vsub.s32 %v3261_v23, %v3263_v24 }
 0x2bd   : > { %v2102_v29 = vpop.permute.xlu0 %2101 }
 0x2be   : > { %v2746_v30 = vpop.permute.xlu1 %2745  ;;  %2140 = vst.msk [vmem:[#allocation5 + $0x50] sm:$0xff] %vm2129_vm1, %v2102_v29 }
 0x2bf   : > { %2785 = vst.msk [vmem:[#allocation5 + $0x48] sm:$0xff] %vm2775_vm7, %v2746_v30 }
 0x2c0   : > { %2914 = vst.msk [vmem:[#allocation5 + $0x48] sm:$0xff] %vm2904_vm8, %v2875_v27 }
 0x2c1   : > { %v2231_v19 = vpop.permute.xlu0 %2230 }
 0x2c2   : > { %v1975_v31 = vpop.permute.xlu1 %1974  ;;  %2269 = vst.msk [vmem:[#allocation5 + $0x50] sm:$0xff] %vm2258_vm3, %v2231_v19 }
 0x2c3   : > { %2012 = vst.msk [vmem:[#allocation5 + $0x58] sm:$0xff] %vm2000_vm0, %v1975_v31 }
 0x2c5   : > { %v2360_v37 = vpop.permute.xlu0 %2359 }
 0x2c6   : > { %v2104_v32 = vpop.permute.xlu1 %2103  ;;  %2398 = vst.msk [vmem:[#allocation5 + $0x50] sm:$0xff] %vm2387_vm4, %v2360_v37 }
 0x2c7   : > { %2141 = vst.msk [vmem:[#allocation5 + $0x58] sm:$0xff] %vm2129_vm1, %v2104_v32  ;;  %v2930_v33 = vld [vmem:[#allocation5 + $0x48] sm:$0xff] }
 0x2c8   : > { %5478 = vmatmul.mubr.msk.bf16.gmra.mrb[16].mxu1 %vm2980_vm9, %v2930_v33 }
 0x2c9   : > { %v2489_v34 = vpop.permute.xlu0 %2488 }
 0x2ca   : > { %2527 = vst.msk [vmem:[#allocation5 + $0x50] sm:$0xff] %vm2516_vm5, %v2489_v34  ;;  %v2233_v9 = vpop.permute.xlu1 %2232 }
 0x2cb   : > { %2270 = vst.msk [vmem:[#allocation5 + $0x58] sm:$0xff] %vm2258_vm3, %v2233_v9 }
 0x2cd   : > { %v2619_v35 = vpop.permute.xlu0 %2618 }
 0x2ce   : > { %2657 = vst.msk [vmem:[#allocation5 + $0x50] sm:$0xff] %vm2646_vm6, %v2619_v35  ;;  %v2362_v36 = vpop.permute.xlu1 %2361 }
 0x2cf   : > { %2399 = vst.msk [vmem:[#allocation5 + $0x58] sm:$0xff] %vm2387_vm4, %v2362_v36 }
 0x2d1   : > { %v2748_v38 = vpop.permute.xlu0 %2747 }
 0x2d2   : > { %2786 = vst.msk [vmem:[#allocation5 + $0x50] sm:$0xff] %vm2775_vm7, %v2748_v38  ;;  %v2491_v39 = vpop.permute.xlu1 %2490 }
 0x2d3   : > { %2528 = vst.msk [vmem:[#allocation5 + $0x58] sm:$0xff] %vm2516_vm5, %v2491_v39 }
 0x2d5   : > { %v2877_v40 = vpop.permute.xlu0 %2876 }
 0x2d6   : > { %2915 = vst.msk [vmem:[#allocation5 + $0x50] sm:$0xff] %vm2904_vm8, %v2877_v40  ;;  %v6743_v40 = vsub.s32 0, %v3263_v24 }
 0x2db   : > { %v2879_v41 = vpop.permute.xlu0 %2878 }
 0x2dc   : > { %v2621_v42 = vpop.permute.xlu1 %2620 }
 0x2dd   : > { %2658 = vst.msk [vmem:[#allocation5 + $0x58] sm:$0xff] %vm2646_vm6, %v2621_v42  ;;  %v2931_v0 = vld [vmem:[#allocation5 + $0x50] sm:$0xff] }
 0x2de   : > { %5481 = vmatprep.mubr.msk.bf16.mxu1 %vm2980_vm9, %v2931_v0 }
 0x2df   : > { %v2106_v43 = vpop.permute.xlu0 %2105 }
 0x2e0   : > { %v2750_v12 = vpop.permute.xlu1 %2749 }
 0x2e1   : > { %2787 = vst.msk [vmem:[#allocation5 + $0x58] sm:$0xff] %vm2775_vm7, %v2750_v12 }
 0x2e2   : > { %2916 = vst.msk [vmem:[#allocation5 + $0x58] sm:$0xff] %vm2904_vm8, %v2879_v41 }
 0x2e3   : > { %v2235_v44 = vpop.permute.xlu0 %2234 }
 0x2e4   : > { %v1977_v45 = vpop.permute.xlu1 %1976 }
 0x2e5   : > { %2013 = vst.msk [vmem:[#allocation5 + $0x60] sm:$0xff] %vm2000_vm0, %v1977_v45 }
 0x2e6   : > { %2142 = vst.msk [vmem:[#allocation5 + $0x60] sm:$0xff] %vm2129_vm1, %v2106_v43 }
 0x2e7   : > { %2271 = vst.msk [vmem:[#allocation5 + $0x60] sm:$0xff] %vm2258_vm3, %v2235_v44  ;;  %v2364_v46 = vpop.permute.xlu0 %2363 }
 0x2e8   : > { %v1979_v47 = vpop.permute.xlu1 %1978  ;;  %2400 = vst.msk [vmem:[#allocation5 + $0x60] sm:$0xff] %vm2387_vm4, %v2364_v46 }
 0x2e9   : > { %2014 = vst.msk [vmem:[#allocation5 + $0x68] sm:$0xff] %vm2000_vm0, %v1979_v47  ;;  %v2932_v48 = vld [vmem:[#allocation5 + $0x58] sm:$0xff] }
 0x2ea   : > { %5482 = vmatmul.mubr.msk.bf16.gmra.mrb[20].mxu1 %vm2980_vm9, %v2932_v48 }
 0x2eb   : > { %v2493_v49 = vpop.permute.xlu0 %2492 }
 0x2ec   : > { %2529 = vst.msk [vmem:[#allocation5 + $0x60] sm:$0xff] %vm2516_vm5, %v2493_v49  ;;  %v2108_v50 = vpop.permute.xlu1 %2107 }
 0x2ed   : > { %2143 = vst.msk [vmem:[#allocation5 + $0x68] sm:$0xff] %vm2129_vm1, %v2108_v50 }
 0x2ef   : > { %v2623_v51 = vpop.permute.xlu0 %2622 }
 0x2f0   : > { %2659 = vst.msk [vmem:[#allocation5 + $0x60] sm:$0xff] %vm2646_vm6, %v2623_v51  ;;  %v2237_v52 = vpop.permute.xlu1 %2236 }
 0x2f1   : > { %2272 = vst.msk [vmem:[#allocation5 + $0x68] sm:$0xff] %vm2258_vm3, %v2237_v52 }
 0x2f3   : > { %v2752_v53 = vpop.permute.xlu0 %2751 }
 0x2f4   : > { %2788 = vst.msk [vmem:[#allocation5 + $0x60] sm:$0xff] %vm2775_vm7, %v2752_v53  ;;  %v2366_v56 = vpop.permute.xlu1 %2365 }
 0x2f5   : > { %2401 = vst.msk [vmem:[#allocation5 + $0x68] sm:$0xff] %vm2387_vm4, %v2366_v56 }
 0x2f7   : > { %v2881_v57 = vpop.permute.xlu0 %2880 }
 0x2f8   : > { %2917 = vst.msk [vmem:[#allocation5 + $0x60] sm:$0xff] %vm2904_vm8, %v2881_v57  ;;  %v2495_v58 = vpop.permute.xlu1 %2494 }
 0x2f9   : > { %2530 = vst.msk [vmem:[#allocation5 + $0x68] sm:$0xff] %vm2516_vm5, %v2495_v58 }
 0x2fb   : > { %v2883_v60 = vpop.permute.xlu0 %2882 }
 0x2fc   : > { %v2625_v17 = vpop.permute.xlu1 %2624 }
 0x2fd   : > { %2660 = vst.msk [vmem:[#allocation5 + $0x68] sm:$0xff] %vm2646_vm6, %v2625_v17 }
 0x2ff   : > { %v2110_v54 = vpop.permute.xlu0 %2109  ;;  %v2933_v59 = vld [vmem:[#allocation5 + $0x60] sm:$0xff] }
 0x300   : > { %v2754_v61 = vpop.permute.xlu1 %2753  ;;  %5485 = vmatprep.mubr.msk.bf16.mxu1 %vm2980_vm9, %v2933_v59 }
 0x301   : > { %2789 = vst.msk [vmem:[#allocation5 + $0x68] sm:$0xff] %vm2775_vm7, %v2754_v61 }
 0x302   : > { %2918 = vst.msk [vmem:[#allocation5 + $0x68] sm:$0xff] %vm2904_vm8, %v2883_v60 }
 0x303   : > { %v2239_v62 = vpop.permute.xlu0 %2238 }
 0x304   : > { %v1981_v63 = vpop.permute.xlu1 %1980 }
 0x305   : > { %2015 = vst.msk [vmem:[#allocation5 + $0x70] sm:$0xff] %vm2000_vm0, %v1981_v63 }
 0x306   : > { %2144 = vst.msk [vmem:[#allocation5 + $0x70] sm:$0xff] %vm2129_vm1, %v2110_v54 }
 0x307   : > { %2273 = vst.msk [vmem:[#allocation5 + $0x70] sm:$0xff] %vm2258_vm3, %v2239_v62  ;;  %v2368_v1 = vpop.permute.xlu0 %2367 }
 0x308   : > { %2402 = vst.msk [vmem:[#allocation5 + $0x70] sm:$0xff] %vm2387_vm4, %v2368_v1  ;;  %v1983_v3 = vpop.permute.xlu1 %1982 }
 0x309   : > { %2016 = vst.msk [vmem:[#allocation5 + $0x78] sm:$0xff] %vm2000_vm0, %v1983_v3  ;;  %v2934_v6 = vld [vmem:[#allocation5 + $0x68] sm:$0xff]  ;;  %vm4965_vm0 = vcmask 1046534  }
 0x30a   : > { %5486 = vmatmul.mubr.msk.bf16.gmra.mrb[24].mxu1 %vm2980_vm9, %v2934_v6 }
 0x30b   : > { %v2497_v7 = vpop.permute.xlu0 %2496 }
 0x30c   : > { %2531 = vst.msk [vmem:[#allocation5 + $0x70] sm:$0xff] %vm2516_vm5, %v2497_v7  ;;  %v2112_v8 = vpop.permute.xlu1 %2111 }
 0x30d   : > { %2145 = vst.msk [vmem:[#allocation5 + $0x78] sm:$0xff] %vm2129_vm1, %v2112_v8  ;;  %vm4967_vm1 = vcmask 1047559  }
 0x30f   : > { %v2627_v10 = vpop.permute.xlu0 %2626 }
 0x310   : > { %2661 = vst.msk [vmem:[#allocation5 + $0x70] sm:$0xff] %vm2646_vm6, %v2627_v10  ;;  %v2241_v4 = vpop.permute.xlu1 %2240 }
 0x311   : > { %2274 = vst.msk [vmem:[#allocation5 + $0x78] sm:$0xff] %vm2258_vm3, %v2241_v4 }
 0x313   : > { %v2756_v20 = vpop.permute.xlu0 %2755 }
 0x314   : > { %2790 = vst.msk [vmem:[#allocation5 + $0x70] sm:$0xff] %vm2775_vm7, %v2756_v20  ;;  %v2370_v11 = vpop.permute.xlu1 %2369 }
 0x315   : > { %2403 = vst.msk [vmem:[#allocation5 + $0x78] sm:$0xff] %vm2387_vm4, %v2370_v11 }
 0x317   : > { %v2885_v13 = vpop.permute.xlu0 %2884 }
 0x318   : > { %2919 = vst.msk [vmem:[#allocation5 + $0x70] sm:$0xff] %vm2904_vm8, %v2885_v13  ;;  %v2499_v2 = vpop.permute.xlu1 %2498 }
 0x319   : > { %2532 = vst.msk [vmem:[#allocation5 + $0x78] sm:$0xff] %vm2516_vm5, %v2499_v2 }
 0x31c   : > { %v2629_v14 = vpop.permute.xlu1 %2628 }
 0x31d   : > { %2662 = vst.msk [vmem:[#allocation5 + $0x78] sm:$0xff] %vm2646_vm6, %v2629_v14 }
 0x31f   : > { %v2935_v15 = vld [vmem:[#allocation5 + $0x70] sm:$0xff] }
 0x320   : > { %v2758_v16 = vpop.permute.xlu1 %2757  ;;  %5489 = vmatprep.mubr.msk.bf16.mxu1 %vm2980_vm9, %v2935_v15 }
 0x321   : > { %2791 = vst.msk [vmem:[#allocation5 + $0x78] sm:$0xff] %vm2775_vm7, %v2758_v16 }
 0x324   : > { %v2887_v18 = vpop.permute.xlu1 %2886 }
 0x325   : > { %2920 = vst.msk [vmem:[#allocation5 + $0x78] sm:$0xff] %vm2904_vm8, %v2887_v18 }
 0x32a   : > { %v5463_v5 = vpop.f32.mrb[0].mxu1 }
 0x32b   : > { %v3076_v27 = vadd.f32 %v5463_v5, %v6732_v25  ;;  %v3067_v29 = vpop.f32.mrb[1].mxu1 }
 0x32c   : > { %v2936_v26 = vld [vmem:[#allocation5 + $0x78] sm:$0xff]  ;;  %v3068_v30 = vadd.f32 %v6732_v25, %v3067_v29  ;;  %v5464_v19 = vpop.f32.mrb[2].mxu1 }
 0x32d   : > { %5490 = vmatmul.mubr.msk.bf16.gmra.mrb[28].mxu1 %vm2980_vm9, %v2936_v26  ;;  %v3196_v31 = vmax.f32 %v3076_v27, 0.0  ;;  %v3079_v37 = vadd.f32 %v5464_v19, %v6732_v25  ;;  %v3070_v32 = vpop.f32.mrb[3].mxu1 }
 0x32e   : > { %v3194_v33 = vmax.f32 %v3068_v30, 0.0  ;;  %v3071_v34 = vadd.f32 %v6732_v25, %v3070_v32 }
 0x32f   : > { %v3292_v9 = vcombine.high %v3196_v31, %v3196_v31  ;;  %v3299_v35 = vrot.slane %v3196_v31, %v6735_v28  ;;  %v3197_v36 = vmax.f32 %v3079_v37, 0.0 }
 0x330   : > { %v3258_v38 = vcombine.high %v3194_v33, %v3194_v33  ;;  %v3265_v39 = vrot.slane %v3194_v33, %v6735_v28  ;;  %v3195_v41 = vmax.f32 %v3071_v34, 0.0 }
 0x331   : > { %v3306_v42 = vrot.slane %v3292_v9, %v6735_v28  ;;  %v3307_v43 = vcombine.high %v3299_v35, %v3299_v35  ;;  %v5167_v12 = vrot.slane %v3299_v35, 9  ;;  %v3309_v0 = vcombine.high %v3197_v36, %v3197_v36 }
 0x332   : > { %v3272_v44 = vrot.slane %v3258_v38, %v6735_v28  ;;  %v3273_v45 = vcombine.high %v3265_v39, %v3265_v39  ;;  %v5159_v46 = vrot.slane %v3265_v39, 9  ;;  %v3316_v47 = vrot.slane %v3197_v36, %v6735_v28 }
 0x333   : > { %v3308_v48 = vcombine.high %v3306_v42, %v3306_v42  ;;  %v5168_v49 = vrot.slane %v3307_v43, 9  ;;  %v5169_v50 = vrot.slane %v3306_v42, 9  ;;  %v4322_v51 = vmax.f32 %v3299_v35, %v5167_v12 }
 0x334   : > { %v3274_v52 = vcombine.high %v3272_v44, %v3272_v44  ;;  %v5160_v53 = vrot.slane %v3273_v45, 9  ;;  %v5161_v56 = vrot.slane %v3272_v44, 9  ;;  %v4314_v57 = vmax.f32 %v3265_v39, %v5159_v46 }
 0x335   : > { %v5170_v58 = vrot.slane %v3308_v48, 9  ;;  %v4323_v60 = vmax.f32 %v3307_v43, %v5168_v49  ;;  %v4324_v17 = vmax.f32 %v3306_v42, %v5169_v50  ;;  %v4444_v54 = vsel %vm4442_vm10, %v4322_v51, -inf }
 0x336   : > { %v5162_v59 = vrot.slane %v3274_v52, 9  ;;  %v4315_v61 = vmax.f32 %v3273_v45, %v5160_v53  ;;  %v4316_v62 = vmax.f32 %v3272_v44, %v5161_v56  ;;  %v4443_v63 = vsel %vm4442_vm10, %v4314_v57, -inf }
 0x337   : > { %v4325_v1 = vmax.f32 %v3308_v48, %v5170_v58  ;;  %v4447_v3 = vsel %vm4442_vm10, %v4323_v60, -inf  ;;  %v4450_v6 = vsel %vm4442_vm10, %v4324_v17, -inf  ;;  %v4445_v7 = vmax.f32 %v4443_v63, %v4444_v54 }
 0x338   : > { %v4317_v8 = vmax.f32 %v3274_v52, %v5162_v59  ;;  %v4446_v10 = vsel %vm4442_vm10, %v4315_v61, -inf  ;;  %v4449_v4 = vsel %vm4442_vm10, %v4316_v62, -inf  ;;  %v3323_v20 = vrot.slane %v3309_v0, %v6735_v28 }
 0x339   : > { %v4453_v11 = vsel %vm4442_vm10, %v4325_v1, -inf  ;;  %v4448_v13 = vmax.f32 %v4446_v10, %v4447_v3  ;;  %v4451_v2 = vmax.f32 %v4449_v4, %v4450_v6  ;;  %v4702_v14 = vrot.slane %v4445_v7, %v6743_v40 }
 0x33a   : > { %v4452_v15 = vsel %vm4442_vm10, %v4317_v8, -inf  ;;  %v3324_v16 = vcombine.high %v3316_v47, %v3316_v47  ;;  %v3325_v18 = vcombine.high %v3323_v20, %v3323_v20  ;;  %v5171_v21 = vrot.slane %v3316_v47, 9 }
 0x33b   : > { %v4454_v22 = vmax.f32 %v4452_v15, %v4453_v11  ;;  %v4706_v55 = vrot.slane %v4448_v13, %v6743_v40  ;;  %v4710_v23 = vrot.slane %v4451_v2, %v6743_v40  ;;  %v5173_v24 = vrot.slane %v3323_v20, 9 }
 0x33c   : > { %v5172_v5 = vrot.slane %v3324_v16, 9  ;;  %v5174_v26 = vrot.slane %v3325_v18, 9  ;;  %v4326_v27 = vmax.f32 %v3316_v47, %v5171_v21  ;;  %v3275_v29 = vcombine.high %v3195_v41, %v3195_v41 }
 0x33d   : > { %v4714_v30 = vrot.slane %v4454_v22, %v6743_v40  ;;  %v4956_v19 = vsel %vm4955_vm11, %v4706_v55, %v4702_v14  ;;  %v3282_v31 = vrot.slane %v3195_v41, %v6735_v28  ;;  %v4328_v33 = vmax.f32 %v3323_v20, %v5173_v24 }
 0x33e   : > { %v4958_v37 = vsel %vm4957_vm12, %v4710_v23, %v4956_v19  ;;  %v4327_v32 = vmax.f32 %v3324_v16, %v5172_v5  ;;  %v3289_v34 = vrot.slane %v3275_v29, %v6735_v28  ;;  %v4329_v36 = vmax.f32 %v3325_v18, %v5174_v26 }
 0x33f   : > { %v3290_v9 = vcombine.high %v3282_v31, %v3282_v31  ;;  %v5163_v35 = vrot.slane %v3282_v31, 9  ;;  %v4456_v38 = vsel %vm4442_vm10, %v4326_v27, -inf  ;;  %v4960_v39 = vsel %vm4959_vm13, %v4714_v30, %v4958_v37 }
 0x340   : > { %v3291_v42 = vcombine.high %v3289_v34, %v3289_v34  ;;  %v5165_v12 = vrot.slane %v3289_v34, 9  ;;  %v4459_v41 = vsel %vm4442_vm10, %v4327_v32, -inf  ;;  %v4462_v44 = vsel %vm4442_vm10, %v4328_v33, -inf }
 0x341   : > { %v5164_v43 = vrot.slane %v3290_v9, 9  ;;  %v4318_v0 = vmax.f32 %v3282_v31, %v5163_v35  ;;  %v4465_v50 = vsel %vm4442_vm10, %v4329_v36, -inf }
 0x342   : > { %v5166_v45 = vrot.slane %v3291_v42, 9  ;;  %v4320_v47 = vmax.f32 %v3289_v34, %v5165_v12 }
 0x343   : > { %v4319_v46 = vmax.f32 %v3290_v9, %v5164_v43  ;;  %v4455_v48 = vsel %vm4442_vm10, %v4318_v0, -inf }
 0x344   : > { %v4457_v49 = vmax.f32 %v4455_v48, %v4456_v38  ;;  %v4321_v51 = vmax.f32 %v3291_v42, %v5166_v45  ;;  %v4461_v53 = vsel %vm4442_vm10, %v4320_v47, -inf }
 0x345   : > { %v4458_v52 = vsel %vm4442_vm10, %v4319_v46, -inf  ;;  %v4463_v57 = vmax.f32 %v4461_v53, %v4462_v44 }
 0x346   : > { %v4460_v56 = vmax.f32 %v4458_v52, %v4459_v41  ;;  %v4718_v58 = vrot.slane %v4457_v49, %v6743_v40  ;;  %v4464_v60 = vsel %vm4442_vm10, %v4321_v51, -inf }
 0x347   : > { %v4466_v17 = vmax.f32 %v4464_v60, %v4465_v50  ;;  %v4726_v61 = vrot.slane %v4463_v57, %v6743_v40 }
 0x348   : > { %v4722_v54 = vrot.slane %v4460_v56, %v6743_v40  ;;  %v4962_v59 = vsel %vm4961_vm14, %v4718_v58, %v4960_v39 }
 0x349   : > { %v4730_v62 = vrot.slane %v4466_v17, %v6743_v40 }
 0x34a   : > { %v4964_v63 = vsel %vm4963_vm15, %v4722_v54, %v4962_v59  ;;  %v5467_v1 = vpop.f32.mrb[4].mxu1 }
 0x34b   : > { %v4966_v3 = vsel %vm4965_vm0, %v4726_v61, %v4964_v63  ;;  %v3092_v6 = vadd.f32 %v5467_v1, %v6732_v25  ;;  %v3083_v7 = vpop.f32.mrb[5].mxu1 }
 0x34c   : > { %v4968_v8 = vsel %vm4967_vm1, %v4730_v62, %v4966_v3  ;;  %v3084_v10 = vadd.f32 %v6732_v25, %v3083_v7  ;;  %v5468_v4 = vpop.f32.mrb[6].mxu1 }
 0x34d   : > { %5026 = vst [vmem:[%s6787_s12] sm:$0xff] %v4968_v8  ;;  %v3200_v20 = vmax.f32 %v3092_v6, 0.0  ;;  %v3095_v11 = vadd.f32 %v5468_v4, %v6732_v25  ;;  %v3086_v13 = vpop.f32.mrb[7].mxu1 }
 0x34e   : > { %v3198_v2 = vmax.f32 %v3084_v10, 0.0  ;;  %v3087_v14 = vadd.f32 %v6732_v25, %v3086_v13 }
 0x34f   : > { %v3360_v15 = vcombine.high %v3200_v20, %v3200_v20  ;;  %v3367_v16 = vrot.slane %v3200_v20, %v6735_v28  ;;  %v3201_v18 = vmax.f32 %v3095_v11, 0.0 }
 0x350   : > { %v3326_v21 = vcombine.high %v3198_v2, %v3198_v2  ;;  %v3333_v22 = vrot.slane %v3198_v2, %v6735_v28  ;;  %v3199_v55 = vmax.f32 %v3087_v14, 0.0 }
 0x351   : > { %v3374_v23 = vrot.slane %v3360_v15, %v6735_v28  ;;  %v3375_v24 = vcombine.high %v3367_v16, %v3367_v16  ;;  %v5183_v5 = vrot.slane %v3367_v16, 9  ;;  %v3377_v26 = vcombine.high %v3201_v18, %v3201_v18 }
 0x352   : > { %v3340_v27 = vrot.slane %v3326_v21, %v6735_v28  ;;  %v3341_v29 = vcombine.high %v3333_v22, %v3333_v22  ;;  %v5175_v30 = vrot.slane %v3333_v22, 9  ;;  %v3384_v19 = vrot.slane %v3201_v18, %v6735_v28 }
 0x353   : > { %v3376_v31 = vcombine.high %v3374_v23, %v3374_v23  ;;  %v5184_v37 = vrot.slane %v3375_v24, 9  ;;  %v5185_v32 = vrot.slane %v3374_v23, 9  ;;  %v4338_v33 = vmax.f32 %v3367_v16, %v5183_v5 }
 0x354   : > { %v3342_v34 = vcombine.high %v3340_v27, %v3340_v27  ;;  %v5176_v9 = vrot.slane %v3341_v29, 9  ;;  %v5177_v35 = vrot.slane %v3340_v27, 9  ;;  %v4330_v36 = vmax.f32 %v3333_v22, %v5175_v30 }
 0x355   : > { %v5186_v38 = vrot.slane %v3376_v31, 9  ;;  %v4339_v39 = vmax.f32 %v3375_v24, %v5184_v37  ;;  %v4340_v42 = vmax.f32 %v3374_v23, %v5185_v32  ;;  %v4468_v43 = vsel %vm4442_vm10, %v4338_v33, -inf }
 0x356   : > { %v5178_v12 = vrot.slane %v3342_v34, 9  ;;  %v4331_v0 = vmax.f32 %v3341_v29, %v5176_v9  ;;  %v4332_v41 = vmax.f32 %v3340_v27, %v5177_v35  ;;  %v4467_v44 = vsel %vm4442_vm10, %v4330_v36, -inf }
 0x357   : > { %v4341_v45 = vmax.f32 %v3376_v31, %v5186_v38  ;;  %v4471_v46 = vsel %vm4442_vm10, %v4339_v39, -inf  ;;  %v4474_v47 = vsel %vm4442_vm10, %v4340_v42, -inf  ;;  %v4469_v48 = vmax.f32 %v4467_v44, %v4468_v43 }
 0x358   : > { %v4333_v49 = vmax.f32 %v3342_v34, %v5178_v12  ;;  %v4470_v50 = vsel %vm4442_vm10, %v4331_v0, -inf  ;;  %v4473_v51 = vsel %vm4442_vm10, %v4332_v41, -inf  ;;  %v3391_v52 = vrot.slane %v3377_v26, %v6735_v28 }
 0x359   : > { %v4477_v53 = vsel %vm4442_vm10, %v4341_v45, -inf  ;;  %v4472_v56 = vmax.f32 %v4470_v50, %v4471_v46  ;;  %v4475_v57 = vmax.f32 %v4473_v51, %v4474_v47  ;;  %v4734_v58 = vrot.slane %v4469_v48, %v6743_v40 }
 0x35a   : > { %v4476_v60 = vsel %vm4442_vm10, %v4333_v49, -inf  ;;  %v3392_v17 = vcombine.high %v3384_v19, %v3384_v19  ;;  %v3393_v54 = vcombine.high %v3391_v52, %v3391_v52  ;;  %v5187_v59 = vrot.slane %v3384_v19, 9 }
 0x35b   : > { %v4478_v61 = vmax.f32 %v4476_v60, %v4477_v53  ;;  %v4738_v62 = vrot.slane %v4472_v56, %v6743_v40  ;;  %v4742_v63 = vrot.slane %v4475_v57, %v6743_v40  ;;  %v5189_v1 = vrot.slane %v3391_v52, 9 }
 0x35c   : > { %v5188_v3 = vrot.slane %v3392_v17, 9  ;;  %v5190_v6 = vrot.slane %v3393_v54, 9  ;;  %v4342_v7 = vmax.f32 %v3384_v19, %v5187_v59  ;;  %v3343_v8 = vcombine.high %v3199_v55, %v3199_v55 }
 0x35d   : > { %v4746_v10 = vrot.slane %v4478_v61, %v6743_v40  ;;  %v4969_v4 = vsel %vm4955_vm11, %v4738_v62, %v4734_v58  ;;  %v3350_v20 = vrot.slane %v3199_v55, %v6735_v28  ;;  %v4344_v2 = vmax.f32 %v3391_v52, %v5189_v1 }
 0x35e   : > { %v4970_v11 = vsel %vm4957_vm12, %v4742_v63, %v4969_v4  ;;  %v4343_v13 = vmax.f32 %v3392_v17, %v5188_v3  ;;  %v3357_v14 = vrot.slane %v3343_v8, %v6735_v28  ;;  %v4345_v18 = vmax.f32 %v3393_v54, %v5190_v6 }
 0x35f   : > { %v3358_v15 = vcombine.high %v3350_v20, %v3350_v20  ;;  %v5179_v16 = vrot.slane %v3350_v20, 9  ;;  %v4480_v21 = vsel %vm4442_vm10, %v4342_v7, -inf  ;;  %v4971_v22 = vsel %vm4959_vm13, %v4746_v10, %v4970_v11 }
 0x360   : > { %v3359_v23 = vcombine.high %v3357_v14, %v3357_v14  ;;  %v5181_v5 = vrot.slane %v3357_v14, 9  ;;  %v4483_v27 = vsel %vm4442_vm10, %v4343_v13, -inf  ;;  %v4486_v55 = vsel %vm4442_vm10, %v4344_v2, -inf }
 0x361   : > { %v5180_v24 = vrot.slane %v3358_v15, 9  ;;  %v4334_v26 = vmax.f32 %v3350_v20, %v5179_v16  ;;  %v4489_v32 = vsel %vm4442_vm10, %v4345_v18, -inf }
 0x362   : > { %v5182_v29 = vrot.slane %v3359_v23, 9  ;;  %v4336_v19 = vmax.f32 %v3357_v14, %v5181_v5 }
 0x363   : > { %v4335_v30 = vmax.f32 %v3358_v15, %v5180_v24  ;;  %v4479_v31 = vsel %vm4442_vm10, %v4334_v26, -inf }
 0x364   : > { %v4481_v37 = vmax.f32 %v4479_v31, %v4480_v21  ;;  %v4337_v33 = vmax.f32 %v3359_v23, %v5182_v29  ;;  %v4485_v9 = vsel %vm4442_vm10, %v4336_v19, -inf }
 0x365   : > { %v4482_v34 = vsel %vm4442_vm10, %v4335_v30, -inf  ;;  %v4487_v36 = vmax.f32 %v4485_v9, %v4486_v55 }
 0x366   : > { %v4484_v35 = vmax.f32 %v4482_v34, %v4483_v27  ;;  %v4750_v38 = vrot.slane %v4481_v37, %v6743_v40  ;;  %v4488_v39 = vsel %vm4442_vm10, %v4337_v33, -inf }
 0x367   : > { %v4490_v42 = vmax.f32 %v4488_v39, %v4489_v32  ;;  %v4758_v0 = vrot.slane %v4487_v36, %v6743_v40 }
 0x368   : > { %v4754_v43 = vrot.slane %v4484_v35, %v6743_v40  ;;  %v4972_v12 = vsel %vm4961_vm14, %v4750_v38, %v4971_v22 }
 0x369   : > { %v4762_v41 = vrot.slane %v4490_v42, %v6743_v40 }
 0x36a   : > { %v4973_v44 = vsel %vm4963_vm15, %v4754_v43, %v4972_v12  ;;  %v5471_v45 = vpop.f32.mrb[8].mxu1 }
 0x36b   : > { %v4974_v46 = vsel %vm4965_vm0, %v4758_v0, %v4973_v44  ;;  %v3108_v47 = vadd.f32 %v5471_v45, %v6732_v25  ;;  %v3099_v48 = vpop.f32.mrb[9].mxu1 }
 0x36c   : > { %v4975_v49 = vsel %vm4967_vm1, %v4762_v41, %v4974_v46  ;;  %v3100_v50 = vadd.f32 %v6732_v25, %v3099_v48  ;;  %v5472_v51 = vpop.f32.mrb[10].mxu1 }
 0x36d   : > { %5027 = vst [vmem:[%s6787_s12 + $0x8] sm:$0xff] %v4975_v49  ;;  %v3204_v52 = vmax.f32 %v3108_v47, 0.0  ;;  %v3111_v53 = vadd.f32 %v5472_v51, %v6732_v25  ;;  %v3102_v56 = vpop.f32.mrb[11].mxu1 }
 0x36e   : > { %v3202_v57 = vmax.f32 %v3100_v50, 0.0  ;;  %v3103_v58 = vadd.f32 %v6732_v25, %v3102_v56 }
 0x36f   : > { %v3428_v60 = vcombine.high %v3204_v52, %v3204_v52  ;;  %v3435_v17 = vrot.slane %v3204_v52, %v6735_v28  ;;  %v3205_v54 = vmax.f32 %v3111_v53, 0.0 }
 0x370   : > { %v3394_v59 = vcombine.high %v3202_v57, %v3202_v57  ;;  %v3401_v61 = vrot.slane %v3202_v57, %v6735_v28  ;;  %v3203_v62 = vmax.f32 %v3103_v58, 0.0 }
 0x371   : > { %v3442_v63 = vrot.slane %v3428_v60, %v6735_v28  ;;  %v3443_v1 = vcombine.high %v3435_v17, %v3435_v17  ;;  %v5199_v3 = vrot.slane %v3435_v17, 9  ;;  %v3445_v6 = vcombine.high %v3205_v54, %v3205_v54 }
 0x372   : > { %v3408_v7 = vrot.slane %v3394_v59, %v6735_v28  ;;  %v3409_v8 = vcombine.high %v3401_v61, %v3401_v61  ;;  %v5191_v10 = vrot.slane %v3401_v61, 9  ;;  %v3452_v4 = vrot.slane %v3205_v54, %v6735_v28 }
 0x373   : > { %v3444_v20 = vcombine.high %v3442_v63, %v3442_v63  ;;  %v5200_v11 = vrot.slane %v3443_v1, 9  ;;  %v5201_v13 = vrot.slane %v3442_v63, 9  ;;  %v4354_v2 = vmax.f32 %v3435_v17, %v5199_v3 }
 0x374   : > { %v3410_v14 = vcombine.high %v3408_v7, %v3408_v7  ;;  %v5192_v15 = vrot.slane %v3409_v8, 9  ;;  %v5193_v16 = vrot.slane %v3408_v7, 9  ;;  %v4346_v18 = vmax.f32 %v3401_v61, %v5191_v10 }
 0x375   : > { %v5202_v21 = vrot.slane %v3444_v20, 9  ;;  %v4355_v22 = vmax.f32 %v3443_v1, %v5200_v11  ;;  %v4356_v23 = vmax.f32 %v3442_v63, %v5201_v13  ;;  %v4492_v24 = vsel %vm4442_vm10, %v4354_v2, -inf }
 0x376   : > { %v5194_v5 = vrot.slane %v3410_v14, 9  ;;  %v4347_v26 = vmax.f32 %v3409_v8, %v5192_v15  ;;  %v4348_v27 = vmax.f32 %v3408_v7, %v5193_v16  ;;  %v4491_v55 = vsel %vm4442_vm10, %v4346_v18, -inf }
 0x377   : > { %v4357_v29 = vmax.f32 %v3444_v20, %v5202_v21  ;;  %v4495_v30 = vsel %vm4442_vm10, %v4355_v22, -inf  ;;  %v4498_v19 = vsel %vm4442_vm10, %v4356_v23, -inf  ;;  %v4493_v31 = vmax.f32 %v4491_v55, %v4492_v24 }
 0x378   : > { %v4349_v37 = vmax.f32 %v3410_v14, %v5194_v5  ;;  %v4494_v32 = vsel %vm4442_vm10, %v4347_v26, -inf  ;;  %v4497_v33 = vsel %vm4442_vm10, %v4348_v27, -inf  ;;  %v3459_v34 = vrot.slane %v3445_v6, %v6735_v28 }
 0x379   : > { %v4501_v9 = vsel %vm4442_vm10, %v4357_v29, -inf  ;;  %v4496_v35 = vmax.f32 %v4494_v32, %v4495_v30  ;;  %v4499_v36 = vmax.f32 %v4497_v33, %v4498_v19  ;;  %v4766_v38 = vrot.slane %v4493_v31, %v6743_v40 }
 0x37a   : > { %v4500_v39 = vsel %vm4442_vm10, %v4349_v37, -inf  ;;  %v3460_v42 = vcombine.high %v3452_v4, %v3452_v4  ;;  %v3461_v43 = vcombine.high %v3459_v34, %v3459_v34  ;;  %v5203_v12 = vrot.slane %v3452_v4, 9 }
 0x37b   : > { %v4502_v0 = vmax.f32 %v4500_v39, %v4501_v9  ;;  %v4770_v41 = vrot.slane %v4496_v35, %v6743_v40  ;;  %v4774_v44 = vrot.slane %v4499_v36, %v6743_v40  ;;  %v5205_v45 = vrot.slane %v3459_v34, 9 }
 0x37c   : > { %v5204_v46 = vrot.slane %v3460_v42, 9  ;;  %v5206_v47 = vrot.slane %v3461_v43, 9  ;;  %v4358_v48 = vmax.f32 %v3452_v4, %v5203_v12  ;;  %v3411_v49 = vcombine.high %v3203_v62, %v3203_v62 }
 0x37d   : > { %v4778_v50 = vrot.slane %v4502_v0, %v6743_v40  ;;  %v4976_v51 = vsel %vm4955_vm11, %v4770_v41, %v4766_v38  ;;  %v3418_v52 = vrot.slane %v3203_v62, %v6735_v28  ;;  %v4360_v57 = vmax.f32 %v3459_v34, %v5205_v45 }
 0x37e   : > { %v4977_v53 = vsel %vm4957_vm12, %v4774_v44, %v4976_v51  ;;  %v4359_v56 = vmax.f32 %v3460_v42, %v5204_v46  ;;  %v3425_v58 = vrot.slane %v3411_v49, %v6735_v28  ;;  %v4361_v54 = vmax.f32 %v3461_v43, %v5206_v47 }
 0x37f   : > { %v3426_v60 = vcombine.high %v3418_v52, %v3418_v52  ;;  %v5195_v17 = vrot.slane %v3418_v52, 9  ;;  %v4504_v59 = vsel %vm4442_vm10, %v4358_v48, -inf  ;;  %v4978_v61 = vsel %vm4959_vm13, %v4778_v50, %v4977_v53 }
 0x380   : > { %v3427_v63 = vcombine.high %v3425_v58, %v3425_v58  ;;  %v5197_v3 = vrot.slane %v3425_v58, 9  ;;  %v4507_v7 = vsel %vm4442_vm10, %v4359_v56, -inf  ;;  %v4510_v62 = vsel %vm4442_vm10, %v4360_v57, -inf }
 0x381   : > { %v5196_v1 = vrot.slane %v3426_v60, 9  ;;  %v4350_v6 = vmax.f32 %v3418_v52, %v5195_v17  ;;  %v4513_v13 = vsel %vm4442_vm10, %v4361_v54, -inf }
 0x382   : > { %v5198_v8 = vrot.slane %v3427_v63, 9  ;;  %v4352_v4 = vmax.f32 %v3425_v58, %v5197_v3 }
 0x383   : > { %v4351_v10 = vmax.f32 %v3426_v60, %v5196_v1  ;;  %v4503_v20 = vsel %vm4442_vm10, %v4350_v6, -inf }
 0x384   : > { %v4505_v11 = vmax.f32 %v4503_v20, %v4504_v59  ;;  %v4353_v2 = vmax.f32 %v3427_v63, %v5198_v8  ;;  %v4509_v15 = vsel %vm4442_vm10, %v4352_v4, -inf }
 0x385   : > { %v4506_v14 = vsel %vm4442_vm10, %v4351_v10, -inf  ;;  %v4511_v18 = vmax.f32 %v4509_v15, %v4510_v62 }
 0x386   : > { %v4508_v16 = vmax.f32 %v4506_v14, %v4507_v7  ;;  %v4782_v21 = vrot.slane %v4505_v11, %v6743_v40  ;;  %v5475_v22 = vpop.f32.mrb[12].mxu1  ;;  %v4512_v23 = vsel %vm4442_vm10, %v4353_v2, -inf }
 0x387   : > { %v3124_v24 = vadd.f32 %v5475_v22, %v6732_v25  ;;  %v3115_v5 = vpop.f32.mrb[13].mxu1  ;;  %v4514_v26 = vmax.f32 %v4512_v23, %v4513_v13  ;;  %v4790_v30 = vrot.slane %v4511_v18, %v6743_v40 }
 0x388   : > { %v4786_v27 = vrot.slane %v4508_v16, %v6743_v40  ;;  %v4979_v55 = vsel %vm4961_vm14, %v4782_v21, %v4978_v61  ;;  %v5476_v29 = vpop.f32.mrb[14].mxu1  ;;  %v3116_v31 = vadd.f32 %v6732_v25, %v3115_v5 }
 0x389   : > { %v3208_v19 = vmax.f32 %v3124_v24, 0.0  ;;  %v3127_v37 = vadd.f32 %v5476_v29, %v6732_v25  ;;  %v3118_v32 = vpop.f32.mrb[15].mxu1  ;;  %v4794_v33 = vrot.slane %v4514_v26, %v6743_v40 }
 0x38a   : > { %v4980_v34 = vsel %vm4963_vm15, %v4786_v27, %v4979_v55  ;;  %v3119_v9 = vadd.f32 %v6732_v25, %v3118_v32  ;;  %v3206_v39 = vmax.f32 %v3116_v31, 0.0 }
 0x38b   : > { %v4981_v35 = vsel %vm4965_vm0, %v4790_v30, %v4980_v34  ;;  %v3496_v36 = vcombine.high %v3208_v19, %v3208_v19  ;;  %v3503_v38 = vrot.slane %v3208_v19, %v6735_v28  ;;  %v3209_v43 = vmax.f32 %v3127_v37, 0.0 }
 0x38c   : > { %v4982_v42 = vsel %vm4967_vm1, %v4794_v33, %v4981_v35  ;;  %v6880_v12 = vmax.f32 %v3119_v9, 0.0  ;;  %v3462_v45 = vcombine.high %v3206_v39, %v3206_v39  ;;  %v3469_v46 = vrot.slane %v3206_v39, %v6735_v28 }
 0x38d   : > { %5028 = vst [vmem:[%s6787_s12 + $0x10] sm:$0xff] %v4982_v42  ;;  %v3510_v0 = vrot.slane %v3496_v36, %v6735_v28  ;;  %v3511_v41 = vcombine.high %v3503_v38, %v3503_v38  ;;  %v5215_v44 = vrot.slane %v3503_v38, 9  ;;  %v3513_v47 = vcombine.high %v3209_v43, %v3209_v43 }
 0x38e   : > { %v3520_v48 = vrot.slane %v3209_v43, %v6735_v28  ;;  %v3479_v49 = vcombine.high %v6880_v12, %v6880_v12  ;;  %v3476_v56 = vrot.slane %v3462_v45, %v6735_v28  ;;  %v3477_v57 = vcombine.high %v3469_v46, %v3469_v46 }
 0x38f   : > { %v3512_v50 = vcombine.high %v3510_v0, %v3510_v0  ;;  %v5216_v51 = vrot.slane %v3511_v41, 9  ;;  %v5217_v52 = vrot.slane %v3510_v0, 9  ;;  %v4370_v53 = vmax.f32 %v3503_v38, %v5215_v44 }
 0x390   : > { %v5207_v58 = vrot.slane %v3469_v46, 9  ;;  %v3527_v60 = vrot.slane %v3513_v47, %v6735_v28  ;;  %v3478_v63 = vcombine.high %v3476_v56, %v3476_v56  ;;  %v5208_v1 = vrot.slane %v3477_v57, 9 }
 0x391   : > { %v5218_v17 = vrot.slane %v3512_v50, 9  ;;  %v4371_v54 = vmax.f32 %v3511_v41, %v5216_v51  ;;  %v4372_v59 = vmax.f32 %v3510_v0, %v5217_v52  ;;  %v4516_v61 = vsel %vm4442_vm10, %v4370_v53, -inf }
 0x392   : > { %v5209_v3 = vrot.slane %v3476_v56, 9  ;;  %v4362_v6 = vmax.f32 %v3469_v46, %v5207_v58  ;;  %v3528_v10 = vcombine.high %v3520_v48, %v3520_v48  ;;  %v5210_v4 = vrot.slane %v3478_v63, 9 }
 0x393   : > { %v4373_v7 = vmax.f32 %v3512_v50, %v5218_v17  ;;  %v4519_v62 = vsel %vm4442_vm10, %v4371_v54, -inf  ;;  %v4522_v8 = vsel %vm4442_vm10, %v4372_v59, -inf  ;;  %v4363_v20 = vmax.f32 %v3477_v57, %v5208_v1 }
 0x394   : > { %v4364_v11 = vmax.f32 %v3476_v56, %v5209_v3  ;;  %v4515_v13 = vsel %vm4442_vm10, %v4362_v6, -inf  ;;  %v3529_v15 = vcombine.high %v3527_v60, %v3527_v60  ;;  %v5219_v16 = vrot.slane %v3520_v48, 9 }
 0x395   : > { %v4525_v2 = vsel %vm4442_vm10, %v4373_v7, -inf  ;;  %v4517_v14 = vmax.f32 %v4515_v13, %v4516_v61  ;;  %v4365_v18 = vmax.f32 %v3478_v63, %v5210_v4  ;;  %v4518_v21 = vsel %vm4442_vm10, %v4363_v20, -inf }
 0x396   : > { %v4521_v22 = vsel %vm4442_vm10, %v4364_v11, -inf  ;;  %v5220_v23 = vrot.slane %v3528_v10, 9  ;;  %v4520_v24 = vmax.f32 %v4518_v21, %v4519_v62  ;;  %v5221_v27 = vrot.slane %v3527_v60, 9 }
 0x397   : > { %v4523_v5 = vmax.f32 %v4521_v22, %v4522_v8  ;;  %v4798_v26 = vrot.slane %v4517_v14, %v6743_v40  ;;  %v4524_v55 = vsel %vm4442_vm10, %v4365_v18, -inf  ;;  %v5222_v29 = vrot.slane %v3529_v15, 9 }
 0x398   : > { %v4374_v30 = vmax.f32 %v3520_v48, %v5219_v16  ;;  %v4375_v19 = vmax.f32 %v3528_v10, %v5220_v23  ;;  %v4526_v31 = vmax.f32 %v4524_v55, %v4525_v2  ;;  %v4802_v37 = vrot.slane %v4520_v24, %v6743_v40 }
 0x399   : > { %v4806_v32 = vrot.slane %v4523_v5, %v6743_v40  ;;  %v4376_v33 = vmax.f32 %v3527_v60, %v5221_v27  ;;  %v4377_v34 = vmax.f32 %v3529_v15, %v5222_v29  ;;  %v3486_v36 = vrot.slane %v6880_v12, %v6735_v28 }
 0x39a   : > { %v4528_v9 = vsel %vm4442_vm10, %v4374_v30, -inf  ;;  %v4531_v35 = vsel %vm4442_vm10, %v4375_v19, -inf  ;;  %v4810_v39 = vrot.slane %v4526_v31, %v6743_v40  ;;  %v4983_v42 = vsel %vm4955_vm11, %v4802_v37, %v4798_v26 }
 0x39b   : > { %v5479_v38 = vpop.f32.mrb[16].mxu1  ;;  %v4534_v43 = vsel %vm4442_vm10, %v4376_v33, -inf  ;;  %v3493_v0 = vrot.slane %v3479_v49, %v6735_v28  ;;  %v4984_v44 = vsel %vm4957_vm12, %v4806_v32, %v4983_v42  ;;  %v4537_v45 = vsel %vm4442_vm10, %v4377_v34, -inf }
 0x39c   : > { %v3131_v41 = vpop.f32.mrb[17].mxu1  ;;  %v3494_v46 = vcombine.high %v3486_v36, %v3486_v36  ;;  %v5211_v47 = vrot.slane %v3486_v36, 9  ;;  %v4985_v12 = vsel %vm4959_vm13, %v4810_v39, %v4984_v44  ;;  %v3140_v52 = vadd.f32 %v5479_v38, %v6732_v25 }
 0x39d   : > { %v5480_v48 = vpop.f32.mrb[18].mxu1  ;;  %v3495_v50 = vcombine.high %v3493_v0, %v3493_v0  ;;  %v5213_v51 = vrot.slane %v3493_v0, 9  ;;  %v3132_v58 = vadd.f32 %v6732_v25, %v3131_v41 }
 0x39e   : > { %v3134_v53 = vpop.f32.mrb[19].mxu1  ;;  %v5212_v56 = vrot.slane %v3494_v46, 9  ;;  %v4366_v57 = vmax.f32 %v3486_v36, %v5211_v47  ;;  %v3143_v49 = vadd.f32 %v5480_v48, %v6732_v25  ;;  %v3212_v54 = vmax.f32 %v3140_v52, 0.0 }
 0x39f   : > { %v5214_v60 = vrot.slane %v3495_v50, 9  ;;  %v4368_v17 = vmax.f32 %v3493_v0, %v5213_v51  ;;  %v3135_v59 = vadd.f32 %v6732_v25, %v3134_v53  ;;  %v3210_v1 = vmax.f32 %v3132_v58, 0.0 }
 0x3a0   : > { %v4367_v61 = vmax.f32 %v3494_v46, %v5212_v56  ;;  %v4527_v63 = vsel %vm4442_vm10, %v4366_v57, -inf  ;;  %v3213_v3 = vmax.f32 %v3143_v49, 0.0  ;;  %v3564_v8 = vcombine.high %v3212_v54, %v3212_v54 }
 0x3a1   : > { %v4369_v6 = vmax.f32 %v3495_v50, %v5214_v60  ;;  %v4529_v7 = vmax.f32 %v4527_v63, %v4528_v9  ;;  %v4533_v62 = vsel %vm4442_vm10, %v4368_v17, -inf  ;;  %v3571_v20 = vrot.slane %v3212_v54, %v6735_v28 }
 0x3a2   : > { %v4530_v10 = vsel %vm4442_vm10, %v4367_v61, -inf  ;;  %v4535_v4 = vmax.f32 %v4533_v62, %v4534_v43  ;;  %v3530_v11 = vcombine.high %v3210_v1, %v3210_v1  ;;  %v3578_v14 = vrot.slane %v3564_v8, %v6735_v28 }
 0x3a3   : > { %v4532_v13 = vmax.f32 %v4530_v10, %v4531_v35  ;;  %v4536_v2 = vsel %vm4442_vm10, %v4369_v6, -inf  ;;  %v4814_v25 = vrot.slane %v4529_v7, %v6743_v40  ;;  %v3579_v18 = vcombine.high %v3571_v20, %v3571_v20 }
 0x3a4   : > { %v4538_v15 = vmax.f32 %v4536_v2, %v4537_v45  ;;  %v4822_v16 = vrot.slane %v4535_v4, %v6743_v40  ;;  %v5231_v21 = vrot.slane %v3571_v20, 9  ;;  %v3580_v24 = vcombine.high %v3578_v14, %v3578_v14 }
 0x3a5   : > { %v4818_v22 = vrot.slane %v4532_v13, %v6743_v40  ;;  %v4986_v23 = vsel %vm4961_vm14, %v4814_v25, %v4985_v12  ;;  %v5233_v5 = vrot.slane %v3578_v14, 9  ;;  %v5232_v27 = vrot.slane %v3579_v18, 9 }
 0x3a6   : > { %v4826_v26 = vrot.slane %v4538_v15, %v6743_v40  ;;  %v4386_v55 = vmax.f32 %v3571_v20, %v5231_v21  ;;  %v3537_v29 = vrot.slane %v3210_v1, %v6735_v28  ;;  %v5234_v19 = vrot.slane %v3580_v24, 9 }
 0x3a7   : > { %v4987_v30 = vsel %vm4963_vm15, %v4818_v22, %v4986_v23  ;;  %v4388_v31 = vmax.f32 %v3578_v14, %v5233_v5  ;;  %v3544_v37 = vrot.slane %v3530_v11, %v6735_v28  ;;  %v4387_v33 = vmax.f32 %v3579_v18, %v5232_v27 }
 0x3a8   : > { %v4988_v32 = vsel %vm4965_vm0, %v4822_v16, %v4987_v30  ;;  %v4540_v34 = vsel %vm4442_vm10, %v4386_v55, -inf  ;;  %v3545_v9 = vcombine.high %v3537_v29, %v3537_v29  ;;  %v4389_v36 = vmax.f32 %v3580_v24, %v5234_v19 }
 0x3a9   : > { %v4989_v35 = vsel %vm4967_vm1, %v4826_v26, %v4988_v32  ;;  %v4546_v38 = vsel %vm4442_vm10, %v4388_v31, -inf  ;;  %v3546_v39 = vcombine.high %v3544_v37, %v3544_v37  ;;  %v4543_v42 = vsel %vm4442_vm10, %v4387_v33, -inf }
 0x3aa   : > { %5029 = vst [vmem:[%s6787_s12 + $0x18] sm:$0xff] %v4989_v35  ;;  %v5223_v43 = vrot.slane %v3537_v29, 9  ;;  %v5224_v0 = vrot.slane %v3545_v9, 9  ;;  %v5225_v41 = vrot.slane %v3544_v37, 9  ;;  %v4549_v44 = vsel %vm4442_vm10, %v4389_v36, -inf }
 0x3ab   : > { %v5226_v45 = vrot.slane %v3546_v39, 9  ;;  %v3581_v46 = vcombine.high %v3213_v3, %v3213_v3  ;;  %v3588_v47 = vrot.slane %v3213_v3, %v6735_v28  ;;  %v3211_v12 = vmax.f32 %v3135_v59, 0.0 }
 0x3ac   : > { %v4378_v48 = vmax.f32 %v3537_v29, %v5223_v43  ;;  %v4379_v50 = vmax.f32 %v3545_v9, %v5224_v0  ;;  %v4380_v51 = vmax.f32 %v3544_v37, %v5225_v41  ;;  %v6963_v43 = vld [vmem:[%s7163_s4] ss:$0 sm:$0xff] }
 0x3ad   : > { %v4381_v52 = vmax.f32 %v3546_v39, %v5226_v45  ;;  %v3595_v53 = vrot.slane %v3581_v46, %v6735_v28  ;;  %v3596_v56 = vcombine.high %v3588_v47, %v3588_v47  ;;  %v5235_v57 = vrot.slane %v3588_v47, 9 }
 0x3ae   : > { %v4539_v58 = vsel %vm4442_vm10, %v4378_v48, -inf  ;;  %v4542_v49 = vsel %vm4442_vm10, %v4379_v50, -inf  ;;  %v4545_v60 = vsel %vm4442_vm10, %v4380_v51, -inf  ;;  %v3547_v17 = vcombine.high %v3211_v12, %v3211_v12 }
 0x3af   : > { %v4541_v54 = vmax.f32 %v4539_v58, %v4540_v34  ;;  %v4544_v61 = vmax.f32 %v4542_v49, %v4543_v42  ;;  %v4547_v63 = vmax.f32 %v4545_v60, %v4546_v38  ;;  %v4548_v1 = vsel %vm4442_vm10, %v4381_v52, -inf }
 0x3b0   : > { %v4550_v3 = vmax.f32 %v4548_v1, %v4549_v44  ;;  %v3597_v6 = vcombine.high %v3595_v53, %v3595_v53  ;;  %v5236_v59 = vrot.slane %v3596_v56, 9  ;;  %v5237_v7 = vrot.slane %v3595_v53, 9 }
 0x3b1   : > { %v4830_v62 = vrot.slane %v4541_v54, %v6743_v40  ;;  %v4834_v8 = vrot.slane %v4544_v61, %v6743_v40  ;;  %v4838_v10 = vrot.slane %v4547_v63, %v6743_v40  ;;  %v4390_v11 = vmax.f32 %v3588_v47, %v5235_v57 }
 0x3b2   : > { %v4842_v4 = vrot.slane %v4550_v3, %v6743_v40  ;;  %v5238_v20 = vrot.slane %v3597_v6, 9  ;;  %v4392_v13 = vmax.f32 %v3595_v53, %v5237_v7  ;;  %v3554_v25 = vrot.slane %v3211_v12, %v6735_v28 }
 0x3b3   : > { %v4990_v2 = vsel %vm4955_vm11, %v4834_v8, %v4830_v62  ;;  %v3561_v14 = vrot.slane %v3547_v17, %v6735_v28  ;;  %v4391_v16 = vmax.f32 %v3596_v56, %v5236_v59  ;;  %v4552_v5 = vsel %vm4442_vm10, %v4390_v11, -inf }
 0x3b4   : > { %v4991_v15 = vsel %vm4957_vm12, %v4838_v10, %v4990_v2  ;;  %v4393_v18 = vmax.f32 %v3597_v6, %v5238_v20  ;;  %v3562_v21 = vcombine.high %v3554_v25, %v3554_v25  ;;  %v5227_v23 = vrot.slane %v3554_v25, 9 }
 0x3b5   : > { %v3563_v22 = vcombine.high %v3561_v14, %v3561_v14  ;;  %v5229_v24 = vrot.slane %v3561_v14, 9  ;;  %v4558_v26 = vsel %vm4442_vm10, %v4392_v13, -inf  ;;  %v4992_v27 = vsel %vm4959_vm13, %v4842_v4, %v4991_v15 }
 0x3b6   : > { %v5228_v55 = vrot.slane %v3562_v21, 9  ;;  %v4382_v30 = vmax.f32 %v3554_v25, %v5227_v23  ;;  %v4555_v31 = vsel %vm4442_vm10, %v4391_v16, -inf  ;;  %v4561_v37 = vsel %vm4442_vm10, %v4393_v18, -inf }
 0x3b7   : > { %v5230_v29 = vrot.slane %v3563_v22, 9  ;;  %v4384_v19 = vmax.f32 %v3561_v14, %v5229_v24 }
 0x3b8   : > { %v4383_v32 = vmax.f32 %v3562_v21, %v5228_v55  ;;  %v4551_v34 = vsel %vm4442_vm10, %v4382_v30, -inf }
 0x3b9   : > { %v4385_v33 = vmax.f32 %v3563_v22, %v5230_v29  ;;  %v4557_v9 = vsel %vm4442_vm10, %v4384_v19, -inf  ;;  %v4553_v35 = vmax.f32 %v4551_v34, %v4552_v5 }
 0x3ba   : > { %v4559_v36 = vmax.f32 %v4557_v9, %v4558_v26  ;;  %v4554_v39 = vsel %vm4442_vm10, %v4383_v32, -inf }
 0x3bb   : > { %v4560_v42 = vsel %vm4442_vm10, %v4385_v33, -inf  ;;  %v4556_v44 = vmax.f32 %v4554_v39, %v4555_v31  ;;  %v4846_v46 = vrot.slane %v4553_v35, %v6743_v40 }
 0x3bc   : > { %v4562_v45 = vmax.f32 %v4560_v42, %v4561_v37  ;;  %v4854_v53 = vrot.slane %v4559_v36, %v6743_v40 }
 0x3bd   : > { %v5483_v38 = vpop.f32.mrb[20].mxu1  ;;  %v4850_v52 = vrot.slane %v4556_v44, %v6743_v40  ;;  %v4993_v56 = vsel %vm4961_vm14, %v4846_v46, %v4992_v27 }
 0x3be   : > { %v3156_v0 = vadd.f32 %v6963_v43, %v5483_v38  ;;  %v3147_v41 = vpop.f32.mrb[21].mxu1  ;;  %v4858_v17 = vrot.slane %v4562_v45, %v6743_v40 }
 0x3bf   : > { %v5484_v47 = vpop.f32.mrb[22].mxu1  ;;  %v3148_v50 = vadd.f32 %v6963_v43, %v3147_v41  ;;  %v4994_v54 = vsel %vm4963_vm15, %v4850_v52, %v4993_v56 }
 0x3c0   : > { %v3216_v48 = vmax.f32 %v3156_v0, 0.0  ;;  %v3159_v51 = vadd.f32 %v6963_v43, %v5484_v47  ;;  %v3150_v12 = vpop.f32.mrb[23].mxu1  ;;  %v4995_v63 = vsel %vm4965_vm0, %v4854_v53, %v4994_v54 }
 0x3c1   : > { %v3214_v49 = vmax.f32 %v3148_v50, 0.0  ;;  %v3151_v61 = vadd.f32 %v6963_v43, %v3150_v12  ;;  %v4996_v59 = vsel %vm4967_vm1, %v4858_v17, %v4995_v63 }
 0x3c2   : > { %v3632_v57 = vcombine.high %v3216_v48, %v3216_v48  ;;  %v3639_v58 = vrot.slane %v3216_v48, %v6735_v28  ;;  %v3217_v60 = vmax.f32 %v3159_v51, 0.0  ;;  %5030 = vst [vmem:[%s6787_s12 + $0x20] sm:$0xff] %v4996_v59 }
 0x3c3   : > { %v3598_v7 = vcombine.high %v3214_v49, %v3214_v49  ;;  %v3605_v62 = vrot.slane %v3214_v49, %v6735_v28  ;;  %v3215_v9 = vmax.f32 %v3151_v61, 0.0 }
 0x3c4   : > { %v3646_v1 = vrot.slane %v3632_v57, %v6735_v28  ;;  %v3647_v3 = vcombine.high %v3639_v58, %v3639_v58  ;;  %v5247_v6 = vrot.slane %v3639_v58, 9  ;;  %v3649_v8 = vcombine.high %v3217_v60, %v3217_v60 }
 0x3c5   : > { %v3612_v13 = vrot.slane %v3598_v7, %v6735_v28  ;;  %v3613_v2 = vcombine.high %v3605_v62, %v3605_v62  ;;  %v5239_v25 = vrot.slane %v3605_v62, 9  ;;  %v3656_v14 = vrot.slane %v3217_v60, %v6735_v28 }
 0x3c6   : > { %v3648_v10 = vcombine.high %v3646_v1, %v3646_v1  ;;  %v5248_v4 = vrot.slane %v3647_v3, 9  ;;  %v5249_v20 = vrot.slane %v3646_v1, 9  ;;  %v4402_v11 = vmax.f32 %v3639_v58, %v5247_v6 }
 0x3c7   : > { %v3614_v22 = vcombine.high %v3612_v13, %v3612_v13  ;;  %v5240_v23 = vrot.slane %v3613_v2, 9  ;;  %v5241_v24 = vrot.slane %v3612_v13, 9  ;;  %v4394_v5 = vmax.f32 %v3605_v62, %v5239_v25 }
 0x3c8   : > { %v5250_v15 = vrot.slane %v3648_v10, 9  ;;  %v4403_v16 = vmax.f32 %v3647_v3, %v5248_v4  ;;  %v4404_v18 = vmax.f32 %v3646_v1, %v5249_v20  ;;  %v4564_v21 = vsel %vm4442_vm10, %v4402_v11, -inf }
 0x3c9   : > { %v3663_v29 = vrot.slane %v3649_v8, %v6735_v28  ;;  %v5242_v30 = vrot.slane %v3614_v22, 9  ;;  %v4395_v19 = vmax.f32 %v3613_v2, %v5240_v23  ;;  %v4396_v31 = vmax.f32 %v3612_v13, %v5241_v24 }
 0x3ca   : > { %v4405_v26 = vmax.f32 %v3648_v10, %v5250_v15  ;;  %v4567_v27 = vsel %vm4442_vm10, %v4403_v16, -inf  ;;  %v4570_v55 = vsel %vm4442_vm10, %v4404_v18, -inf  ;;  %v4563_v37 = vsel %vm4442_vm10, %v4394_v5, -inf }
 0x3cb   : > { %v4565_v33 = vmax.f32 %v4563_v37, %v4564_v21  ;;  %v3664_v34 = vcombine.high %v3656_v14, %v3656_v14  ;;  %v4397_v35 = vmax.f32 %v3614_v22, %v5242_v30  ;;  %v4566_v36 = vsel %vm4442_vm10, %v4395_v19, -inf }
 0x3cc   : > { %v4573_v32 = vsel %vm4442_vm10, %v4405_v26, -inf  ;;  %v4569_v38 = vsel %vm4442_vm10, %v4396_v31, -inf  ;;  %v3665_v39 = vcombine.high %v3663_v29, %v3663_v29  ;;  %v4568_v42 = vmax.f32 %v4566_v36, %v4567_v27 }
 0x3cd   : > { %v4571_v0 = vmax.f32 %v4569_v38, %v4570_v55  ;;  %v5251_v41 = vrot.slane %v3656_v14, 9  ;;  %v4572_v44 = vsel %vm4442_vm10, %v4397_v35, -inf  ;;  %v4862_v45 = vrot.slane %v4565_v33, %v6743_v40 }
 0x3ce   : > { %v5253_v46 = vrot.slane %v3663_v29, 9  ;;  %v4574_v47 = vmax.f32 %v4572_v44, %v4573_v32  ;;  %v4866_v48 = vrot.slane %v4568_v42, %v6743_v40  ;;  %v5252_v51 = vrot.slane %v3664_v34, 9 }
 0x3cf   : > { %v4870_v50 = vrot.slane %v4571_v0, %v6743_v40  ;;  %v5254_v12 = vrot.slane %v3665_v39, 9  ;;  %v3615_v52 = vcombine.high %v3215_v9, %v3215_v9  ;;  %v4406_v57 = vmax.f32 %v3656_v14, %v5251_v41 }
 0x3d0   : > { %v4874_v53 = vrot.slane %v4574_v47, %v6743_v40  ;;  %v4997_v56 = vsel %vm4955_vm11, %v4866_v48, %v4862_v45  ;;  %v3622_v58 = vrot.slane %v3215_v9, %v6735_v28  ;;  %v4408_v60 = vmax.f32 %v3663_v29, %v5253_v46 }
 0x3d1   : > { %v4998_v49 = vsel %vm4957_vm12, %v4870_v50, %v4997_v56  ;;  %v3629_v17 = vrot.slane %v3615_v52, %v6735_v28  ;;  %v4407_v54 = vmax.f32 %v3664_v34, %v5252_v51  ;;  %v4409_v3 = vmax.f32 %v3665_v39, %v5254_v12 }
 0x3d2   : > { %v3630_v61 = vcombine.high %v3622_v58, %v3622_v58  ;;  %v5243_v63 = vrot.slane %v3622_v58, 9  ;;  %v4999_v1 = vsel %vm4959_vm13, %v4874_v53, %v4998_v49  ;;  %v4576_v7 = vsel %vm4442_vm10, %v4406_v57, -inf }
 0x3d3   : > { %v3631_v6 = vcombine.high %v3629_v17, %v3629_v17  ;;  %v5245_v59 = vrot.slane %v3629_v17, 9  ;;  %v4582_v10 = vsel %vm4442_vm10, %v4408_v60, -inf  ;;  %v4579_v11 = vsel %vm4442_vm10, %v4407_v54, -inf }
 0x3d4   : > { %v5244_v62 = vrot.slane %v3630_v61, 9  ;;  %v4398_v8 = vmax.f32 %v3622_v58, %v5243_v63  ;;  %v4585_v25 = vsel %vm4442_vm10, %v4409_v3, -inf }
 0x3d5   : > { %v5246_v4 = vrot.slane %v3631_v6, 9  ;;  %v4400_v20 = vmax.f32 %v3629_v17, %v5245_v59 }
 0x3d6   : > { %v4399_v13 = vmax.f32 %v3630_v61, %v5244_v62  ;;  %v4575_v2 = vsel %vm4442_vm10, %v4398_v8, -inf }
 0x3d7   : > { %v4401_v14 = vmax.f32 %v3631_v6, %v5246_v4  ;;  %v4577_v15 = vmax.f32 %v4575_v2, %v4576_v7  ;;  %v4581_v16 = vsel %vm4442_vm10, %v4400_v20, -inf }
 0x3d8   : > { %v4578_v18 = vsel %vm4442_vm10, %v4399_v13, -inf  ;;  %v4583_v21 = vmax.f32 %v4581_v16, %v4582_v10 }
 0x3d9   : > { %v4580_v22 = vmax.f32 %v4578_v18, %v4579_v11  ;;  %v4584_v23 = vsel %vm4442_vm10, %v4401_v14, -inf  ;;  %v4878_v24 = vrot.slane %v4577_v15, %v6743_v40 }
 0x3da   : > { %v4586_v5 = vmax.f32 %v4584_v23, %v4585_v25  ;;  %v4886_v55 = vrot.slane %v4583_v21, %v6743_v40 }
 0x3db   : > { %v4882_v26 = vrot.slane %v4580_v22, %v6743_v40  ;;  %v5000_v27 = vsel %vm4961_vm14, %v4878_v24, %v4999_v1 }
 0x3dc   : > { %v4890_v30 = vrot.slane %v4586_v5, %v6743_v40 }
 0x3dd   : > { %v5487_v29 = vpop.f32.mrb[24].mxu1  ;;  %v5001_v19 = vsel %vm4963_vm15, %v4882_v26, %v5000_v27 }
 0x3de   : > { %v3172_v31 = vadd.f32 %v6963_v43, %v5487_v29  ;;  %v3163_v37 = vpop.f32.mrb[25].mxu1  ;;  %v5002_v32 = vsel %vm4965_vm0, %v4886_v55, %v5001_v19 }
 0x3df   : > { %v3164_v33 = vadd.f32 %v6963_v43, %v3163_v37  ;;  %v5488_v34 = vpop.f32.mrb[26].mxu1  ;;  %v5003_v9 = vsel %vm4967_vm1, %v4890_v30, %v5002_v32 }
 0x3e0   : > { %v3220_v35 = vmax.f32 %v3172_v31, 0.0  ;;  %v3175_v36 = vadd.f32 %v6963_v43, %v5488_v34  ;;  %v3166_v38 = vpop.f32.mrb[27].mxu1  ;;  %5031 = vst [vmem:[%s6787_s12 + $0x28] sm:$0xff] %v5003_v9 }
 0x3e1   : > { %v3218_v39 = vmax.f32 %v3164_v33, 0.0  ;;  %v3167_v42 = vadd.f32 %v6963_v43, %v3166_v38 }
 0x3e2   : > { %v3700_v0 = vcombine.high %v3220_v35, %v3220_v35  ;;  %v3707_v41 = vrot.slane %v3220_v35, %v6735_v28  ;;  %v3221_v44 = vmax.f32 %v3175_v36, 0.0 }
 0x3e3   : > { %v3666_v45 = vcombine.high %v3218_v39, %v3218_v39  ;;  %v3673_v46 = vrot.slane %v3218_v39, %v6735_v28  ;;  %v3219_v47 = vmax.f32 %v3167_v42, 0.0 }
 0x3e4   : > { %v3714_v48 = vrot.slane %v3700_v0, %v6735_v28  ;;  %v3715_v50 = vcombine.high %v3707_v41, %v3707_v41  ;;  %v5263_v51 = vrot.slane %v3707_v41, 9  ;;  %v3717_v12 = vcombine.high %v3221_v44, %v3221_v44 }
 0x3e5   : > { %v3680_v52 = vrot.slane %v3666_v45, %v6735_v28  ;;  %v3681_v53 = vcombine.high %v3673_v46, %v3673_v46  ;;  %v5255_v56 = vrot.slane %v3673_v46, 9  ;;  %v3724_v57 = vrot.slane %v3221_v44, %v6735_v28 }
 0x3e6   : > { %v3716_v58 = vcombine.high %v3714_v48, %v3714_v48  ;;  %v5264_v49 = vrot.slane %v3715_v50, 9  ;;  %v5265_v60 = vrot.slane %v3714_v48, 9  ;;  %v4418_v17 = vmax.f32 %v3707_v41, %v5263_v51 }
 0x3e7   : > { %v3682_v54 = vcombine.high %v3680_v52, %v3680_v52  ;;  %v5256_v61 = vrot.slane %v3681_v53, 9  ;;  %v5257_v63 = vrot.slane %v3680_v52, 9  ;;  %v4410_v1 = vmax.f32 %v3673_v46, %v5255_v56 }
 0x3e8   : > { %v5266_v3 = vrot.slane %v3716_v58, 9  ;;  %v4419_v6 = vmax.f32 %v3715_v50, %v5264_v49  ;;  %v4420_v59 = vmax.f32 %v3714_v48, %v5265_v60  ;;  %v4588_v7 = vsel %vm4442_vm10, %v4418_v17, -inf }
 0x3e9   : > { %v5258_v62 = vrot.slane %v3682_v54, 9  ;;  %v4411_v8 = vmax.f32 %v3681_v53, %v5256_v61  ;;  %v4412_v10 = vmax.f32 %v3680_v52, %v5257_v63  ;;  %v4587_v4 = vsel %vm4442_vm10, %v4410_v1, -inf }
 0x3ea   : > { %v4421_v20 = vmax.f32 %v3716_v58, %v5266_v3  ;;  %v4591_v11 = vsel %vm4442_vm10, %v4419_v6, -inf  ;;  %v4594_v13 = vsel %vm4442_vm10, %v4420_v59, -inf  ;;  %v4589_v2 = vmax.f32 %v4587_v4, %v4588_v7 }
 0x3eb   : > { %v4413_v25 = vmax.f32 %v3682_v54, %v5258_v62  ;;  %v4590_v14 = vsel %vm4442_vm10, %v4411_v8, -inf  ;;  %v4593_v15 = vsel %vm4442_vm10, %v4412_v10, -inf  ;;  %v3731_v16 = vrot.slane %v3717_v12, %v6735_v28 }
 0x3ec   : > { %v4597_v18 = vsel %vm4442_vm10, %v4421_v20, -inf  ;;  %v4592_v21 = vmax.f32 %v4590_v14, %v4591_v11  ;;  %v4595_v22 = vmax.f32 %v4593_v15, %v4594_v13  ;;  %v4894_v23 = vrot.slane %v4589_v2, %v6743_v40 }
 0x3ed   : > { %v4596_v24 = vsel %vm4442_vm10, %v4413_v25, -inf  ;;  %v3732_v5 = vcombine.high %v3724_v57, %v3724_v57  ;;  %v3733_v26 = vcombine.high %v3731_v16, %v3731_v16  ;;  %v5267_v27 = vrot.slane %v3724_v57, 9 }
 0x3ee   : > { %v4598_v55 = vmax.f32 %v4596_v24, %v4597_v18  ;;  %v4898_v29 = vrot.slane %v4592_v21, %v6743_v40  ;;  %v4902_v30 = vrot.slane %v4595_v22, %v6743_v40  ;;  %v5269_v19 = vrot.slane %v3731_v16, 9 }
 0x3ef   : > { %v5268_v31 = vrot.slane %v3732_v5, 9  ;;  %v5270_v37 = vrot.slane %v3733_v26, 9  ;;  %v4422_v32 = vmax.f32 %v3724_v57, %v5267_v27  ;;  %v3683_v33 = vcombine.high %v3219_v47, %v3219_v47 }
 0x3f0   : > { %v4906_v34 = vrot.slane %v4598_v55, %v6743_v40  ;;  %v5004_v9 = vsel %vm4955_vm11, %v4898_v29, %v4894_v23  ;;  %v3690_v35 = vrot.slane %v3219_v47, %v6735_v28  ;;  %v4424_v39 = vmax.f32 %v3731_v16, %v5269_v19 }
 0x3f1   : > { %v5005_v36 = vsel %vm4957_vm12, %v4902_v30, %v5004_v9  ;;  %v4423_v38 = vmax.f32 %v3732_v5, %v5268_v31  ;;  %v3697_v42 = vrot.slane %v3683_v33, %v6735_v28  ;;  %v4425_v44 = vmax.f32 %v3733_v26, %v5270_v37 }
 0x3f2   : > { %v3698_v0 = vcombine.high %v3690_v35, %v3690_v35  ;;  %v5259_v41 = vrot.slane %v3690_v35, 9  ;;  %v4600_v45 = vsel %vm4442_vm10, %v4422_v32, -inf  ;;  %v5006_v46 = vsel %vm4959_vm13, %v4906_v34, %v5005_v36 }
 0x3f3   : > { %v3699_v48 = vcombine.high %v3697_v42, %v3697_v42  ;;  %v5261_v51 = vrot.slane %v3697_v42, 9  ;;  %v4603_v52 = vsel %vm4442_vm10, %v4423_v38, -inf  ;;  %v4606_v47 = vsel %vm4442_vm10, %v4424_v39, -inf }
 0x3f4   : > { %v5260_v50 = vrot.slane %v3698_v0, 9  ;;  %v4414_v12 = vmax.f32 %v3690_v35, %v5259_v41  ;;  %v4609_v60 = vsel %vm4442_vm10, %v4425_v44, -inf }
 0x3f5   : > { %v5262_v53 = vrot.slane %v3699_v48, 9  ;;  %v4416_v57 = vmax.f32 %v3697_v42, %v5261_v51 }
 0x3f6   : > { %v4415_v56 = vmax.f32 %v3698_v0, %v5260_v50  ;;  %v4599_v58 = vsel %vm4442_vm10, %v4414_v12, -inf }
 0x3f7   : > { %v4601_v49 = vmax.f32 %v4599_v58, %v4600_v45  ;;  %v4417_v17 = vmax.f32 %v3699_v48, %v5262_v53  ;;  %v4605_v61 = vsel %vm4442_vm10, %v4416_v57, -inf }
 0x3f8   : > { %v4602_v54 = vsel %vm4442_vm10, %v4415_v56, -inf  ;;  %v4607_v1 = vmax.f32 %v4605_v61, %v4606_v47 }
 0x3f9   : > { %v4604_v63 = vmax.f32 %v4602_v54, %v4603_v52  ;;  %v4910_v3 = vrot.slane %v4601_v49, %v6743_v40  ;;  %v4608_v6 = vsel %vm4442_vm10, %v4417_v17, -inf }
 0x3fa   : > { %v4610_v59 = vmax.f32 %v4608_v6, %v4609_v60  ;;  %v4918_v8 = vrot.slane %v4607_v1, %v6743_v40 }
 0x3fb   : > { %v4914_v7 = vrot.slane %v4604_v63, %v6743_v40  ;;  %v5007_v62 = vsel %vm4961_vm14, %v4910_v3, %v5006_v46 }
 0x3fc   : > { %v4922_v10 = vrot.slane %v4610_v59, %v6743_v40 }
 0x3fd   : > { %v5008_v4 = vsel %vm4963_vm15, %v4914_v7, %v5007_v62 }
 0x3fe   : > { %v5009_v20 = vsel %vm4965_vm0, %v4918_v8, %v5008_v4 }
 0x3ff   : > { %v5010_v11 = vsel %vm4967_vm1, %v4922_v10, %v5009_v20 }
 0x400   : > { %5032 = vst [vmem:[%s6787_s12 + $0x30] sm:$0xff] %v5010_v11  ;;  %v5491_v13 = vpop.f32.mrb[28].mxu1 }
 0x401   : > { %v3188_v2 = vadd.f32 %v6963_v43, %v5491_v13  ;;  %v3179_v25 = vpop.f32.mrb[29].mxu1 }
 0x402   : > { %v3180_v14 = vadd.f32 %v6963_v43, %v3179_v25  ;;  %v5492_v15 = vpop.f32.mrb[30].mxu1 }
 0x403   : > { %v3224_v16 = vmax.f32 %v3188_v2, 0.0  ;;  %v3191_v18 = vadd.f32 %v6963_v43, %v5492_v15  ;;  %v3182_v21 = vpop.f32.mrb[31].mxu1 }
 0x404   : > { %v3222_v22 = vmax.f32 %v3180_v14, 0.0  ;;  %v3183_v23 = vadd.f32 %v6963_v43, %v3182_v21 }
 0x405   : > { %v3768_v24 = vcombine.high %v3224_v16, %v3224_v16  ;;  %v3775_v5 = vrot.slane %v3224_v16, %v6735_v28  ;;  %v3225_v26 = vmax.f32 %v3191_v18, 0.0 }
 0x406   : > { %v3734_v27 = vcombine.high %v3222_v22, %v3222_v22  ;;  %v3741_v55 = vrot.slane %v3222_v22, %v6735_v28  ;;  %v3223_v29 = vmax.f32 %v3183_v23, 0.0 }
 0x407   : > { %v3782_v30 = vrot.slane %v3768_v24, %v6735_v28  ;;  %v3783_v19 = vcombine.high %v3775_v5, %v3775_v5  ;;  %v5279_v31 = vrot.slane %v3775_v5, 9  ;;  %v3785_v37 = vcombine.high %v3225_v26, %v3225_v26 }
 0x408   : > { %v3748_v32 = vrot.slane %v3734_v27, %v6735_v28  ;;  %v3749_v33 = vcombine.high %v3741_v55, %v3741_v55  ;;  %v5271_v34 = vrot.slane %v3741_v55, 9  ;;  %v3792_v9 = vrot.slane %v3225_v26, %v6735_v28 }
 0x409   : > { %v3784_v43 = vcombine.high %v3782_v30, %v3782_v30  ;;  %v5280_v35 = vrot.slane %v3783_v19, 9  ;;  %v5281_v36 = vrot.slane %v3782_v30, 9  ;;  %v4434_v38 = vmax.f32 %v3775_v5, %v5279_v31 }
 0x40a   : > { %v3750_v39 = vcombine.high %v3748_v32, %v3748_v32  ;;  %v5272_v42 = vrot.slane %v3749_v33, 9  ;;  %v5273_v0 = vrot.slane %v3748_v32, 9  ;;  %v4426_v41 = vmax.f32 %v3741_v55, %v5271_v34 }
 0x40b   : > { %v5282_v44 = vrot.slane %v3784_v43, 9  ;;  %v4435_v45 = vmax.f32 %v3783_v19, %v5280_v35  ;;  %v4436_v46 = vmax.f32 %v3782_v30, %v5281_v36  ;;  %v4612_v48 = vsel %vm4442_vm10, %v4434_v38, -inf }
 0x40c   : > { %v5274_v50 = vrot.slane %v3750_v39, 9  ;;  %v4427_v51 = vmax.f32 %v3749_v33, %v5272_v42  ;;  %v4428_v12 = vmax.f32 %v3748_v32, %v5273_v0  ;;  %v4611_v52 = vsel %vm4442_vm10, %v4426_v41, -inf }
 0x40d   : > { %v4437_v47 = vmax.f32 %v3784_v43, %v5282_v44  ;;  %v4615_v53 = vsel %vm4442_vm10, %v4435_v45, -inf  ;;  %v4618_v56 = vsel %vm4442_vm10, %v4436_v46, -inf  ;;  %v4613_v57 = vmax.f32 %v4611_v52, %v4612_v48 }
 0x40e   : > { %v4429_v58 = vmax.f32 %v3750_v39, %v5274_v50  ;;  %v4614_v49 = vsel %vm4442_vm10, %v4427_v51, -inf  ;;  %v4617_v60 = vsel %vm4442_vm10, %v4428_v12, -inf  ;;  %v3799_v17 = vrot.slane %v3785_v37, %v6735_v28 }
 0x40f   : > { %v4621_v54 = vsel %vm4442_vm10, %v4437_v47, -inf  ;;  %v4616_v61 = vmax.f32 %v4614_v49, %v4615_v53  ;;  %v4619_v63 = vmax.f32 %v4617_v60, %v4618_v56  ;;  %v4926_v1 = vrot.slane %v4613_v57, %v6743_v40 }
 0x410   : > { %v4620_v3 = vsel %vm4442_vm10, %v4429_v58, -inf  ;;  %v3800_v6 = vcombine.high %v3792_v9, %v3792_v9  ;;  %v3801_v59 = vcombine.high %v3799_v17, %v3799_v17  ;;  %v5283_v7 = vrot.slane %v3792_v9, 9 }
 0x411   : > { %v4622_v62 = vmax.f32 %v4620_v3, %v4621_v54  ;;  %v4930_v8 = vrot.slane %v4616_v61, %v6743_v40  ;;  %v4934_v10 = vrot.slane %v4619_v63, %v6743_v40  ;;  %v5285_v4 = vrot.slane %v3799_v17, 9 }
 0x412   : > { %v5284_v20 = vrot.slane %v3800_v6, 9  ;;  %v5286_v11 = vrot.slane %v3801_v59, 9  ;;  %v4438_v13 = vmax.f32 %v3792_v9, %v5283_v7  ;;  %v3751_v2 = vcombine.high %v3223_v29, %v3223_v29 }
 0x413   : > { %v4938_v25 = vrot.slane %v4622_v62, %v6743_v40  ;;  %v5011_v14 = vsel %vm4955_vm11, %v4930_v8, %v4926_v1  ;;  %v3758_v15 = vrot.slane %v3223_v29, %v6735_v28  ;;  %v4440_v21 = vmax.f32 %v3799_v17, %v5285_v4 }
 0x414   : > { %v5012_v16 = vsel %vm4957_vm12, %v4934_v10, %v5011_v14  ;;  %v4439_v18 = vmax.f32 %v3800_v6, %v5284_v20  ;;  %v3765_v22 = vrot.slane %v3751_v2, %v6735_v28  ;;  %v4441_v5 = vmax.f32 %v3801_v59, %v5286_v11 }
 0x415   : > { %v3766_v23 = vcombine.high %v3758_v15, %v3758_v15  ;;  %v5275_v24 = vrot.slane %v3758_v15, 9  ;;  %v4624_v26 = vsel %vm4442_vm10, %v4438_v13, -inf  ;;  %v5013_v27 = vsel %vm4959_vm13, %v4938_v25, %v5012_v16 }
 0x416   : > { %v3767_v55 = vcombine.high %v3765_v22, %v3765_v22  ;;  %v5277_v19 = vrot.slane %v3765_v22, 9  ;;  %v4627_v29 = vsel %vm4442_vm10, %v4439_v18, -inf  ;;  %v4630_v37 = vsel %vm4442_vm10, %v4440_v21, -inf }
 0x417   : > { %v5276_v30 = vrot.slane %v3766_v23, 9  ;;  %v4430_v31 = vmax.f32 %v3758_v15, %v5275_v24  ;;  %v4633_v43 = vsel %vm4442_vm10, %v4441_v5, -inf }
 0x418   : > { %v5278_v32 = vrot.slane %v3767_v55, 9  ;;  %v4432_v28 = vmax.f32 %v3765_v22, %v5277_v19 }
 0x419   : > { %v4431_v33 = vmax.f32 %v3766_v23, %v5276_v30  ;;  %v4623_v34 = vsel %vm4442_vm10, %v4430_v31, -inf }
 0x41a   : > { %v4625_v9 = vmax.f32 %v4623_v34, %v4624_v26  ;;  %v4433_v35 = vmax.f32 %v3767_v55, %v5278_v32  ;;  %v4629_v38 = vsel %vm4442_vm10, %v4432_v28, -inf }
 0x41b   : > { %v4626_v36 = vsel %vm4442_vm10, %v4431_v33, -inf  ;;  %v4631_v42 = vmax.f32 %v4629_v38, %v4630_v37 }
 0x41c   : > { %v4628_v39 = vmax.f32 %v4626_v36, %v4627_v29  ;;  %v4942_v0 = vrot.slane %v4625_v9, %v6743_v40  ;;  %v4632_v41 = vsel %vm4442_vm10, %v4433_v35, -inf }
 0x41d   : > { %v4634_v44 = vmax.f32 %v4632_v41, %v4633_v43  ;;  %v4950_v48 = vrot.slane %v4631_v42, %v6743_v40 }
 0x41e   : > { %v4946_v45 = vrot.slane %v4628_v39, %v6743_v40  ;;  %v5014_v46 = vsel %vm4961_vm14, %v4942_v0, %v5013_v27 }
 0x41f   : > { %v4954_v50 = vrot.slane %v4634_v44, %v6743_v40 }
 0x420   : > { %v5015_v51 = vsel %vm4963_vm15, %v4946_v45, %v5014_v46 }
 0x421   : > { %v5016_v12 = vsel %vm4965_vm0, %v4950_v48, %v5015_v51 }
 0x422   : > { %v5017_v52 = vsel %vm4967_vm1, %v4954_v50, %v5016_v12 }
 0x423   : > { %5033 = vst [vmem:[%s6787_s12 + $0x38] sm:$0xff] %v5017_v52 }
 0x424   : > { %5571 = shalt.err (!%p5568_p3)
}
 0x425   : > { %s5572_s15 = scalar_lea.hbm %s7108_s8, 1024  ;;  %s5576_s12 = scalar_lea.hbm %s7164_s5, 2048 }
 0x426   : > { %p5573_p4 = scmp.ne.s32.totalorder %s7108_s8, %s5572_s15  ;;  %p5577_p9 = scmp.lt.u32.totalorder %s7108_s8, %s7164_s5 }
 0x427   : > { %p5578_p10 = scmp.lt.u32.totalorder %s5576_s12, %s5572_s15  ;;  %p5580_p12 = scmp.lt.u32.totalorder %s5572_s15, %s7108_s8 }
 0x428   : > { %p5574_p7 = pnand %p5573_p4, %p5706_p5 }
 0x429   : > { %p5579_p11 = por %p5578_p10, %p5577_p9 }
 0x42a   : > { %p5575_p8 = pneg %p5574_p7 }
 0x42b   : > { %p5581_p13 = por %p5580_p12, %p5579_p11 }
 0x42d   : > { %p5582_p0 = pnand %p5581_p13, %p5575_p8 }
 0x42f   : > { %5585 = shalt.err (!%p5582_p0)
}
 0x430   : > { %s5637_s25 = smov 128  }
 0x431   : > { %5495 = dma.vmem_to_hbm [thread:$0]  (%p5706_p5), %s7111_s26, 1024, %s7108_s8, %s7117_s22, %s5637_s25, %s5637_s25, %s5624_s11  }
 0x432 PF: > { %p5501_p1 = scmp.ge.s32.totalorder %s5620_s21, 2  ;;  %s5063_s30 = sand.u32 1, %s5608_s18  }
 0x433   : > { %s5064_s6 = scalar_lea.sflag [#allocation7], %s5063_s30 }
 0x434   : > { %p5498_p2 = pnand %p5501_p1, %p5710_p6 }
 0x436   : > { %5603 = dma.done.wait (!%p5498_p2), %s5064_s6, 1024  }
 0x437   : > { %5605 = vsyncadd (!%p5498_p2), %s5064_s6, 4294966272  ;;  %p15_p3 = scmp.ge.s32.totalorder %s5693_s24, 4   ;;  %s7167_s18 = smov %s5612_s19 }
 0x438   : > { %s7168_s19 = smov %s5616_s20  ;;  %s7169_s20 = smov %s5704_s27 }
 0x439   : > { %s7170_s21 = smov %s5693_s24  ;;  %17 = sbr.rel (!%p15_p3) target bundleno = 3 (0x3), region = 81 }
 0x440   :  { %5069 = vsyncpa [#allocation7], 1 }
 0x441   :  { %5071 = vsyncpa [#allocation7 + $0x1], 1 }

</bundles_post_ra>
